<compile_context>
chip_gen: v5e
topology: v5e:2x2
jax: 0.10.0
libtpu: 0.0.40
codegen_flags: <defaults>
</compile_context>

<pallas_src>
import math

import jax
import jax.numpy as jnp
from jax.experimental import pallas as pl
from jax.experimental.pallas import tpu as pltpu


_PALLAS_FLOAT_DTYPES = (
    jnp.dtype(jnp.float32),
    jnp.dtype(jnp.bfloat16),
    jnp.dtype(jnp.float16),
)


def _h_sigmoid_kernel(x_ref, o_ref):
    # relu6(x + 3) / 6 == clamp(x + 3, 0, 6) * (1/6), computed in f32.
    x = x_ref[...].astype(jnp.float32)
    o_ref[...] = (jnp.clip(x + 3.0, 0.0, 6.0) * (1.0 / 6.0)).astype(o_ref.dtype)


def _h_sigmoid_jnp(x):
    y = jnp.clip(x.astype(jnp.float32) + 3.0, 0.0, 6.0) * (1.0 / 6.0)
    return y.astype(x.dtype)


def _round_up(v, m):
    return -(-v // m) * m


def _chip_params():
    """Per-generation (target_block_bytes, vmem_limit_bytes, dual_tensorcore)."""
    kind = ""
    try:
        kind = jax.devices()[0].device_kind.lower()
    except Exception:  # defensive: interpret mode / exotic backends
        pass
    if "v7" in kind:
        # 2 TCs/chip, 64 MiB physical VMEM (32 MiB scoped default), ~3.2 TB/s
        # HBM: 6 MiB blocks (24 MiB resident with in+out double-buffering),
        # raise the scoped limit explicitly so the compiler has headroom.
        return 6 * 1024 * 1024, 48 * 1024 * 1024, True
    if "v6" in kind:
        # 128 MiB physical VMEM (32 MiB scoped default): 4 MiB blocks ->
        # 16 MiB resident, no limit change needed.
        return 4 * 1024 * 1024, None, False
    # v5e (16 MiB scoped default) and anything unrecognized: 2 MiB blocks
    # (8 MiB resident) is safe everywhere; at 0.82 TB/s HBM the step overhead
    # is already small, so v5e mostly just must not regress.
    return 2 * 1024 * 1024, None, False


def h_sigmoid(x, *, min_pallas_elems=1 << 20, donate_input=False):
    """Elementwise h_sigmoid. Uses a Pallas TPU kernel for large float inputs."""
    n = int(math.prod(x.shape))

    # Fallback: small inputs (launch + 1-2 grid steps is no faster than the
    # XLA-fused expression, which is already HBM-bound), element counts not a
    # multiple of 128 (would force padded HBM copies on both sides), or
    # dtypes we do not want in the kernel (ints, fp8, f64, ...).
    if (
        n < min_pallas_elems
        or n % 128 != 0
        or jnp.dtype(x.dtype) not in _PALLAS_FLOAT_DTYPES
    ):
        return _h_sigmoid_jnp(x)

    dtype = x.dtype
    itemsize = jnp.dtype(dtype).itemsize
    target_block_bytes, vmem_limit_bytes, dual_tc = _chip_params()

    # Lane-dense 2-D view: widest last dim (multiple of 128) dividing n
    # evenly. NOTE: this reshape is only free for the default contiguous
    # layout; transposed/tiled producers would make XLA insert HBM copies.
    lane_w = 128
    for cand in (4096, 2048, 1024, 512, 256):
        if n % cand == 0:
            lane_w = cand
            break
    rows = n // lane_w
    x2d = x.reshape(rows, lane_w)

    # Sub-32-bit dtypes pack along sublanes: (8,128) f32, (16,128) bf16/f16.
    sublane_min = max(8, 32 // itemsize)
    target_rows = max(
        sublane_min,
        (target_block_bytes // (lane_w * itemsize)) // sublane_min * sublane_min,
    )

    total_bytes = n * itemsize
    if dual_tc and rows > sublane_min:
        # Two TensorCores: give each core enough grid steps to overlap input
        # DMA / compute / writeback (>= 4 steps per core on large data).
        if total_bytes >= 8 * target_block_bytes:
            min_steps = 8
        elif total_bytes >= 2 * target_block_bytes:
            min_steps = 4
        else:
            min_steps = 2
        block_rows = min(target_rows, _round_up(pl.cdiv(rows, min_steps), sublane_min))
        block_rows = min(block_rows, rows)
    elif rows <= target_rows:
        # Single TensorCore and the data fits one target block: take it in
        # one step (full-extent block, no masked-store epilogue).
        block_rows = rows
    else:
        block_rows = target_rows

    grid = (pl.cdiv(rows, block_rows),)

    cp_kwargs = dict(dimension_semantics=("parallel",))
    # pltpu.CORE_PARALLEL on the grid axis is a candidate for v7x once a trace
    # confirms both TCs issue DMAs; "parallel" is the safe, documented default
    # that megacore sharding keys off today.
    if vmem_limit_bytes is not None:
        cp_kwargs["vmem_limit_bytes"] = vmem_limit_bytes

    out2d = pl.pallas_call(
        _h_sigmoid_kernel,
        out_shape=jax.ShapeDtypeStruct((rows, lane_w), dtype),
        grid=grid,
        in_specs=[pl.BlockSpec((block_rows, lane_w), lambda i: (i, 0))],
        out_specs=pl.BlockSpec((block_rows, lane_w), lambda i: (i, 0)),
        input_output_aliases=({0: 0} if donate_input else {}),
        compiler_params=pltpu.CompilerParams(**cp_kwargs),
    )(x2d)

    return out2d.reshape(x.shape)


if __name__ == "__main__":
    key = jax.random.PRNGKey(0)
    k1, k2, k3 = jax.random.split(key, 3)

    # Small NCHW input (typical CSDI usage) -> fused jnp fast path.
    x_small = jax.random.normal(k1, (2, 4, 16, 16), dtype=jnp.float32) * 4.0
    y_small = jax.block_until_ready(h_sigmoid(x_small))
    ref_small = jnp.clip(x_small + 3.0, 0.0, 6.0) / 6.0
    assert y_small.shape == x_small.shape and y_small.dtype == x_small.dtype
    assert jnp.allclose(y_small, ref_small, atol=1e-6), "small-path mismatch"

    # 1M-element f32 input -> exercises the Pallas kernel path.
    x_big = jax.random.normal(k2, (2, 16, 64, 512), dtype=jnp.float32) * 4.0
    y_big = jax.block_until_ready(h_sigmoid(x_big))
    ref_big = jnp.clip(x_big + 3.0, 0.0, 6.0) / 6.0
    assert y_big.shape == x_big.shape and y_big.dtype == x_big.dtype
    assert jnp.allclose(y_big, ref_big, atol=1e-6), "pallas-path mismatch"

    # bf16 through the Pallas path (f32 internal compute, cast back).
    x_bf16 = (jax.random.normal(k3, (2, 16, 64, 512), dtype=jnp.float32) * 4.0).astype(
        jnp.bfloat16
    )
    y_bf16 = jax.block_until_ready(h_sigmoid(x_bf16))
    ref_bf16 = (jnp.clip(x_bf16.astype(jnp.float32) + 3.0, 0.0, 6.0) / 6.0).astype(
        jnp.bfloat16
    )
    assert y_bf16.shape == x_bf16.shape and y_bf16.dtype == jnp.bfloat16
    assert jnp.allclose(
        y_bf16.astype(jnp.float32), ref_bf16.astype(jnp.float32), atol=1e-2
    ), "bf16 pallas-path mismatch"

    print("KERNEL_OK")
</pallas_src>

<mosaic_0001>
module attributes {stable_mosaic.version = 11 : i64} {
  func.func @_h_sigmoid_kernel(%arg0: i32, %arg1: memref<128x4096xf32, #tpu.memory_space<vmem>>, %arg2: memref<128x4096xf32, #tpu.memory_space<vmem>>) attributes {dimension_semantics = [#tpu.dimension_semantics<parallel>], iteration_bounds = array<i64: 2>, scalar_prefetch = 0 : i64, scratch_operands = 0 : i64, tpu.core_type = #tpu.core_type<tc>, window_params = [{transform_indices = @transform_0, window_bounds = array<i64: 128, 4096>}, {transform_indices = @transform_1, window_bounds = array<i64: 128, 4096>}]} {
    %c0 = arith.constant 0 : index
    %c0_0 = arith.constant 0 : index
    %0 = vector.load %arg1[%c0, %c0_0] : memref<128x4096xf32, #tpu.memory_space<vmem>>, vector<128x4096xf32>
    %cst = arith.constant 3.000000e+00 : f32
    %1 = vector.broadcast %cst : f32 to vector<128x4096xf32>
    %2 = arith.addf %0, %1 : vector<128x4096xf32>
    %cst_1 = arith.constant 0.000000e+00 : f32
    %cst_2 = arith.constant 6.000000e+00 : f32
    %3 = vector.broadcast %cst_1 : f32 to vector<128x4096xf32>
    %4 = arith.maximumf %3, %2 : vector<128x4096xf32>
    %5 = vector.broadcast %cst_2 : f32 to vector<128x4096xf32>
    %6 = arith.minimumf %5, %4 : vector<128x4096xf32>
    %cst_3 = arith.constant 0.166666672 : f32
    %7 = vector.broadcast %cst_3 : f32 to vector<128x4096xf32>
    %8 = arith.mulf %6, %7 : vector<128x4096xf32>
    %c0_4 = arith.constant 0 : index
    %c0_5 = arith.constant 0 : index
    %9 = vector.load %arg2[%c0_4, %c0_5] : memref<128x4096xf32, #tpu.memory_space<vmem>>, vector<128x4096xf32>
    tpu.vector_store %arg2[%c0_4, %c0_5], %8 {strides = array<i32>} : memref<128x4096xf32, #tpu.memory_space<vmem>>, vector<128x4096xf32>,
    return
  }
  func.func @transform_0(%arg0: i32) -> (i32, i32) {
    %c0_i32 = arith.constant 0 : i32
    %c0_i32_0 = arith.constant 0 : i32
    return %arg0, %c0_i32 : i32, i32
  }
  func.func @transform_1(%arg0: i32) -> (i32, i32) {
    %c0_i32 = arith.constant 0 : i32
    %c0_i32_0 = arith.constant 0 : i32
    return %arg0, %c0_i32 : i32, i32
  }
}

</mosaic_0001>

<bundles_post_ra>
// kernel: tpu_custom_call.1
= control target key start
LH: loop header
LB: loop body
LE: loop exit
PB: predicated region body
PF: predicated region fallthrough
CT: control target
= control target key end

     0   :  { %6 = vsyncpa [#allocation3], 0  ;;  %s4644_s0 = inlined_call_operand.hbm [shape: f32[256,4096], index: 0, kind: input, shape index: {}]   ;;  %s4645_s1 = inlined_call_operand.hbm [shape: f32[256,4096], index: 1, kind: output, shape index: {}]  }
   0x1   :  { %8 = vsyncpa [#allocation3 + $0x1], 0 }
   0x2   :  { %9 = vsyncpa [#allocation4], 0 }
   0x3   :  { %11 = vsyncpa [#allocation4 + $0x1], 0  ;;  %s3484_s6 = smov 0   ;;  %s3486_s7 = smov 0  }
   0x4   :  { %s3488_s8 = smov 0   ;;  %s3490_s9 = smov 0  }
   0x5 LB: > { %s3505_s10 = sadd.s32 4294967295, %s3468_s9   ;;  %s3302_s11 = sadd.s32 4294967294, %s3468_s9   ;;  %s3468_s9 = sphi %s3490_s9, %s4655_s9   ;;  %s3464_s8 = sphi %s3488_s8, %s4654_s8   ;;  %s3460_s7 = sphi %s3486_s7, %s4653_s7   ;;  %s3456_s6 = sphi %s3484_s6, %s4652_s6  }
   0x6   : > { %s3509_s12 = sadd.s32 1, %s3468_s9   ;;  %s24_s13 = sadd.s32 1, %s3464_s8 }
   0x7   : > { %s21_s14 = ssub.s32 %s3468_s9, %s3509_s12  ;;  %p31_p0 = scmp.ne.s32.totalorder %s3464_s8, %s3460_s7 }
   0x8   : > { %p22_p1 = scmp.eq.s32.totalorder %s21_s14, 0  ;;  %p32_p2 = scmp.eq.s32.totalorder %s3468_s9, 0 }
   0x9   : > { %p37_p3 = scmp.ne.s32.totalorder %s3460_s7, %s3456_s6  ;;  %p38_p4 = scmp.eq.s32.totalorder %s3505_s10, 0 }
   0xa   : > { %s3521_s15 = scalar_select %p22_p1, %s3464_s8, %s24_s13  }
   0xb   : > { %p3523_p5 = por %p32_p2, %p31_p0  ;;  %p3527_p6 = por %p38_p4, %p37_p3 }
   0xc   : > { %p61_p7 = scmp.eq.s32.totalorder %s3505_s10, 1  ;;  %p67_p8 = scmp.eq.s32.totalorder %s3302_s11, 1 }
   0xd   : > { %p3334_p10 = scmp.lt.s32.totalorder %s3468_s9, 2  ;;  %s87_s20 = sand.u32 1, %s3464_s8  }
   0xe   : > { %p3534_p11 = por %p61_p7, %p31_p0  ;;  %p3538_p12 = por %p67_p8, %p37_p3 }
   0xf   : > { %s3319_s21 = sshll.u32 %s3468_s9, 12  ;;  %s3305_s22 = sshll.u32 %s87_s20, 12 }
  0x10   : > { %s97_s25 = scalar_lea.hbm %s4644_s0, %s3319_s21  ;;  %s91_s27 = scalar_lea.vmem [#allocation2], %s3305_s22 }
  0x11   : > { %s98_s26 = sshll.u32 %s97_s25, 4  ;;  %s100_s28 = sshll.u32 %s91_s27, 4  ;;  %s99_s26 = int_to_ptr.hbm [resolvable:$true] %s98_s26  ;;  %s101_s28 = int_to_ptr.vmem [resolvable:$true] %s100_s28 }
  0x12   : > { %p3549_p13 = pnand %p3334_p10, %p3523_p5  ;;  %p3309_p0 = scmp.ge.s32.totalorder %s3468_s9, 1 }
  0x13   : > { %p108_p1 = scmp.lt.s32.totalorder %s3468_s9, 3  ;;  %s88_s30 = scalar_lea.sflag [#allocation3], %s87_s20 }
  0x14   : > { %s3372_s2 = sshra.s32 %s99_s26, 4  ;;  %p3376_p3 = pneg %p3549_p13  ;;  %s3373_s2 = int_to_ptr.hbm [resolvable:$true] %s3372_s2 }
  0x15   : > { %s3374_s3 = scalar_lea.hbm %s3373_s2, 4096  ;;  %s3379_s11 = scalar_lea.hbm %s4644_s0, 8192 }
  0x16   : > { %p3375_p2 = scmp.ne.s32.totalorder %s3373_s2, %s3374_s3  ;;  %p3380_p5 = scmp.lt.s32.totalorder %s3373_s2, %s4644_s0 }
  0x17   : > { %p3381_p8 = scmp.lt.s32.totalorder %s3379_s11, %s3374_s3 }
  0x18   : > { %p3377_p4 = pnand %p3376_p3, %p3375_p2 }
  0x19   : > { %p3382_p10 = por %p3381_p8, %p3380_p5 }
  0x1a   : > { %p3378_p7 = pneg %p3377_p4 }
  0x1c   : > { %p3383_p9 = pnand %p3382_p10, %p3378_p7 }
  0x1e   : > { %3386 = shalt.err (!%p3383_p9)
}
  0x1f   : > { %s3470_s16 = smov 4096   ;;  %s3471_s20 = smov 256  }
  0x20   : > { %3329 = dma.hbm_to_vmem [thread:$0]  (!%p3549_p13), %s99_s26, 65536, %s101_s28, %s88_s30, %s3470_s16, %s3470_s16, %s3471_s20  }
  0x21   : > { %p109_p2 = pnand %p3309_p0, %p108_p1 }
  0x22   : > { %s3570_s21 = sand.u32 (!%p109_p2), 1, %s3460_s7  }
  0x23   : > { %112 = sbr.rel (%p109_p2) target bundleno = 649 (0x289), region = 24  ;;  %s3310_s22 = sshll.u32 (!%p109_p2), %s3570_s21, 12 }
  0x24   : > { %s115_s23 = scalar_lea.sflag (!%p109_p2), [#allocation3], %s3570_s21  ;;  %s3576_s24 = scalar_lea.vmem (!%p109_p2), [#allocation2], %s3310_s22 }
  0x28   : > { %3447 = dma.done.wait (%p3527_p6), %s115_s23, 65536  }
  0x29   : > { %3449 = vsyncadd (%p3527_p6), %s115_s23, 4294901760  ;;  %v140_v0 = vld [vmem:[%s3576_s24] sm:$0xff]  ;;  %v141_v1 = vld [vmem:[%s3576_s24 + $0x8] sm:$0xff]  ;;  %s3598_s17 = scalar_lea.vmem [#allocation5], %s3310_s22  ;;  %s3321_s25 = sshll.u32 %s3505_s10, 12 }
  0x2a   : > { %v142_v2 = vld [vmem:[%s3576_s24 + $0x10] sm:$0xff]  ;;  %v652_v3 = vadd.f32 3.0, %v140_v0  ;;  %v653_v4 = vadd.f32 3.0, %v141_v1  ;;  %v143_v6 = vld [vmem:[%s3576_s24 + $0x18] sm:$0xff]  ;;  %v144_v7 = vld [vmem:[%s3576_s24 + $0x20] sm:$0xff]  ;;  %s3225_s27 = scalar_lea.hbm %s4645_s1, %s3321_s25  ;;  %s3226_s28 = sshll.u32 %s3598_s17, 4  ;;  %s3227_s28 = int_to_ptr.vmem [resolvable:$true] %s3226_s28 }
  0x2b   : > { %v654_v5 = vadd.f32 3.0, %v142_v2  ;;  %v145_v8 = vld [vmem:[%s3576_s24 + $0x28] sm:$0xff]  ;;  %v655_v9 = vadd.f32 3.0, %v143_v6  ;;  %v656_v10 = vadd.f32 3.0, %v144_v7  ;;  %v146_v12 = vld [vmem:[%s3576_s24 + $0x30] sm:$0xff]  ;;  %v147_v13 = vld [vmem:[%s3576_s24 + $0x38] sm:$0xff] }
  0x2c   : > { %v657_v11 = vadd.f32 3.0, %v145_v8  ;;  %v1164_v14 = vmax.f32 %v652_v3, 0.0  ;;  %v1165_v15 = vmax.f32 %v653_v4, 0.0  ;;  %v658_v17 = vadd.f32 3.0, %v146_v12  ;;  %v148_v22 = vld [vmem:[%s3576_s24 + $0x40] sm:$0xff]  ;;  %v149_v23 = vld [vmem:[%s3576_s24 + $0x48] sm:$0xff] }
  0x2d   : > { %v1166_v16 = vmax.f32 %v654_v5, 0.0  ;;  %v1167_v18 = vmax.f32 %v655_v9, 0.0  ;;  %v1168_v19 = vmax.f32 %v656_v10, 0.0  ;;  %v659_v21 = vadd.f32 3.0, %v147_v13  ;;  %v150_v28 = vld [vmem:[%s3576_s24 + $0x50] sm:$0xff]  ;;  %v151_v29 = vld [vmem:[%s3576_s24 + $0x58] sm:$0xff] }
  0x2e   : > { %v1169_v20 = vmax.f32 %v657_v11, 0.0  ;;  %v1676_v24 = vmin.f32 %v1164_v14, 6.0  ;;  %v1677_v25 = vmin.f32 %v1165_v15, 6.0  ;;  %v1170_v27 = vmax.f32 %v658_v17, 0.0  ;;  %v152_v34 = vld [vmem:[%s3576_s24 + $0x60] sm:$0xff]  ;;  %v153_v35 = vld [vmem:[%s3576_s24 + $0x68] sm:$0xff] }
  0x2f   : > { %v1678_v26 = vmin.f32 %v1166_v16, 6.0  ;;  %v1679_v30 = vmin.f32 %v1167_v18, 6.0  ;;  %v1680_v31 = vmin.f32 %v1168_v19, 6.0  ;;  %v1171_v33 = vmax.f32 %v659_v21, 0.0  ;;  %v154_v46 = vld [vmem:[%s3576_s24 + $0x70] sm:$0xff]  ;;  %v155_v51 = vld [vmem:[%s3576_s24 + $0x78] sm:$0xff] }
  0x30   : > { %v1681_v32 = vmin.f32 %v1169_v20, 6.0  ;;  %v2188_v36 = vmul.f32 0.16666667, %v1676_v24  ;;  %v2189_v37 = vmul.f32 0.16666667, %v1677_v25  ;;  %v1682_v42 = vmin.f32 %v1170_v27, 6.0 }
  0x31   : > { %v2190_v38 = vmul.f32 0.16666667, %v1678_v26  ;;  %v2191_v39 = vmul.f32 0.16666667, %v1679_v30  ;;  %v2192_v40 = vmul.f32 0.16666667, %v1680_v31 }
  0x32   : > { %v2193_v41 = vmul.f32 0.16666667, %v1681_v32  ;;  %2700 = vst [vmem:[%s3598_s17] sm:$0xff] %v2188_v36  ;;  %v1683_v43 = vmin.f32 %v1171_v33, 6.0  ;;  %v660_v44 = vadd.f32 3.0, %v148_v22  ;;  %v661_v45 = vadd.f32 3.0, %v149_v23  ;;  %v156_v59 = vld [vmem:[%s3576_s24 + $0x80] sm:$0xff] }
  0x33   : > { %2701 = vst [vmem:[%s3598_s17 + $0x8] sm:$0xff] %v2189_v37  ;;  %v662_v47 = vadd.f32 3.0, %v150_v28  ;;  %v663_v48 = vadd.f32 3.0, %v151_v29  ;;  %v664_v49 = vadd.f32 3.0, %v152_v34  ;;  %v665_v50 = vadd.f32 3.0, %v153_v35  ;;  %v157_v0 = vld [vmem:[%s3576_s24 + $0x88] sm:$0xff] }
  0x34   : > { %2702 = vst [vmem:[%s3598_s17 + $0x10] sm:$0xff] %v2190_v38  ;;  %v2194_v52 = vmul.f32 0.16666667, %v1682_v42  ;;  %v2195_v53 = vmul.f32 0.16666667, %v1683_v43  ;;  %v1172_v54 = vmax.f32 %v660_v44, 0.0 }
  0x35   : > { %2703 = vst [vmem:[%s3598_s17 + $0x18] sm:$0xff] %v2191_v39  ;;  %v1173_v55 = vmax.f32 %v661_v45, 0.0  ;;  %v1174_v56 = vmax.f32 %v662_v47, 0.0  ;;  %v1175_v57 = vmax.f32 %v663_v48, 0.0  ;;  %v1176_v58 = vmax.f32 %v664_v49, 0.0  ;;  %v158_v5 = vld [vmem:[%s3576_s24 + $0x90] sm:$0xff] }
  0x36   : > { %2704 = vst [vmem:[%s3598_s17 + $0x20] sm:$0xff] %v2192_v40  ;;  %v1684_v60 = vmin.f32 %v1172_v54, 6.0  ;;  %v1177_v61 = vmax.f32 %v665_v50, 0.0  ;;  %v666_v62 = vadd.f32 3.0, %v154_v46  ;;  %v667_v63 = vadd.f32 3.0, %v155_v51  ;;  %v159_v6 = vld [vmem:[%s3576_s24 + $0x98] sm:$0xff] }
  0x37   : > { %2705 = vst [vmem:[%s3598_s17 + $0x28] sm:$0xff] %v2193_v41  ;;  %v1685_v1 = vmin.f32 %v1173_v55, 6.0  ;;  %v1686_v2 = vmin.f32 %v1174_v56, 6.0  ;;  %v1687_v3 = vmin.f32 %v1175_v57, 6.0  ;;  %v1688_v4 = vmin.f32 %v1176_v58, 6.0  ;;  %v160_v7 = vld [vmem:[%s3576_s24 + $0xa0] sm:$0xff] }
  0x38   : > { %2706 = vst [vmem:[%s3598_s17 + $0x30] sm:$0xff] %v2194_v52  ;;  %v2196_v8 = vmul.f32 0.16666667, %v1684_v60  ;;  %v1689_v9 = vmin.f32 %v1177_v61, 6.0  ;;  %v1178_v10 = vmax.f32 %v666_v62, 0.0  ;;  %v1179_v11 = vmax.f32 %v667_v63, 0.0 }
  0x39   : > { %v161_v12 = vld [vmem:[%s3576_s24 + $0xa8] sm:$0xff]  ;;  %2707 = vst [vmem:[%s3598_s17 + $0x38] sm:$0xff] %v2195_v53  ;;  %v2197_v13 = vmul.f32 0.16666667, %v1685_v1  ;;  %v2198_v14 = vmul.f32 0.16666667, %v1686_v2 }
  0x3a   : > { %v668_v15 = vadd.f32 3.0, %v156_v59  ;;  %v162_v16 = vld [vmem:[%s3576_s24 + $0xb0] sm:$0xff]  ;;  %2708 = vst [vmem:[%s3598_s17 + $0x40] sm:$0xff] %v2196_v8  ;;  %v2199_v17 = vmul.f32 0.16666667, %v1687_v3  ;;  %v1690_v19 = vmin.f32 %v1178_v10, 6.0 }
  0x3b   : > { %v2200_v18 = vmul.f32 0.16666667, %v1688_v4  ;;  %2709 = vst [vmem:[%s3598_s17 + $0x48] sm:$0xff] %v2197_v13  ;;  %v2201_v20 = vmul.f32 0.16666667, %v1689_v9  ;;  %v1691_v21 = vmin.f32 %v1179_v11, 6.0 }
  0x3c   : > { %v1180_v22 = vmax.f32 %v668_v15, 0.0  ;;  %v669_v23 = vadd.f32 3.0, %v157_v0  ;;  %2710 = vst [vmem:[%s3598_s17 + $0x50] sm:$0xff] %v2198_v14  ;;  %v2202_v24 = vmul.f32 0.16666667, %v1690_v19  ;;  %v670_v25 = vadd.f32 3.0, %v158_v5 }
  0x3d   : > { %v671_v26 = vadd.f32 3.0, %v159_v6  ;;  %v672_v27 = vadd.f32 3.0, %v160_v7  ;;  %2711 = vst [vmem:[%s3598_s17 + $0x58] sm:$0xff] %v2199_v17  ;;  %v2203_v28 = vmul.f32 0.16666667, %v1691_v21  ;;  %v673_v31 = vadd.f32 3.0, %v161_v12 }
  0x3e   : > { %v1692_v29 = vmin.f32 %v1180_v22, 6.0  ;;  %v1181_v30 = vmax.f32 %v669_v23, 0.0  ;;  %2712 = vst [vmem:[%s3598_s17 + $0x60] sm:$0xff] %v2200_v18  ;;  %v1182_v32 = vmax.f32 %v670_v25, 0.0  ;;  %v674_v35 = vadd.f32 3.0, %v162_v16  ;;  %v163_v36 = vld [vmem:[%s3576_s24 + $0xb8] sm:$0xff] }
  0x3f   : > { %v1183_v33 = vmax.f32 %v671_v26, 0.0  ;;  %v1184_v34 = vmax.f32 %v672_v27, 0.0  ;;  %2713 = vst [vmem:[%s3598_s17 + $0x68] sm:$0xff] %v2201_v20  ;;  %v1185_v39 = vmax.f32 %v673_v31, 0.0  ;;  %v675_v40 = vadd.f32 3.0, %v163_v36  ;;  %v164_v45 = vld [vmem:[%s3576_s24 + $0xc0] sm:$0xff] }
  0x40   : > { %v2204_v37 = vmul.f32 0.16666667, %v1692_v29  ;;  %v1693_v38 = vmin.f32 %v1181_v30, 6.0  ;;  %2714 = vst [vmem:[%s3598_s17 + $0x70] sm:$0xff] %v2202_v24  ;;  %v1694_v41 = vmin.f32 %v1182_v32, 6.0  ;;  %v1186_v44 = vmax.f32 %v674_v35, 0.0 }
  0x41   : > { %v1695_v42 = vmin.f32 %v1183_v33, 6.0  ;;  %v1696_v43 = vmin.f32 %v1184_v34, 6.0  ;;  %2715 = vst [vmem:[%s3598_s17 + $0x78] sm:$0xff] %v2203_v28  ;;  %v1697_v47 = vmin.f32 %v1185_v39, 6.0  ;;  %v1187_v48 = vmax.f32 %v675_v40, 0.0  ;;  %v165_v58 = vld [vmem:[%s3576_s24 + $0xc8] sm:$0xff] }
  0x42   : > { %v2205_v46 = vmul.f32 0.16666667, %v1693_v38  ;;  %v676_v49 = vadd.f32 3.0, %v164_v45  ;;  %2716 = vst [vmem:[%s3598_s17 + $0x80] sm:$0xff] %v2204_v37  ;;  %v2206_v50 = vmul.f32 0.16666667, %v1694_v41 }
  0x43   : > { %v2207_v51 = vmul.f32 0.16666667, %v1695_v42  ;;  %v1698_v52 = vmin.f32 %v1186_v44, 6.0  ;;  %v2208_v53 = vmul.f32 0.16666667, %v1696_v43  ;;  %v1699_v55 = vmin.f32 %v1187_v48, 6.0 }
  0x44   : > { %2717 = vst [vmem:[%s3598_s17 + $0x88] sm:$0xff] %v2205_v46  ;;  %v2209_v54 = vmul.f32 0.16666667, %v1697_v47  ;;  %v1188_v57 = vmax.f32 %v676_v49, 0.0  ;;  %v166_v59 = vld [vmem:[%s3576_s24 + $0xd0] sm:$0xff]  ;;  %v677_v61 = vadd.f32 3.0, %v165_v58 }
  0x45   : > { %2718 = vst [vmem:[%s3598_s17 + $0x90] sm:$0xff] %v2206_v50  ;;  %v2210_v56 = vmul.f32 0.16666667, %v1698_v52  ;;  %v2211_v60 = vmul.f32 0.16666667, %v1699_v55  ;;  %v678_v62 = vadd.f32 3.0, %v166_v59 }
  0x46   : > { %2719 = vst [vmem:[%s3598_s17 + $0x98] sm:$0xff] %v2207_v51  ;;  %v167_v63 = vld [vmem:[%s3576_s24 + $0xd8] sm:$0xff]  ;;  %v1700_v0 = vmin.f32 %v1188_v57, 6.0  ;;  %v168_v2 = vld [vmem:[%s3576_s24 + $0xe0] sm:$0xff]  ;;  %v169_v3 = vld [vmem:[%s3576_s24 + $0xe8] sm:$0xff]  ;;  %v1189_v5 = vmax.f32 %v677_v61, 0.0 }
  0x47   : > { %2720 = vst [vmem:[%s3598_s17 + $0xa0] sm:$0xff] %v2208_v53  ;;  %v679_v1 = vadd.f32 3.0, %v167_v63  ;;  %v170_v4 = vld [vmem:[%s3576_s24 + $0xf0] sm:$0xff]  ;;  %v1190_v6 = vmax.f32 %v678_v62, 0.0  ;;  %v680_v7 = vadd.f32 3.0, %v168_v2  ;;  %v681_v8 = vadd.f32 3.0, %v169_v3 }
  0x48   : > { %2721 = vst [vmem:[%s3598_s17 + $0xa8] sm:$0xff] %v2209_v54  ;;  %v171_v9 = vld [vmem:[%s3576_s24 + $0xf8] sm:$0xff]  ;;  %v2212_v10 = vmul.f32 0.16666667, %v1700_v0  ;;  %v682_v12 = vadd.f32 3.0, %v170_v4  ;;  %v1701_v14 = vmin.f32 %v1189_v5, 6.0 }
  0x49   : > { %2722 = vst [vmem:[%s3598_s17 + $0xb0] sm:$0xff] %v2210_v56  ;;  %v1191_v11 = vmax.f32 %v679_v1, 0.0  ;;  %v683_v13 = vadd.f32 3.0, %v171_v9  ;;  %v1702_v15 = vmin.f32 %v1190_v6, 6.0  ;;  %v1192_v16 = vmax.f32 %v680_v7, 0.0  ;;  %v172_v18 = vld [vmem:[%s3576_s24 + $0x100] sm:$0xff] }
  0x4a   : > { %2723 = vst [vmem:[%s3598_s17 + $0xb8] sm:$0xff] %v2211_v60  ;;  %v1193_v17 = vmax.f32 %v681_v8, 0.0  ;;  %v1194_v20 = vmax.f32 %v682_v12, 0.0  ;;  %v684_v22 = vadd.f32 3.0, %v172_v18  ;;  %v173_v23 = vld [vmem:[%s3576_s24 + $0x108] sm:$0xff]  ;;  %v174_v32 = vld [vmem:[%s3576_s24 + $0x110] sm:$0xff] }
  0x4b   : > { %2724 = vst [vmem:[%s3598_s17 + $0xc0] sm:$0xff] %v2212_v10  ;;  %v1703_v19 = vmin.f32 %v1191_v11, 6.0  ;;  %v1195_v21 = vmax.f32 %v683_v13, 0.0  ;;  %v2213_v24 = vmul.f32 0.16666667, %v1701_v14  ;;  %v1704_v26 = vmin.f32 %v1192_v16, 6.0 }
  0x4c   : > { %v2214_v25 = vmul.f32 0.16666667, %v1702_v15  ;;  %v1705_v27 = vmin.f32 %v1193_v17, 6.0  ;;  %v1706_v29 = vmin.f32 %v1194_v20, 6.0  ;;  %v1196_v31 = vmax.f32 %v684_v22, 0.0  ;;  %v175_v41 = vld [vmem:[%s3576_s24 + $0x118] sm:$0xff] }
  0x4d   : > { %v2215_v28 = vmul.f32 0.16666667, %v1703_v19  ;;  %v1707_v30 = vmin.f32 %v1195_v21, 6.0  ;;  %2725 = vst [vmem:[%s3598_s17 + $0xc8] sm:$0xff] %v2213_v24  ;;  %v2216_v33 = vmul.f32 0.16666667, %v1704_v26 }
  0x4e   : > { %v2217_v34 = vmul.f32 0.16666667, %v1705_v27  ;;  %v685_v35 = vadd.f32 3.0, %v173_v23  ;;  %2726 = vst [vmem:[%s3598_s17 + $0xd0] sm:$0xff] %v2214_v25  ;;  %v2218_v36 = vmul.f32 0.16666667, %v1706_v29 }
  0x4f   : > { %v2219_v37 = vmul.f32 0.16666667, %v1707_v30  ;;  %v1708_v38 = vmin.f32 %v1196_v31, 6.0  ;;  %2727 = vst [vmem:[%s3598_s17 + $0xd8] sm:$0xff] %v2215_v28  ;;  %v686_v40 = vadd.f32 3.0, %v174_v32  ;;  %v176_v42 = vld [vmem:[%s3576_s24 + $0x120] sm:$0xff] }
  0x50   : > { %v1197_v39 = vmax.f32 %v685_v35, 0.0  ;;  %v177_v43 = vld [vmem:[%s3576_s24 + $0x128] sm:$0xff]  ;;  %2728 = vst [vmem:[%s3598_s17 + $0xe0] sm:$0xff] %v2216_v33  ;;  %v687_v45 = vadd.f32 3.0, %v175_v41  ;;  %v688_v46 = vadd.f32 3.0, %v176_v42  ;;  %v178_v50 = vld [vmem:[%s3576_s24 + $0x130] sm:$0xff] }
  0x51   : > { %v2220_v44 = vmul.f32 0.16666667, %v1708_v38  ;;  %v689_v47 = vadd.f32 3.0, %v177_v43  ;;  %2729 = vst [vmem:[%s3598_s17 + $0xe8] sm:$0xff] %v2217_v34  ;;  %v1198_v49 = vmax.f32 %v686_v40, 0.0  ;;  %v179_v51 = vld [vmem:[%s3576_s24 + $0x138] sm:$0xff] }
  0x52   : > { %v1709_v48 = vmin.f32 %v1197_v39, 6.0  ;;  %v180_v52 = vld [vmem:[%s3576_s24 + $0x140] sm:$0xff]  ;;  %2730 = vst [vmem:[%s3598_s17 + $0xf0] sm:$0xff] %v2218_v36  ;;  %v1199_v53 = vmax.f32 %v687_v45, 0.0  ;;  %v1200_v54 = vmax.f32 %v688_v46, 0.0  ;;  %v690_v56 = vadd.f32 3.0, %v178_v50 }
  0x53   : > { %v1201_v55 = vmax.f32 %v689_v47, 0.0  ;;  %v181_v57 = vld [vmem:[%s3576_s24 + $0x148] sm:$0xff]  ;;  %2731 = vst [vmem:[%s3598_s17 + $0xf8] sm:$0xff] %v2219_v37  ;;  %v1710_v59 = vmin.f32 %v1198_v49, 6.0  ;;  %v691_v60 = vadd.f32 3.0, %v179_v51  ;;  %v692_v61 = vadd.f32 3.0, %v180_v52 }
  0x54   : > { %v2221_v58 = vmul.f32 0.16666667, %v1709_v48  ;;  %2732 = vst [vmem:[%s3598_s17 + $0x100] sm:$0xff] %v2220_v44  ;;  %v1711_v62 = vmin.f32 %v1199_v53, 6.0  ;;  %v1712_v63 = vmin.f32 %v1200_v54, 6.0  ;;  %v1202_v1 = vmax.f32 %v690_v56, 0.0 }
  0x55   : > { %v1713_v0 = vmin.f32 %v1201_v55, 6.0  ;;  %v182_v2 = vld [vmem:[%s3576_s24 + $0x150] sm:$0xff]  ;;  %v2222_v3 = vmul.f32 0.16666667, %v1710_v59  ;;  %v1203_v4 = vmax.f32 %v691_v60, 0.0  ;;  %v1204_v5 = vmax.f32 %v692_v61, 0.0 }
  0x56   : > { %2733 = vst [vmem:[%s3598_s17 + $0x108] sm:$0xff] %v2221_v58  ;;  %v693_v6 = vadd.f32 3.0, %v181_v57  ;;  %v2223_v7 = vmul.f32 0.16666667, %v1711_v62  ;;  %v2224_v8 = vmul.f32 0.16666667, %v1712_v63 }
  0x57   : > { %v2225_v9 = vmul.f32 0.16666667, %v1713_v0  ;;  %2734 = vst [vmem:[%s3598_s17 + $0x110] sm:$0xff] %v2222_v3  ;;  %v1714_v10 = vmin.f32 %v1202_v1, 6.0  ;;  %v1715_v11 = vmin.f32 %v1203_v4, 6.0  ;;  %v1716_v12 = vmin.f32 %v1204_v5, 6.0 }
  0x58   : > { %v1205_v13 = vmax.f32 %v693_v6, 0.0  ;;  %v183_v14 = vld [vmem:[%s3576_s24 + $0x158] sm:$0xff]  ;;  %2735 = vst [vmem:[%s3598_s17 + $0x118] sm:$0xff] %v2223_v7  ;;  %v694_v15 = vadd.f32 3.0, %v182_v2  ;;  %v184_v17 = vld [vmem:[%s3576_s24 + $0x160] sm:$0xff]  ;;  %v185_v18 = vld [vmem:[%s3576_s24 + $0x168] sm:$0xff] }
  0x59   : > { %v695_v16 = vadd.f32 3.0, %v183_v14  ;;  %v186_v19 = vld [vmem:[%s3576_s24 + $0x170] sm:$0xff]  ;;  %2736 = vst [vmem:[%s3598_s17 + $0x120] sm:$0xff] %v2224_v8  ;;  %v2226_v20 = vmul.f32 0.16666667, %v1714_v10  ;;  %v696_v26 = vadd.f32 3.0, %v184_v17 }
  0x5a   : > { %v2227_v21 = vmul.f32 0.16666667, %v1715_v11  ;;  %v1717_v22 = vmin.f32 %v1205_v13, 6.0  ;;  %2737 = vst [vmem:[%s3598_s17 + $0x128] sm:$0xff] %v2225_v9  ;;  %v2228_v23 = vmul.f32 0.16666667, %v1716_v12 }
  0x5b   : > { %v1206_v24 = vmax.f32 %v694_v15, 0.0  ;;  %v1207_v25 = vmax.f32 %v695_v16, 0.0  ;;  %2738 = vst [vmem:[%s3598_s17 + $0x130] sm:$0xff] %v2226_v20  ;;  %v697_v28 = vadd.f32 3.0, %v185_v18  ;;  %v698_v29 = vadd.f32 3.0, %v186_v19  ;;  %v187_v30 = vld [vmem:[%s3576_s24 + $0x178] sm:$0xff] }
  0x5c   : > { %v2229_v27 = vmul.f32 0.16666667, %v1717_v22  ;;  %2739 = vst [vmem:[%s3598_s17 + $0x138] sm:$0xff] %v2227_v21  ;;  %v1208_v33 = vmax.f32 %v696_v26, 0.0  ;;  %v699_v34 = vadd.f32 3.0, %v187_v30  ;;  %v188_v35 = vld [vmem:[%s3576_s24 + $0x180] sm:$0xff] }
  0x5d   : > { %v1718_v31 = vmin.f32 %v1206_v24, 6.0  ;;  %v1719_v32 = vmin.f32 %v1207_v25, 6.0  ;;  %2740 = vst [vmem:[%s3598_s17 + $0x140] sm:$0xff] %v2228_v23  ;;  %v1209_v36 = vmax.f32 %v697_v28, 0.0  ;;  %v1210_v37 = vmax.f32 %v698_v29, 0.0  ;;  %v189_v39 = vld [vmem:[%s3576_s24 + $0x188] sm:$0xff] }
  0x5e   : > { %v700_v38 = vadd.f32 3.0, %v188_v35  ;;  %v190_v40 = vld [vmem:[%s3576_s24 + $0x190] sm:$0xff]  ;;  %2741 = vst [vmem:[%s3598_s17 + $0x148] sm:$0xff] %v2229_v27  ;;  %v1720_v43 = vmin.f32 %v1208_v33, 6.0  ;;  %v1211_v46 = vmax.f32 %v699_v34, 0.0  ;;  %v191_v48 = vld [vmem:[%s3576_s24 + $0x198] sm:$0xff] }
  0x5f   : > { %v2230_v41 = vmul.f32 0.16666667, %v1718_v31  ;;  %v2231_v42 = vmul.f32 0.16666667, %v1719_v32  ;;  %v1721_v44 = vmin.f32 %v1209_v36, 6.0  ;;  %v1722_v45 = vmin.f32 %v1210_v37, 6.0 }
  0x60   : > { %v1212_v47 = vmax.f32 %v700_v38, 0.0  ;;  %v192_v49 = vld [vmem:[%s3576_s24 + $0x1a0] sm:$0xff]  ;;  %v2232_v50 = vmul.f32 0.16666667, %v1720_v43  ;;  %v701_v51 = vadd.f32 3.0, %v189_v39  ;;  %v702_v52 = vadd.f32 3.0, %v190_v40 }
  0x61   : > { %2742 = vst [vmem:[%s3598_s17 + $0x150] sm:$0xff] %v2230_v41  ;;  %v703_v53 = vadd.f32 3.0, %v191_v48  ;;  %v2233_v54 = vmul.f32 0.16666667, %v1721_v44  ;;  %v2234_v55 = vmul.f32 0.16666667, %v1722_v45 }
  0x62   : > { %2743 = vst [vmem:[%s3598_s17 + $0x158] sm:$0xff] %v2231_v42  ;;  %v1723_v56 = vmin.f32 %v1211_v46, 6.0  ;;  %v1724_v57 = vmin.f32 %v1212_v47, 6.0  ;;  %v1213_v58 = vmax.f32 %v701_v51, 0.0  ;;  %v1214_v59 = vmax.f32 %v702_v52, 0.0  ;;  %v193_v61 = vld [vmem:[%s3576_s24 + $0x1a8] sm:$0xff] }
  0x63   : > { %2744 = vst [vmem:[%s3598_s17 + $0x160] sm:$0xff] %v2232_v50  ;;  %v1215_v60 = vmax.f32 %v703_v53, 0.0  ;;  %v704_v63 = vadd.f32 3.0, %v192_v49  ;;  %v705_v0 = vadd.f32 3.0, %v193_v61  ;;  %v194_v1 = vld [vmem:[%s3576_s24 + $0x1b0] sm:$0xff]  ;;  %v195_v9 = vld [vmem:[%s3576_s24 + $0x1b8] sm:$0xff] }
  0x64   : > { %2745 = vst [vmem:[%s3598_s17 + $0x168] sm:$0xff] %v2233_v54  ;;  %v2235_v62 = vmul.f32 0.16666667, %v1723_v56  ;;  %v2236_v2 = vmul.f32 0.16666667, %v1724_v57  ;;  %v1725_v3 = vmin.f32 %v1213_v58, 6.0 }
  0x65   : > { %2746 = vst [vmem:[%s3598_s17 + $0x170] sm:$0xff] %v2234_v55  ;;  %v1726_v4 = vmin.f32 %v1214_v59, 6.0  ;;  %v1727_v5 = vmin.f32 %v1215_v60, 6.0  ;;  %v1216_v6 = vmax.f32 %v704_v63, 0.0  ;;  %v1217_v7 = vmax.f32 %v705_v0, 0.0  ;;  %v196_v10 = vld [vmem:[%s3576_s24 + $0x1c0] sm:$0xff] }
  0x66   : > { %2747 = vst [vmem:[%s3598_s17 + $0x178] sm:$0xff] %v2235_v62  ;;  %v706_v8 = vadd.f32 3.0, %v194_v1  ;;  %v2237_v11 = vmul.f32 0.16666667, %v1725_v3  ;;  %v707_v13 = vadd.f32 3.0, %v195_v9  ;;  %v197_v18 = vld [vmem:[%s3576_s24 + $0x1c8] sm:$0xff] }
  0x67   : > { %2748 = vst [vmem:[%s3598_s17 + $0x180] sm:$0xff] %v2236_v2  ;;  %v2238_v12 = vmul.f32 0.16666667, %v1726_v4  ;;  %v2239_v14 = vmul.f32 0.16666667, %v1727_v5  ;;  %v1728_v15 = vmin.f32 %v1216_v6, 6.0 }
  0x68   : > { %v1729_v16 = vmin.f32 %v1217_v7, 6.0  ;;  %v1218_v17 = vmax.f32 %v706_v8, 0.0  ;;  %2749 = vst [vmem:[%s3598_s17 + $0x188] sm:$0xff] %v2237_v11  ;;  %v1219_v19 = vmax.f32 %v707_v13, 0.0  ;;  %v708_v20 = vadd.f32 3.0, %v196_v10  ;;  %v198_v22 = vld [vmem:[%s3576_s24 + $0x1d0] sm:$0xff] }
  0x69   : > { %v709_v21 = vadd.f32 3.0, %v197_v18  ;;  %v199_v23 = vld [vmem:[%s3576_s24 + $0x1d8] sm:$0xff]  ;;  %2750 = vst [vmem:[%s3598_s17 + $0x190] sm:$0xff] %v2238_v12  ;;  %v2240_v24 = vmul.f32 0.16666667, %v1728_v15  ;;  %v710_v30 = vadd.f32 3.0, %v198_v22 }
  0x6a   : > { %v2241_v25 = vmul.f32 0.16666667, %v1729_v16  ;;  %v1730_v26 = vmin.f32 %v1218_v17, 6.0  ;;  %2751 = vst [vmem:[%s3598_s17 + $0x198] sm:$0xff] %v2239_v14  ;;  %v1731_v27 = vmin.f32 %v1219_v19, 6.0  ;;  %v1220_v28 = vmax.f32 %v708_v20, 0.0 }
  0x6b   : > { %v1221_v29 = vmax.f32 %v709_v21, 0.0  ;;  %v200_v31 = vld [vmem:[%s3576_s24 + $0x1e0] sm:$0xff]  ;;  %2752 = vst [vmem:[%s3598_s17 + $0x1a0] sm:$0xff] %v2240_v24  ;;  %v711_v33 = vadd.f32 3.0, %v199_v23  ;;  %v201_v35 = vld [vmem:[%s3576_s24 + $0x1e8] sm:$0xff]  ;;  %v1222_v39 = vmax.f32 %v710_v30, 0.0 }
  0x6c   : > { %v2242_v32 = vmul.f32 0.16666667, %v1730_v26  ;;  %v712_v34 = vadd.f32 3.0, %v200_v31  ;;  %2753 = vst [vmem:[%s3598_s17 + $0x1a8] sm:$0xff] %v2241_v25  ;;  %v2243_v36 = vmul.f32 0.16666667, %v1731_v27 }
  0x6d   : > { %v1732_v37 = vmin.f32 %v1220_v28, 6.0  ;;  %v1733_v38 = vmin.f32 %v1221_v29, 6.0  ;;  %v1223_v40 = vmax.f32 %v711_v33, 0.0  ;;  %v713_v42 = vadd.f32 3.0, %v201_v35  ;;  %v202_v43 = vld [vmem:[%s3576_s24 + $0x1f0] sm:$0xff]  ;;  %v203_v44 = vld [vmem:[%s3576_s24 + $0x1f8] sm:$0xff] }
  0x6e   : > { %2754 = vst [vmem:[%s3598_s17 + $0x1b0] sm:$0xff] %v2242_v32  ;;  %v1224_v41 = vmax.f32 %v712_v34, 0.0  ;;  %v1734_v47 = vmin.f32 %v1222_v39, 6.0  ;;  %v714_v51 = vadd.f32 3.0, %v202_v43  ;;  %v204_v52 = vld [vmem:[%s3576_s24 + $0x200] sm:$0xff]  ;;  %v205_v53 = vld [vmem:[%s3576_s24 + $0x208] sm:$0xff] }
  0x6f   : > { %2755 = vst [vmem:[%s3598_s17 + $0x1b8] sm:$0xff] %v2243_v36  ;;  %v2244_v45 = vmul.f32 0.16666667, %v1732_v37  ;;  %v2245_v46 = vmul.f32 0.16666667, %v1733_v38  ;;  %v1735_v48 = vmin.f32 %v1223_v40, 6.0 }
  0x70   : > { %v1736_v49 = vmin.f32 %v1224_v41, 6.0  ;;  %v1225_v50 = vmax.f32 %v713_v42, 0.0  ;;  %v2246_v54 = vmul.f32 0.16666667, %v1734_v47  ;;  %v715_v55 = vadd.f32 3.0, %v203_v44  ;;  %v206_v1 = vld [vmem:[%s3576_s24 + $0x210] sm:$0xff] }
  0x71   : > { %2756 = vst [vmem:[%s3598_s17 + $0x1c0] sm:$0xff] %v2244_v45  ;;  %v716_v56 = vadd.f32 3.0, %v204_v52  ;;  %v717_v57 = vadd.f32 3.0, %v205_v53  ;;  %v2247_v58 = vmul.f32 0.16666667, %v1735_v48  ;;  %v1226_v61 = vmax.f32 %v714_v51, 0.0 }
  0x72   : > { %2757 = vst [vmem:[%s3598_s17 + $0x1c8] sm:$0xff] %v2245_v46  ;;  %v2248_v59 = vmul.f32 0.16666667, %v1736_v49  ;;  %v1737_v60 = vmin.f32 %v1225_v50, 6.0  ;;  %v1227_v62 = vmax.f32 %v715_v55, 0.0  ;;  %v718_v3 = vadd.f32 3.0, %v206_v1 }
  0x73   : > { %2758 = vst [vmem:[%s3598_s17 + $0x1d0] sm:$0xff] %v2246_v54  ;;  %v1228_v63 = vmax.f32 %v716_v56, 0.0  ;;  %v1229_v0 = vmax.f32 %v717_v57, 0.0  ;;  %v207_v4 = vld [vmem:[%s3576_s24 + $0x218] sm:$0xff]  ;;  %v208_v5 = vld [vmem:[%s3576_s24 + $0x220] sm:$0xff]  ;;  %v1738_v6 = vmin.f32 %v1226_v61, 6.0 }
  0x74   : > { %2759 = vst [vmem:[%s3598_s17 + $0x1d8] sm:$0xff] %v2247_v58  ;;  %v2249_v2 = vmul.f32 0.16666667, %v1737_v60  ;;  %v1739_v7 = vmin.f32 %v1227_v62, 6.0  ;;  %v209_v10 = vld [vmem:[%s3576_s24 + $0x228] sm:$0xff]  ;;  %v1230_v11 = vmax.f32 %v718_v3, 0.0 }
  0x75   : > { %2760 = vst [vmem:[%s3598_s17 + $0x1e0] sm:$0xff] %v2248_v59  ;;  %v1740_v8 = vmin.f32 %v1228_v63, 6.0  ;;  %v1741_v9 = vmin.f32 %v1229_v0, 6.0  ;;  %v719_v12 = vadd.f32 3.0, %v207_v4  ;;  %v720_v13 = vadd.f32 3.0, %v208_v5  ;;  %v210_v15 = vld [vmem:[%s3576_s24 + $0x230] sm:$0xff] }
  0x76   : > { %2761 = vst [vmem:[%s3598_s17 + $0x1e8] sm:$0xff] %v2249_v2  ;;  %v721_v14 = vadd.f32 3.0, %v209_v10  ;;  %v2250_v16 = vmul.f32 0.16666667, %v1738_v6  ;;  %v2251_v17 = vmul.f32 0.16666667, %v1739_v7 }
  0x77   : > { %v2252_v18 = vmul.f32 0.16666667, %v1740_v8  ;;  %v2253_v19 = vmul.f32 0.16666667, %v1741_v9  ;;  %v1742_v20 = vmin.f32 %v1230_v11, 6.0  ;;  %v1231_v21 = vmax.f32 %v719_v12, 0.0 }
  0x78   : > { %v1232_v22 = vmax.f32 %v720_v13, 0.0  ;;  %v211_v23 = vld [vmem:[%s3576_s24 + $0x238] sm:$0xff]  ;;  %2762 = vst [vmem:[%s3598_s17 + $0x1f0] sm:$0xff] %v2250_v16  ;;  %v1233_v24 = vmax.f32 %v721_v14, 0.0  ;;  %v722_v25 = vadd.f32 3.0, %v210_v15  ;;  %v212_v27 = vld [vmem:[%s3576_s24 + $0x240] sm:$0xff] }
  0x79   : > { %v723_v26 = vadd.f32 3.0, %v211_v23  ;;  %v213_v28 = vld [vmem:[%s3576_s24 + $0x248] sm:$0xff]  ;;  %2763 = vst [vmem:[%s3598_s17 + $0x1f8] sm:$0xff] %v2251_v17  ;;  %v2254_v29 = vmul.f32 0.16666667, %v1742_v20  ;;  %v1743_v30 = vmin.f32 %v1231_v21, 6.0 }
  0x7a   : > { %v1744_v31 = vmin.f32 %v1232_v22, 6.0  ;;  %v724_v32 = vadd.f32 3.0, %v212_v27  ;;  %2764 = vst [vmem:[%s3598_s17 + $0x200] sm:$0xff] %v2252_v18  ;;  %v1745_v33 = vmin.f32 %v1233_v24, 6.0  ;;  %v1234_v34 = vmax.f32 %v722_v25, 0.0  ;;  %v214_v37 = vld [vmem:[%s3576_s24 + $0x250] sm:$0xff] }
  0x7b   : > { %v1235_v35 = vmax.f32 %v723_v26, 0.0  ;;  %v725_v36 = vadd.f32 3.0, %v213_v28  ;;  %2765 = vst [vmem:[%s3598_s17 + $0x208] sm:$0xff] %v2253_v19  ;;  %v2255_v38 = vmul.f32 0.16666667, %v1743_v30  ;;  %v726_v46 = vadd.f32 3.0, %v214_v37 }
  0x7c   : > { %v2256_v39 = vmul.f32 0.16666667, %v1744_v31  ;;  %v1236_v40 = vmax.f32 %v724_v32, 0.0  ;;  %2766 = vst [vmem:[%s3598_s17 + $0x210] sm:$0xff] %v2254_v29  ;;  %v2257_v41 = vmul.f32 0.16666667, %v1745_v33 }
  0x7d   : > { %v1746_v42 = vmin.f32 %v1234_v34, 6.0  ;;  %v1747_v43 = vmin.f32 %v1235_v35, 6.0  ;;  %v1237_v44 = vmax.f32 %v725_v36, 0.0  ;;  %2767 = vst [vmem:[%s3598_s17 + $0x218] sm:$0xff] %v2255_v38  ;;  %v215_v47 = vld [vmem:[%s3576_s24 + $0x258] sm:$0xff]  ;;  %v216_v48 = vld [vmem:[%s3576_s24 + $0x260] sm:$0xff] }
  0x7e   : > { %v1748_v45 = vmin.f32 %v1236_v40, 6.0  ;;  %v217_v49 = vld [vmem:[%s3576_s24 + $0x268] sm:$0xff]  ;;  %2768 = vst [vmem:[%s3598_s17 + $0x220] sm:$0xff] %v2256_v39  ;;  %v1238_v54 = vmax.f32 %v726_v46, 0.0  ;;  %v727_v55 = vadd.f32 3.0, %v215_v47  ;;  %v728_v56 = vadd.f32 3.0, %v216_v48 }
  0x7f   : > { %v2258_v50 = vmul.f32 0.16666667, %v1746_v42  ;;  %v2259_v51 = vmul.f32 0.16666667, %v1747_v43  ;;  %v1749_v52 = vmin.f32 %v1237_v44, 6.0  ;;  %2769 = vst [vmem:[%s3598_s17 + $0x228] sm:$0xff] %v2257_v41 }
  0x80   : > { %v2260_v53 = vmul.f32 0.16666667, %v1748_v45  ;;  %v729_v58 = vadd.f32 3.0, %v217_v49  ;;  %v218_v59 = vld [vmem:[%s3576_s24 + $0x270] sm:$0xff]  ;;  %v219_v60 = vld [vmem:[%s3576_s24 + $0x278] sm:$0xff]  ;;  %v1750_v61 = vmin.f32 %v1238_v54, 6.0 }
  0x81   : > { %2770 = vst [vmem:[%s3598_s17 + $0x230] sm:$0xff] %v2258_v50  ;;  %v2261_v57 = vmul.f32 0.16666667, %v1749_v52  ;;  %v1239_v62 = vmax.f32 %v727_v55, 0.0  ;;  %v1240_v63 = vmax.f32 %v728_v56, 0.0  ;;  %v730_v0 = vadd.f32 3.0, %v218_v59 }
  0x82   : > { %2771 = vst [vmem:[%s3598_s17 + $0x238] sm:$0xff] %v2259_v51  ;;  %v220_v1 = vld [vmem:[%s3576_s24 + $0x280] sm:$0xff]  ;;  %v1241_v2 = vmax.f32 %v729_v58, 0.0  ;;  %v731_v3 = vadd.f32 3.0, %v219_v60  ;;  %v221_v5 = vld [vmem:[%s3576_s24 + $0x288] sm:$0xff]  ;;  %v222_v6 = vld [vmem:[%s3576_s24 + $0x290] sm:$0xff] }
  0x83   : > { %2772 = vst [vmem:[%s3598_s17 + $0x240] sm:$0xff] %v2260_v53  ;;  %v732_v4 = vadd.f32 3.0, %v220_v1  ;;  %v2262_v7 = vmul.f32 0.16666667, %v1750_v61  ;;  %v1751_v8 = vmin.f32 %v1239_v62, 6.0  ;;  %v1752_v9 = vmin.f32 %v1240_v63, 6.0 }
  0x84   : > { %2773 = vst [vmem:[%s3598_s17 + $0x248] sm:$0xff] %v2261_v57  ;;  %v1242_v10 = vmax.f32 %v730_v0, 0.0  ;;  %v1753_v11 = vmin.f32 %v1241_v2, 6.0  ;;  %v1243_v12 = vmax.f32 %v731_v3, 0.0  ;;  %v733_v14 = vadd.f32 3.0, %v221_v5  ;;  %v223_v15 = vld [vmem:[%s3576_s24 + $0x298] sm:$0xff] }
  0x85   : > { %v1244_v13 = vmax.f32 %v732_v4, 0.0  ;;  %v224_v16 = vld [vmem:[%s3576_s24 + $0x2a0] sm:$0xff]  ;;  %2774 = vst [vmem:[%s3598_s17 + $0x250] sm:$0xff] %v2262_v7  ;;  %v2263_v17 = vmul.f32 0.16666667, %v1751_v8  ;;  %v225_v24 = vld [vmem:[%s3576_s24 + $0x2a8] sm:$0xff] }
  0x86   : > { %v2264_v18 = vmul.f32 0.16666667, %v1752_v9  ;;  %v1754_v19 = vmin.f32 %v1242_v10, 6.0  ;;  %v2265_v20 = vmul.f32 0.16666667, %v1753_v11  ;;  %v1755_v21 = vmin.f32 %v1243_v12, 6.0 }
  0x87   : > { %v1756_v22 = vmin.f32 %v1244_v13, 6.0  ;;  %v1245_v23 = vmax.f32 %v733_v14, 0.0  ;;  %2775 = vst [vmem:[%s3598_s17 + $0x258] sm:$0xff] %v2263_v17  ;;  %v734_v26 = vadd.f32 3.0, %v222_v6  ;;  %v735_v27 = vadd.f32 3.0, %v223_v15  ;;  %v226_v36 = vld [vmem:[%s3576_s24 + $0x2b0] sm:$0xff] }
  0x88   : > { %v2266_v25 = vmul.f32 0.16666667, %v1754_v19  ;;  %v736_v28 = vadd.f32 3.0, %v224_v16  ;;  %2776 = vst [vmem:[%s3598_s17 + $0x260] sm:$0xff] %v2264_v18  ;;  %v2267_v29 = vmul.f32 0.16666667, %v1755_v21 }
  0x89   : > { %v2268_v30 = vmul.f32 0.16666667, %v1756_v22  ;;  %v1757_v31 = vmin.f32 %v1245_v23, 6.0  ;;  %2777 = vst [vmem:[%s3598_s17 + $0x268] sm:$0xff] %v2265_v20  ;;  %v1246_v32 = vmax.f32 %v734_v26, 0.0  ;;  %v1247_v33 = vmax.f32 %v735_v27, 0.0 }
  0x8a   : > { %v1248_v34 = vmax.f32 %v736_v28, 0.0  ;;  %v737_v35 = vadd.f32 3.0, %v225_v24  ;;  %2778 = vst [vmem:[%s3598_s17 + $0x270] sm:$0xff] %v2266_v25  ;;  %v738_v38 = vadd.f32 3.0, %v226_v36  ;;  %v227_v39 = vld [vmem:[%s3576_s24 + $0x2b8] sm:$0xff]  ;;  %v228_v40 = vld [vmem:[%s3576_s24 + $0x2c0] sm:$0xff] }
  0x8b   : > { %v2269_v37 = vmul.f32 0.16666667, %v1757_v31  ;;  %2779 = vst [vmem:[%s3598_s17 + $0x278] sm:$0xff] %v2267_v29  ;;  %v1758_v41 = vmin.f32 %v1246_v32, 6.0  ;;  %v1759_v42 = vmin.f32 %v1247_v33, 6.0  ;;  %v229_v45 = vld [vmem:[%s3576_s24 + $0x2c8] sm:$0xff] }
  0x8c   : > { %v1760_v43 = vmin.f32 %v1248_v34, 6.0  ;;  %v1249_v44 = vmax.f32 %v737_v35, 0.0  ;;  %2780 = vst [vmem:[%s3598_s17 + $0x280] sm:$0xff] %v2268_v30  ;;  %v1250_v46 = vmax.f32 %v738_v38, 0.0  ;;  %v739_v47 = vadd.f32 3.0, %v227_v39  ;;  %v230_v50 = vld [vmem:[%s3576_s24 + $0x2d0] sm:$0xff] }
  0x8d   : > { %v740_v48 = vadd.f32 3.0, %v228_v40  ;;  %v741_v49 = vadd.f32 3.0, %v229_v45  ;;  %2781 = vst [vmem:[%s3598_s17 + $0x288] sm:$0xff] %v2269_v37  ;;  %v2270_v51 = vmul.f32 0.16666667, %v1758_v41  ;;  %v231_v58 = vld [vmem:[%s3576_s24 + $0x2d8] sm:$0xff] }
  0x8e   : > { %v2271_v52 = vmul.f32 0.16666667, %v1759_v42  ;;  %v1761_v53 = vmin.f32 %v1249_v44, 6.0  ;;  %v2272_v54 = vmul.f32 0.16666667, %v1760_v43  ;;  %v1762_v55 = vmin.f32 %v1250_v46, 6.0 }
  0x8f   : > { %v1251_v56 = vmax.f32 %v739_v47, 0.0  ;;  %v1252_v57 = vmax.f32 %v740_v48, 0.0  ;;  %2782 = vst [vmem:[%s3598_s17 + $0x290] sm:$0xff] %v2270_v51  ;;  %v1253_v60 = vmax.f32 %v741_v49, 0.0  ;;  %v742_v61 = vadd.f32 3.0, %v230_v50  ;;  %v232_v2 = vld [vmem:[%s3576_s24 + $0x2e0] sm:$0xff] }
  0x90   : > { %v2273_v59 = vmul.f32 0.16666667, %v1761_v53  ;;  %v743_v62 = vadd.f32 3.0, %v231_v58  ;;  %2783 = vst [vmem:[%s3598_s17 + $0x298] sm:$0xff] %v2271_v52  ;;  %v2274_v63 = vmul.f32 0.16666667, %v1762_v55 }
  0x91   : > { %v1763_v0 = vmin.f32 %v1251_v56, 6.0  ;;  %v1764_v1 = vmin.f32 %v1252_v57, 6.0  ;;  %2784 = vst [vmem:[%s3598_s17 + $0x2a0] sm:$0xff] %v2272_v54  ;;  %v1765_v3 = vmin.f32 %v1253_v60, 6.0  ;;  %v1254_v4 = vmax.f32 %v742_v61, 0.0  ;;  %v233_v7 = vld [vmem:[%s3576_s24 + $0x2e8] sm:$0xff] }
  0x92   : > { %v1255_v5 = vmax.f32 %v743_v62, 0.0  ;;  %v744_v6 = vadd.f32 3.0, %v232_v2  ;;  %2785 = vst [vmem:[%s3598_s17 + $0x2a8] sm:$0xff] %v2273_v59  ;;  %v745_v10 = vadd.f32 3.0, %v233_v7  ;;  %v234_v16 = vld [vmem:[%s3576_s24 + $0x2f0] sm:$0xff]  ;;  %v235_v17 = vld [vmem:[%s3576_s24 + $0x2f8] sm:$0xff] }
  0x93   : > { %v2275_v8 = vmul.f32 0.16666667, %v1763_v0  ;;  %v2276_v9 = vmul.f32 0.16666667, %v1764_v1  ;;  %2786 = vst [vmem:[%s3598_s17 + $0x2b0] sm:$0xff] %v2274_v63  ;;  %v1766_v12 = vmin.f32 %v1254_v4, 6.0 }
  0x94   : > { %v2277_v11 = vmul.f32 0.16666667, %v1765_v3  ;;  %v1767_v13 = vmin.f32 %v1255_v5, 6.0  ;;  %v1256_v14 = vmax.f32 %v744_v6, 0.0  ;;  %v1257_v15 = vmax.f32 %v745_v10, 0.0  ;;  %v236_v18 = vld [vmem:[%s3576_s24 + $0x300] sm:$0xff] }
  0x95   : > { %2787 = vst [vmem:[%s3598_s17 + $0x2b8] sm:$0xff] %v2275_v8  ;;  %v2278_v19 = vmul.f32 0.16666667, %v1766_v12  ;;  %v746_v23 = vadd.f32 3.0, %v234_v16  ;;  %v747_v24 = vadd.f32 3.0, %v235_v17  ;;  %v748_v25 = vadd.f32 3.0, %v236_v18 }
  0x96   : > { %2788 = vst [vmem:[%s3598_s17 + $0x2c0] sm:$0xff] %v2276_v9  ;;  %v2279_v20 = vmul.f32 0.16666667, %v1767_v13  ;;  %v1768_v21 = vmin.f32 %v1256_v14, 6.0  ;;  %v1769_v22 = vmin.f32 %v1257_v15, 6.0  ;;  %v237_v26 = vld [vmem:[%s3576_s24 + $0x308] sm:$0xff] }
  0x97   : > { %2789 = vst [vmem:[%s3598_s17 + $0x2c8] sm:$0xff] %v2277_v11  ;;  %v749_v28 = vadd.f32 3.0, %v237_v26  ;;  %v238_v29 = vld [vmem:[%s3576_s24 + $0x310] sm:$0xff]  ;;  %v239_v30 = vld [vmem:[%s3576_s24 + $0x318] sm:$0xff]  ;;  %v1258_v32 = vmax.f32 %v746_v23, 0.0  ;;  %v1259_v33 = vmax.f32 %v747_v24, 0.0 }
  0x98   : > { %2790 = vst [vmem:[%s3598_s17 + $0x2d0] sm:$0xff] %v2278_v19  ;;  %v2280_v27 = vmul.f32 0.16666667, %v1768_v21  ;;  %v2281_v31 = vmul.f32 0.16666667, %v1769_v22  ;;  %v1260_v34 = vmax.f32 %v748_v25, 0.0 }
  0x99   : > { %2791 = vst [vmem:[%s3598_s17 + $0x2d8] sm:$0xff] %v2279_v20  ;;  %v1261_v35 = vmax.f32 %v749_v28, 0.0  ;;  %v750_v36 = vadd.f32 3.0, %v238_v29  ;;  %v751_v37 = vadd.f32 3.0, %v239_v30  ;;  %v240_v38 = vld [vmem:[%s3576_s24 + $0x320] sm:$0xff]  ;;  %v241_v39 = vld [vmem:[%s3576_s24 + $0x328] sm:$0xff] }
  0x9a   : > { %2792 = vst [vmem:[%s3598_s17 + $0x2e0] sm:$0xff] %v2280_v27  ;;  %v1770_v40 = vmin.f32 %v1258_v32, 6.0  ;;  %v1771_v41 = vmin.f32 %v1259_v33, 6.0  ;;  %v1772_v42 = vmin.f32 %v1260_v34, 6.0  ;;  %v752_v43 = vadd.f32 3.0, %v240_v38  ;;  %v242_v44 = vld [vmem:[%s3576_s24 + $0x330] sm:$0xff] }
  0x9b   : > { %2793 = vst [vmem:[%s3598_s17 + $0x2e8] sm:$0xff] %v2281_v31  ;;  %v1773_v45 = vmin.f32 %v1261_v35, 6.0  ;;  %v1262_v46 = vmax.f32 %v750_v36, 0.0  ;;  %v1263_v47 = vmax.f32 %v751_v37, 0.0  ;;  %v753_v48 = vadd.f32 3.0, %v241_v39  ;;  %v243_v49 = vld [vmem:[%s3576_s24 + $0x338] sm:$0xff] }
  0x9c   : > { %v244_v50 = vld [vmem:[%s3576_s24 + $0x340] sm:$0xff]  ;;  %v2282_v51 = vmul.f32 0.16666667, %v1770_v40  ;;  %v2283_v52 = vmul.f32 0.16666667, %v1771_v41  ;;  %v1264_v57 = vmax.f32 %v752_v43, 0.0 }
  0x9d   : > { %v2284_v53 = vmul.f32 0.16666667, %v1772_v42  ;;  %v2285_v54 = vmul.f32 0.16666667, %v1773_v45  ;;  %v1774_v55 = vmin.f32 %v1262_v46, 6.0  ;;  %v1775_v56 = vmin.f32 %v1263_v47, 6.0 }
  0x9e   : > { %v245_v58 = vld [vmem:[%s3576_s24 + $0x348] sm:$0xff]  ;;  %2794 = vst [vmem:[%s3598_s17 + $0x2f0] sm:$0xff] %v2282_v51  ;;  %v1265_v59 = vmax.f32 %v753_v48, 0.0  ;;  %v754_v60 = vadd.f32 3.0, %v242_v44  ;;  %v755_v61 = vadd.f32 3.0, %v243_v49  ;;  %v756_v62 = vadd.f32 3.0, %v244_v50 }
  0x9f   : > { %v246_v63 = vld [vmem:[%s3576_s24 + $0x350] sm:$0xff]  ;;  %2795 = vst [vmem:[%s3598_s17 + $0x2f8] sm:$0xff] %v2283_v52  ;;  %v2286_v0 = vmul.f32 0.16666667, %v1774_v55  ;;  %v2287_v1 = vmul.f32 0.16666667, %v1775_v56 }
  0xa0   : > { %v1776_v2 = vmin.f32 %v1264_v57, 6.0  ;;  %2796 = vst [vmem:[%s3598_s17 + $0x300] sm:$0xff] %v2284_v53  ;;  %v1777_v3 = vmin.f32 %v1265_v59, 6.0  ;;  %v1266_v4 = vmax.f32 %v754_v60, 0.0  ;;  %v1267_v5 = vmax.f32 %v755_v61, 0.0  ;;  %v247_v7 = vld [vmem:[%s3576_s24 + $0x358] sm:$0xff] }
  0xa1   : > { %v1268_v6 = vmax.f32 %v756_v62, 0.0  ;;  %2797 = vst [vmem:[%s3598_s17 + $0x308] sm:$0xff] %v2285_v54  ;;  %v757_v9 = vadd.f32 3.0, %v245_v58  ;;  %v758_v10 = vadd.f32 3.0, %v246_v63  ;;  %v759_v11 = vadd.f32 3.0, %v247_v7  ;;  %v248_v19 = vld [vmem:[%s3576_s24 + $0x360] sm:$0xff] }
  0xa2   : > { %v2288_v8 = vmul.f32 0.16666667, %v1776_v2  ;;  %2798 = vst [vmem:[%s3598_s17 + $0x310] sm:$0xff] %v2286_v0  ;;  %v2289_v12 = vmul.f32 0.16666667, %v1777_v3  ;;  %v1778_v13 = vmin.f32 %v1266_v4, 6.0 }
  0xa3   : > { %v1779_v14 = vmin.f32 %v1267_v5, 6.0  ;;  %v1780_v15 = vmin.f32 %v1268_v6, 6.0  ;;  %2799 = vst [vmem:[%s3598_s17 + $0x318] sm:$0xff] %v2287_v1  ;;  %v1269_v16 = vmax.f32 %v757_v9, 0.0  ;;  %v1270_v17 = vmax.f32 %v758_v10, 0.0  ;;  %v249_v20 = vld [vmem:[%s3576_s24 + $0x368] sm:$0xff] }
  0xa4   : > { %v1271_v18 = vmax.f32 %v759_v11, 0.0  ;;  %2800 = vst [vmem:[%s3598_s17 + $0x320] sm:$0xff] %v2288_v8  ;;  %v2290_v21 = vmul.f32 0.16666667, %v1778_v13  ;;  %v760_v23 = vadd.f32 3.0, %v248_v19  ;;  %v761_v29 = vadd.f32 3.0, %v249_v20 }
  0xa5   : > { %v2291_v22 = vmul.f32 0.16666667, %v1779_v14  ;;  %2801 = vst [vmem:[%s3598_s17 + $0x328] sm:$0xff] %v2289_v12  ;;  %v2292_v24 = vmul.f32 0.16666667, %v1780_v15  ;;  %v1781_v25 = vmin.f32 %v1269_v16, 6.0 }
  0xa6   : > { %v1782_v26 = vmin.f32 %v1270_v17, 6.0  ;;  %v1783_v27 = vmin.f32 %v1271_v18, 6.0  ;;  %2802 = vst [vmem:[%s3598_s17 + $0x330] sm:$0xff] %v2290_v21  ;;  %v1272_v28 = vmax.f32 %v760_v23, 0.0  ;;  %v250_v30 = vld [vmem:[%s3576_s24 + $0x370] sm:$0xff]  ;;  %v251_v31 = vld [vmem:[%s3576_s24 + $0x378] sm:$0xff] }
  0xa7   : > { %v252_v32 = vld [vmem:[%s3576_s24 + $0x380] sm:$0xff]  ;;  %2803 = vst [vmem:[%s3598_s17 + $0x338] sm:$0xff] %v2291_v22  ;;  %v2293_v33 = vmul.f32 0.16666667, %v1781_v25  ;;  %v762_v35 = vadd.f32 3.0, %v250_v30  ;;  %v1273_v38 = vmax.f32 %v761_v29, 0.0 }
  0xa8   : > { %v2294_v34 = vmul.f32 0.16666667, %v1782_v26  ;;  %2804 = vst [vmem:[%s3598_s17 + $0x340] sm:$0xff] %v2292_v24  ;;  %v2295_v36 = vmul.f32 0.16666667, %v1783_v27  ;;  %v1784_v37 = vmin.f32 %v1272_v28, 6.0 }
  0xa9   : > { %v763_v39 = vadd.f32 3.0, %v251_v31  ;;  %2805 = vst [vmem:[%s3598_s17 + $0x348] sm:$0xff] %v2293_v33  ;;  %v1274_v40 = vmax.f32 %v762_v35, 0.0  ;;  %v764_v41 = vadd.f32 3.0, %v252_v32  ;;  %v253_v42 = vld [vmem:[%s3576_s24 + $0x388] sm:$0xff]  ;;  %v254_v43 = vld [vmem:[%s3576_s24 + $0x390] sm:$0xff] }
  0xaa   : > { %v255_v44 = vld [vmem:[%s3576_s24 + $0x398] sm:$0xff]  ;;  %2806 = vst [vmem:[%s3598_s17 + $0x350] sm:$0xff] %v2294_v34  ;;  %v2296_v45 = vmul.f32 0.16666667, %v1784_v37  ;;  %v1785_v46 = vmin.f32 %v1273_v38, 6.0  ;;  %v765_v48 = vadd.f32 3.0, %v253_v42 }
  0xab   : > { %v1275_v47 = vmax.f32 %v763_v39, 0.0  ;;  %2807 = vst [vmem:[%s3598_s17 + $0x358] sm:$0xff] %v2295_v36  ;;  %v1786_v49 = vmin.f32 %v1274_v40, 6.0  ;;  %v1276_v50 = vmax.f32 %v764_v41, 0.0  ;;  %v766_v51 = vadd.f32 3.0, %v254_v43  ;;  %v256_v53 = vld [vmem:[%s3576_s24 + $0x3a0] sm:$0xff] }
  0xac   : > { %v767_v52 = vadd.f32 3.0, %v255_v44  ;;  %2808 = vst [vmem:[%s3598_s17 + $0x360] sm:$0xff] %v2296_v45  ;;  %v2297_v54 = vmul.f32 0.16666667, %v1785_v46  ;;  %v1277_v56 = vmax.f32 %v765_v48, 0.0  ;;  %v768_v57 = vadd.f32 3.0, %v256_v53 }
  0xad   : > { %v1787_v55 = vmin.f32 %v1275_v47, 6.0  ;;  %v2298_v58 = vmul.f32 0.16666667, %v1786_v49  ;;  %v1788_v59 = vmin.f32 %v1276_v50, 6.0  ;;  %v1278_v60 = vmax.f32 %v766_v51, 0.0  ;;  %v257_v62 = vld [vmem:[%s3576_s24 + $0x3a8] sm:$0xff] }
  0xae   : > { %v1279_v61 = vmax.f32 %v767_v52, 0.0  ;;  %2809 = vst [vmem:[%s3598_s17 + $0x368] sm:$0xff] %v2297_v54  ;;  %v1789_v0 = vmin.f32 %v1277_v56, 6.0  ;;  %v1280_v1 = vmax.f32 %v768_v57, 0.0  ;;  %v769_v2 = vadd.f32 3.0, %v257_v62  ;;  %v258_v6 = vld [vmem:[%s3576_s24 + $0x3b0] sm:$0xff] }
  0xaf   : > { %v2299_v63 = vmul.f32 0.16666667, %v1787_v55  ;;  %2810 = vst [vmem:[%s3598_s17 + $0x370] sm:$0xff] %v2298_v58  ;;  %v2300_v3 = vmul.f32 0.16666667, %v1788_v59  ;;  %v1790_v4 = vmin.f32 %v1278_v60, 6.0 }
  0xb0   : > { %v1791_v5 = vmin.f32 %v1279_v61, 6.0  ;;  %v2301_v7 = vmul.f32 0.16666667, %v1789_v0  ;;  %v1792_v8 = vmin.f32 %v1280_v1, 6.0  ;;  %v1281_v9 = vmax.f32 %v769_v2, 0.0  ;;  %v259_v13 = vld [vmem:[%s3576_s24 + $0x3b8] sm:$0xff] }
  0xb1   : > { %2811 = vst [vmem:[%s3598_s17 + $0x378] sm:$0xff] %v2299_v63  ;;  %v770_v10 = vadd.f32 3.0, %v258_v6  ;;  %v2302_v11 = vmul.f32 0.16666667, %v1790_v4  ;;  %v771_v17 = vadd.f32 3.0, %v259_v13  ;;  %v260_v18 = vld [vmem:[%s3576_s24 + $0x3c0] sm:$0xff] }
  0xb2   : > { %2812 = vst [vmem:[%s3598_s17 + $0x380] sm:$0xff] %v2300_v3  ;;  %v2303_v12 = vmul.f32 0.16666667, %v1791_v5  ;;  %v2304_v14 = vmul.f32 0.16666667, %v1792_v8  ;;  %v1793_v15 = vmin.f32 %v1281_v9, 6.0 }
  0xb3   : > { %2813 = vst [vmem:[%s3598_s17 + $0x388] sm:$0xff] %v2301_v7  ;;  %v1282_v16 = vmax.f32 %v770_v10, 0.0  ;;  %v261_v19 = vld [vmem:[%s3576_s24 + $0x3c8] sm:$0xff]  ;;  %v262_v20 = vld [vmem:[%s3576_s24 + $0x3d0] sm:$0xff]  ;;  %v1283_v23 = vmax.f32 %v771_v17, 0.0  ;;  %v772_v24 = vadd.f32 3.0, %v260_v18 }
  0xb4   : > { %2814 = vst [vmem:[%s3598_s17 + $0x390] sm:$0xff] %v2302_v11  ;;  %v2305_v21 = vmul.f32 0.16666667, %v1793_v15  ;;  %v773_v25 = vadd.f32 3.0, %v261_v19  ;;  %v774_v26 = vadd.f32 3.0, %v262_v20  ;;  %v263_v27 = vld [vmem:[%s3576_s24 + $0x3d8] sm:$0xff] }
  0xb5   : > { %2815 = vst [vmem:[%s3598_s17 + $0x398] sm:$0xff] %v2303_v12  ;;  %v1794_v22 = vmin.f32 %v1282_v16, 6.0  ;;  %v264_v28 = vld [vmem:[%s3576_s24 + $0x3e0] sm:$0xff]  ;;  %v265_v29 = vld [vmem:[%s3576_s24 + $0x3e8] sm:$0xff]  ;;  %v1795_v31 = vmin.f32 %v1283_v23, 6.0  ;;  %v1284_v32 = vmax.f32 %v772_v24, 0.0 }
  0xb6   : > { %2816 = vst [vmem:[%s3598_s17 + $0x3a0] sm:$0xff] %v2304_v14  ;;  %v775_v33 = vadd.f32 3.0, %v263_v27  ;;  %v1285_v34 = vmax.f32 %v773_v25, 0.0  ;;  %v1286_v35 = vmax.f32 %v774_v26, 0.0  ;;  %v776_v36 = vadd.f32 3.0, %v264_v28  ;;  %v266_v38 = vld [vmem:[%s3576_s24 + $0x3f0] sm:$0xff] }
  0xb7   : > { %2817 = vst [vmem:[%s3598_s17 + $0x3a8] sm:$0xff] %v2305_v21  ;;  %v2306_v30 = vmul.f32 0.16666667, %v1794_v22  ;;  %v777_v37 = vadd.f32 3.0, %v265_v29  ;;  %v267_v39 = vld [vmem:[%s3576_s24 + $0x3f8] sm:$0xff]  ;;  %v1796_v41 = vmin.f32 %v1284_v32, 6.0 }
  0xb8   : > { %v2307_v40 = vmul.f32 0.16666667, %v1795_v31  ;;  %v1287_v42 = vmax.f32 %v775_v33, 0.0  ;;  %v778_v43 = vadd.f32 3.0, %v266_v38  ;;  %v1797_v44 = vmin.f32 %v1285_v34, 6.0  ;;  %v268_v48 = vld [vmem:[%s3576_s24 + $0x400] sm:$0xff] }
  0xb9   : > { %2818 = vst [vmem:[%s3598_s17 + $0x3b0] sm:$0xff] %v2306_v30  ;;  %v1798_v45 = vmin.f32 %v1286_v35, 6.0  ;;  %v1288_v46 = vmax.f32 %v776_v36, 0.0  ;;  %v1289_v47 = vmax.f32 %v777_v37, 0.0  ;;  %v269_v49 = vld [vmem:[%s3576_s24 + $0x408] sm:$0xff]  ;;  %v779_v53 = vadd.f32 3.0, %v267_v39 }
  0xba   : > { %2819 = vst [vmem:[%s3598_s17 + $0x3b8] sm:$0xff] %v2307_v40  ;;  %v2308_v50 = vmul.f32 0.16666667, %v1796_v41  ;;  %v1799_v51 = vmin.f32 %v1287_v42, 6.0  ;;  %v1290_v52 = vmax.f32 %v778_v43, 0.0  ;;  %v780_v61 = vadd.f32 3.0, %v268_v48 }
  0xbb   : > { %v2309_v54 = vmul.f32 0.16666667, %v1797_v44  ;;  %v2310_v55 = vmul.f32 0.16666667, %v1798_v45  ;;  %v1800_v56 = vmin.f32 %v1288_v46, 6.0  ;;  %v1801_v57 = vmin.f32 %v1289_v47, 6.0 }
  0xbc   : > { %2820 = vst [vmem:[%s3598_s17 + $0x3c0] sm:$0xff] %v2308_v50  ;;  %v2311_v58 = vmul.f32 0.16666667, %v1799_v51  ;;  %v1802_v59 = vmin.f32 %v1290_v52, 6.0  ;;  %v1291_v60 = vmax.f32 %v779_v53, 0.0  ;;  %v781_v0 = vadd.f32 3.0, %v269_v49 }
  0xbd   : > { %2821 = vst [vmem:[%s3598_s17 + $0x3c8] sm:$0xff] %v2309_v54  ;;  %v2312_v62 = vmul.f32 0.16666667, %v1800_v56  ;;  %v2313_v63 = vmul.f32 0.16666667, %v1801_v57  ;;  %v1292_v3 = vmax.f32 %v780_v61, 0.0 }
  0xbe   : > { %2822 = vst [vmem:[%s3598_s17 + $0x3d0] sm:$0xff] %v2310_v55  ;;  %v2314_v1 = vmul.f32 0.16666667, %v1802_v59  ;;  %v1803_v2 = vmin.f32 %v1291_v60, 6.0  ;;  %v270_v4 = vld [vmem:[%s3576_s24 + $0x410] sm:$0xff]  ;;  %v1293_v5 = vmax.f32 %v781_v0, 0.0 }
  0xbf   : > { %2823 = vst [vmem:[%s3598_s17 + $0x3d8] sm:$0xff] %v2311_v58  ;;  %v782_v6 = vadd.f32 3.0, %v270_v4  ;;  %v271_v7 = vld [vmem:[%s3576_s24 + $0x418] sm:$0xff]  ;;  %v272_v8 = vld [vmem:[%s3576_s24 + $0x420] sm:$0xff]  ;;  %v273_v9 = vld [vmem:[%s3576_s24 + $0x428] sm:$0xff]  ;;  %v1804_v11 = vmin.f32 %v1292_v3, 6.0 }
  0xc0   : > { %2824 = vst [vmem:[%s3598_s17 + $0x3e0] sm:$0xff] %v2312_v62  ;;  %v2315_v10 = vmul.f32 0.16666667, %v1803_v2  ;;  %v783_v12 = vadd.f32 3.0, %v271_v7  ;;  %v784_v13 = vadd.f32 3.0, %v272_v8  ;;  %v1805_v14 = vmin.f32 %v1293_v5, 6.0 }
  0xc1   : > { %2825 = vst [vmem:[%s3598_s17 + $0x3e8] sm:$0xff] %v2313_v63  ;;  %v1294_v15 = vmax.f32 %v782_v6, 0.0  ;;  %v785_v16 = vadd.f32 3.0, %v273_v9  ;;  %v274_v17 = vld [vmem:[%s3576_s24 + $0x430] sm:$0xff]  ;;  %v275_v18 = vld [vmem:[%s3576_s24 + $0x438] sm:$0xff]  ;;  %v276_v30 = vld [vmem:[%s3576_s24 + $0x440] sm:$0xff] }
  0xc2   : > { %2826 = vst [vmem:[%s3598_s17 + $0x3f0] sm:$0xff] %v2314_v1  ;;  %v2316_v19 = vmul.f32 0.16666667, %v1804_v11  ;;  %v1295_v20 = vmax.f32 %v783_v12, 0.0  ;;  %v1296_v21 = vmax.f32 %v784_v13, 0.0  ;;  %v786_v22 = vadd.f32 3.0, %v274_v17 }
  0xc3   : > { %2827 = vst [vmem:[%s3598_s17 + $0x3f8] sm:$0xff] %v2315_v10  ;;  %v2317_v23 = vmul.f32 0.16666667, %v1805_v14  ;;  %v1806_v24 = vmin.f32 %v1294_v15, 6.0  ;;  %v1297_v25 = vmax.f32 %v785_v16, 0.0  ;;  %v787_v26 = vadd.f32 3.0, %v275_v18 }
  0xc4   : > { %2828 = vst [vmem:[%s3598_s17 + $0x400] sm:$0xff] %v2316_v19  ;;  %v1807_v27 = vmin.f32 %v1295_v20, 6.0  ;;  %v1808_v28 = vmin.f32 %v1296_v21, 6.0  ;;  %v1298_v29 = vmax.f32 %v786_v22, 0.0  ;;  %v277_v31 = vld [vmem:[%s3576_s24 + $0x448] sm:$0xff]  ;;  %v788_v35 = vadd.f32 3.0, %v276_v30 }
  0xc5   : > { %2829 = vst [vmem:[%s3598_s17 + $0x408] sm:$0xff] %v2317_v23  ;;  %v2318_v32 = vmul.f32 0.16666667, %v1806_v24  ;;  %v1809_v33 = vmin.f32 %v1297_v25, 6.0  ;;  %v1299_v34 = vmax.f32 %v787_v26, 0.0  ;;  %v789_v39 = vadd.f32 3.0, %v277_v31 }
  0xc6   : > { %v2319_v36 = vmul.f32 0.16666667, %v1807_v27  ;;  %v2320_v37 = vmul.f32 0.16666667, %v1808_v28  ;;  %v1810_v38 = vmin.f32 %v1298_v29, 6.0  ;;  %v1300_v42 = vmax.f32 %v788_v35, 0.0 }
  0xc7   : > { %2830 = vst [vmem:[%s3598_s17 + $0x410] sm:$0xff] %v2318_v32  ;;  %v2321_v40 = vmul.f32 0.16666667, %v1809_v33  ;;  %v1811_v41 = vmin.f32 %v1299_v34, 6.0  ;;  %v278_v43 = vld [vmem:[%s3576_s24 + $0x450] sm:$0xff]  ;;  %v1301_v45 = vmax.f32 %v789_v39, 0.0 }
  0xc8   : > { %2831 = vst [vmem:[%s3598_s17 + $0x418] sm:$0xff] %v2319_v36  ;;  %v2322_v44 = vmul.f32 0.16666667, %v1810_v38  ;;  %v790_v46 = vadd.f32 3.0, %v278_v43  ;;  %v279_v47 = vld [vmem:[%s3576_s24 + $0x458] sm:$0xff]  ;;  %v1812_v49 = vmin.f32 %v1300_v42, 6.0 }
  0xc9   : > { %2832 = vst [vmem:[%s3598_s17 + $0x420] sm:$0xff] %v2320_v37  ;;  %v2323_v48 = vmul.f32 0.16666667, %v1811_v41  ;;  %v791_v50 = vadd.f32 3.0, %v279_v47  ;;  %v280_v51 = vld [vmem:[%s3576_s24 + $0x460] sm:$0xff]  ;;  %v1813_v52 = vmin.f32 %v1301_v45, 6.0 }
  0xca   : > { %2833 = vst [vmem:[%s3598_s17 + $0x428] sm:$0xff] %v2321_v40  ;;  %v1302_v53 = vmax.f32 %v790_v46, 0.0  ;;  %v792_v54 = vadd.f32 3.0, %v280_v51  ;;  %v281_v55 = vld [vmem:[%s3576_s24 + $0x468] sm:$0xff]  ;;  %v282_v56 = vld [vmem:[%s3576_s24 + $0x470] sm:$0xff]  ;;  %v283_v0 = vld [vmem:[%s3576_s24 + $0x478] sm:$0xff] }
  0xcb   : > { %2834 = vst [vmem:[%s3598_s17 + $0x430] sm:$0xff] %v2322_v44  ;;  %v2324_v57 = vmul.f32 0.16666667, %v1812_v49  ;;  %v1303_v58 = vmax.f32 %v791_v50, 0.0  ;;  %v793_v59 = vadd.f32 3.0, %v281_v55  ;;  %v794_v60 = vadd.f32 3.0, %v282_v56 }
  0xcc   : > { %2835 = vst [vmem:[%s3598_s17 + $0x438] sm:$0xff] %v2323_v48  ;;  %v2325_v61 = vmul.f32 0.16666667, %v1813_v52  ;;  %v1814_v62 = vmin.f32 %v1302_v53, 6.0  ;;  %v1304_v63 = vmax.f32 %v792_v54, 0.0  ;;  %v795_v4 = vadd.f32 3.0, %v283_v0 }
  0xcd   : > { %2836 = vst [vmem:[%s3598_s17 + $0x440] sm:$0xff] %v2324_v57  ;;  %v1815_v1 = vmin.f32 %v1303_v58, 6.0  ;;  %v1305_v2 = vmax.f32 %v793_v59, 0.0  ;;  %v1306_v3 = vmax.f32 %v794_v60, 0.0  ;;  %v284_v5 = vld [vmem:[%s3576_s24 + $0x480] sm:$0xff]  ;;  %v285_v9 = vld [vmem:[%s3576_s24 + $0x488] sm:$0xff] }
  0xce   : > { %2837 = vst [vmem:[%s3598_s17 + $0x448] sm:$0xff] %v2325_v61  ;;  %v2326_v6 = vmul.f32 0.16666667, %v1814_v62  ;;  %v1816_v7 = vmin.f32 %v1304_v63, 6.0  ;;  %v796_v8 = vadd.f32 3.0, %v284_v5  ;;  %v1307_v13 = vmax.f32 %v795_v4, 0.0 }
  0xcf   : > { %v2327_v10 = vmul.f32 0.16666667, %v1815_v1  ;;  %v1817_v11 = vmin.f32 %v1305_v2, 6.0  ;;  %v1818_v12 = vmin.f32 %v1306_v3, 6.0  ;;  %v286_v14 = vld [vmem:[%s3576_s24 + $0x490] sm:$0xff]  ;;  %v797_v17 = vadd.f32 3.0, %v285_v9 }
  0xd0   : > { %2838 = vst [vmem:[%s3598_s17 + $0x450] sm:$0xff] %v2326_v6  ;;  %v2328_v15 = vmul.f32 0.16666667, %v1816_v7  ;;  %v1308_v16 = vmax.f32 %v796_v8, 0.0  ;;  %v798_v18 = vadd.f32 3.0, %v286_v14  ;;  %v1819_v21 = vmin.f32 %v1307_v13, 6.0 }
  0xd1   : > { %2839 = vst [vmem:[%s3598_s17 + $0x458] sm:$0xff] %v2327_v10  ;;  %v2329_v19 = vmul.f32 0.16666667, %v1817_v11  ;;  %v2330_v20 = vmul.f32 0.16666667, %v1818_v12  ;;  %v1309_v23 = vmax.f32 %v797_v17, 0.0 }
  0xd2   : > { %2840 = vst [vmem:[%s3598_s17 + $0x460] sm:$0xff] %v2328_v15  ;;  %v1820_v22 = vmin.f32 %v1308_v16, 6.0  ;;  %v1310_v24 = vmax.f32 %v798_v18, 0.0  ;;  %v287_v25 = vld [vmem:[%s3576_s24 + $0x498] sm:$0xff]  ;;  %v288_v26 = vld [vmem:[%s3576_s24 + $0x4a0] sm:$0xff]  ;;  %v289_v30 = vld [vmem:[%s3576_s24 + $0x4a8] sm:$0xff] }
  0xd3   : > { %2841 = vst [vmem:[%s3598_s17 + $0x468] sm:$0xff] %v2329_v19  ;;  %v2331_v27 = vmul.f32 0.16666667, %v1819_v21  ;;  %v799_v28 = vadd.f32 3.0, %v287_v25  ;;  %v800_v29 = vadd.f32 3.0, %v288_v26  ;;  %v1821_v32 = vmin.f32 %v1309_v23, 6.0 }
  0xd4   : > { %2842 = vst [vmem:[%s3598_s17 + $0x470] sm:$0xff] %v2330_v20  ;;  %v2332_v31 = vmul.f32 0.16666667, %v1820_v22  ;;  %v1822_v33 = vmin.f32 %v1310_v24, 6.0  ;;  %v801_v34 = vadd.f32 3.0, %v289_v30  ;;  %v290_v37 = vld [vmem:[%s3576_s24 + $0x4b0] sm:$0xff] }
  0xd5   : > { %2843 = vst [vmem:[%s3598_s17 + $0x478] sm:$0xff] %v2331_v27  ;;  %v1311_v35 = vmax.f32 %v799_v28, 0.0  ;;  %v1312_v36 = vmax.f32 %v800_v29, 0.0  ;;  %v291_v38 = vld [vmem:[%s3576_s24 + $0x4b8] sm:$0xff]  ;;  %v292_v39 = vld [vmem:[%s3576_s24 + $0x4c0] sm:$0xff]  ;;  %v802_v45 = vadd.f32 3.0, %v290_v37 }
  0xd6   : > { %2844 = vst [vmem:[%s3598_s17 + $0x480] sm:$0xff] %v2332_v31  ;;  %v2333_v40 = vmul.f32 0.16666667, %v1821_v32  ;;  %v2334_v41 = vmul.f32 0.16666667, %v1822_v33  ;;  %v1313_v42 = vmax.f32 %v801_v34, 0.0 }
  0xd7   : > { %v1823_v43 = vmin.f32 %v1311_v35, 6.0  ;;  %v1824_v44 = vmin.f32 %v1312_v36, 6.0  ;;  %v803_v46 = vadd.f32 3.0, %v291_v38  ;;  %v293_v47 = vld [vmem:[%s3576_s24 + $0x4c8] sm:$0xff]  ;;  %v294_v48 = vld [vmem:[%s3576_s24 + $0x4d0] sm:$0xff]  ;;  %v804_v50 = vadd.f32 3.0, %v292_v39 }
  0xd8   : > { %2845 = vst [vmem:[%s3598_s17 + $0x488] sm:$0xff] %v2333_v40  ;;  %v1825_v49 = vmin.f32 %v1313_v42, 6.0  ;;  %v805_v51 = vadd.f32 3.0, %v293_v47  ;;  %v806_v52 = vadd.f32 3.0, %v294_v48  ;;  %v295_v53 = vld [vmem:[%s3576_s24 + $0x4d8] sm:$0xff]  ;;  %v1314_v56 = vmax.f32 %v802_v45, 0.0 }
  0xd9   : > { %2846 = vst [vmem:[%s3598_s17 + $0x490] sm:$0xff] %v2334_v41  ;;  %v2335_v54 = vmul.f32 0.16666667, %v1823_v43  ;;  %v2336_v55 = vmul.f32 0.16666667, %v1824_v44  ;;  %v1315_v58 = vmax.f32 %v803_v46, 0.0 }
  0xda   : > { %v2337_v57 = vmul.f32 0.16666667, %v1825_v49  ;;  %v1316_v59 = vmax.f32 %v804_v50, 0.0  ;;  %v1317_v60 = vmax.f32 %v805_v51, 0.0  ;;  %v296_v61 = vld [vmem:[%s3576_s24 + $0x4e0] sm:$0xff]  ;;  %v1826_v62 = vmin.f32 %v1314_v56, 6.0 }
  0xdb   : > { %2847 = vst [vmem:[%s3598_s17 + $0x498] sm:$0xff] %v2335_v54  ;;  %v1318_v63 = vmax.f32 %v806_v52, 0.0  ;;  %v807_v0 = vadd.f32 3.0, %v295_v53  ;;  %v808_v1 = vadd.f32 3.0, %v296_v61  ;;  %v297_v2 = vld [vmem:[%s3576_s24 + $0x4e8] sm:$0xff]  ;;  %v1827_v3 = vmin.f32 %v1315_v58, 6.0 }
  0xdc   : > { %2848 = vst [vmem:[%s3598_s17 + $0x4a0] sm:$0xff] %v2336_v55  ;;  %v1828_v4 = vmin.f32 %v1316_v59, 6.0  ;;  %v1829_v5 = vmin.f32 %v1317_v60, 6.0  ;;  %v809_v6 = vadd.f32 3.0, %v297_v2  ;;  %v298_v7 = vld [vmem:[%s3576_s24 + $0x4f0] sm:$0xff]  ;;  %v299_v20 = vld [vmem:[%s3576_s24 + $0x4f8] sm:$0xff] }
  0xdd   : > { %2849 = vst [vmem:[%s3598_s17 + $0x4a8] sm:$0xff] %v2337_v57  ;;  %v2338_v8 = vmul.f32 0.16666667, %v1826_v62  ;;  %v1830_v9 = vmin.f32 %v1318_v63, 6.0  ;;  %v1319_v10 = vmax.f32 %v807_v0, 0.0  ;;  %v1320_v11 = vmax.f32 %v808_v1, 0.0 }
  0xde   : > { %v2339_v12 = vmul.f32 0.16666667, %v1827_v3  ;;  %v2340_v13 = vmul.f32 0.16666667, %v1828_v4  ;;  %v2341_v14 = vmul.f32 0.16666667, %v1829_v5 }
  0xdf   : > { %2850 = vst [vmem:[%s3598_s17 + $0x4b0] sm:$0xff] %v2338_v8  ;;  %v2342_v15 = vmul.f32 0.16666667, %v1830_v9  ;;  %v1831_v16 = vmin.f32 %v1319_v10, 6.0  ;;  %v1832_v17 = vmin.f32 %v1320_v11, 6.0  ;;  %v1321_v18 = vmax.f32 %v809_v6, 0.0 }
  0xe0   : > { %2851 = vst [vmem:[%s3598_s17 + $0x4b8] sm:$0xff] %v2339_v12  ;;  %v810_v19 = vadd.f32 3.0, %v298_v7  ;;  %v300_v21 = vld [vmem:[%s3576_s24 + $0x500] sm:$0xff]  ;;  %v301_v22 = vld [vmem:[%s3576_s24 + $0x508] sm:$0xff]  ;;  %v811_v27 = vadd.f32 3.0, %v299_v20  ;;  %v302_v30 = vld [vmem:[%s3576_s24 + $0x510] sm:$0xff] }
  0xe1   : > { %2852 = vst [vmem:[%s3598_s17 + $0x4c0] sm:$0xff] %v2340_v13  ;;  %v2343_v23 = vmul.f32 0.16666667, %v1831_v16  ;;  %v2344_v24 = vmul.f32 0.16666667, %v1832_v17  ;;  %v1833_v25 = vmin.f32 %v1321_v18, 6.0 }
  0xe2   : > { %2853 = vst [vmem:[%s3598_s17 + $0x4c8] sm:$0xff] %v2341_v14  ;;  %v1322_v26 = vmax.f32 %v810_v19, 0.0  ;;  %v812_v28 = vadd.f32 3.0, %v300_v21  ;;  %v813_v29 = vadd.f32 3.0, %v301_v22  ;;  %v814_v32 = vadd.f32 3.0, %v302_v30  ;;  %v303_v33 = vld [vmem:[%s3576_s24 + $0x518] sm:$0xff] }
  0xe3   : > { %2854 = vst [vmem:[%s3598_s17 + $0x4d0] sm:$0xff] %v2342_v15  ;;  %v2345_v31 = vmul.f32 0.16666667, %v1833_v25  ;;  %v304_v34 = vld [vmem:[%s3576_s24 + $0x520] sm:$0xff]  ;;  %v1323_v36 = vmax.f32 %v811_v27, 0.0  ;;  %v305_v39 = vld [vmem:[%s3576_s24 + $0x528] sm:$0xff] }
  0xe4   : > { %2855 = vst [vmem:[%s3598_s17 + $0x4d8] sm:$0xff] %v2343_v23  ;;  %v1834_v35 = vmin.f32 %v1322_v26, 6.0  ;;  %v1324_v37 = vmax.f32 %v812_v28, 0.0  ;;  %v1325_v38 = vmax.f32 %v813_v29, 0.0  ;;  %v1326_v40 = vmax.f32 %v814_v32, 0.0  ;;  %v306_v44 = vld [vmem:[%s3576_s24 + $0x530] sm:$0xff] }
  0xe5   : > { %2856 = vst [vmem:[%s3598_s17 + $0x4e0] sm:$0xff] %v2344_v24  ;;  %v815_v41 = vadd.f32 3.0, %v303_v33  ;;  %v816_v42 = vadd.f32 3.0, %v304_v34  ;;  %v817_v43 = vadd.f32 3.0, %v305_v39  ;;  %v1835_v46 = vmin.f32 %v1323_v36, 6.0  ;;  %v307_v53 = vld [vmem:[%s3576_s24 + $0x538] sm:$0xff] }
  0xe6   : > { %2857 = vst [vmem:[%s3598_s17 + $0x4e8] sm:$0xff] %v2345_v31  ;;  %v2346_v45 = vmul.f32 0.16666667, %v1834_v35  ;;  %v1836_v47 = vmin.f32 %v1324_v37, 6.0  ;;  %v1837_v48 = vmin.f32 %v1325_v38, 6.0  ;;  %v1838_v49 = vmin.f32 %v1326_v40, 6.0 }
  0xe7   : > { %v1327_v50 = vmax.f32 %v815_v41, 0.0  ;;  %v1328_v51 = vmax.f32 %v816_v42, 0.0  ;;  %v1329_v52 = vmax.f32 %v817_v43, 0.0  ;;  %v308_v54 = vld [vmem:[%s3576_s24 + $0x540] sm:$0xff]  ;;  %v2347_v55 = vmul.f32 0.16666667, %v1835_v46 }
  0xe8   : > { %2858 = vst [vmem:[%s3598_s17 + $0x4f0] sm:$0xff] %v2346_v45  ;;  %v2348_v56 = vmul.f32 0.16666667, %v1836_v47  ;;  %v818_v57 = vadd.f32 3.0, %v306_v44  ;;  %v2349_v58 = vmul.f32 0.16666667, %v1837_v48 }
  0xe9   : > { %v2350_v59 = vmul.f32 0.16666667, %v1838_v49  ;;  %v1839_v60 = vmin.f32 %v1327_v50, 6.0  ;;  %v1840_v61 = vmin.f32 %v1328_v51, 6.0  ;;  %2859 = vst [vmem:[%s3598_s17 + $0x4f8] sm:$0xff] %v2347_v55  ;;  %v1841_v62 = vmin.f32 %v1329_v52, 6.0 }
  0xea   : > { %v1330_v63 = vmax.f32 %v818_v57, 0.0  ;;  %v819_v0 = vadd.f32 3.0, %v307_v53  ;;  %v820_v1 = vadd.f32 3.0, %v308_v54  ;;  %v309_v2 = vld [vmem:[%s3576_s24 + $0x548] sm:$0xff]  ;;  %2860 = vst [vmem:[%s3598_s17 + $0x500] sm:$0xff] %v2348_v56  ;;  %v310_v11 = vld [vmem:[%s3576_s24 + $0x550] sm:$0xff] }
  0xeb   : > { %v2351_v3 = vmul.f32 0.16666667, %v1839_v60  ;;  %v2352_v4 = vmul.f32 0.16666667, %v1840_v61  ;;  %v821_v5 = vadd.f32 3.0, %v309_v2  ;;  %2861 = vst [vmem:[%s3598_s17 + $0x508] sm:$0xff] %v2349_v58 }
  0xec   : > { %v2353_v6 = vmul.f32 0.16666667, %v1841_v62  ;;  %v1842_v7 = vmin.f32 %v1330_v63, 6.0  ;;  %v1331_v8 = vmax.f32 %v819_v0, 0.0  ;;  %v1332_v9 = vmax.f32 %v820_v1, 0.0  ;;  %2862 = vst [vmem:[%s3598_s17 + $0x510] sm:$0xff] %v2350_v59 }
  0xed   : > { %v1333_v10 = vmax.f32 %v821_v5, 0.0  ;;  %v311_v12 = vld [vmem:[%s3576_s24 + $0x558] sm:$0xff]  ;;  %v312_v13 = vld [vmem:[%s3576_s24 + $0x560] sm:$0xff]  ;;  %2863 = vst [vmem:[%s3598_s17 + $0x518] sm:$0xff] %v2351_v3  ;;  %v822_v17 = vadd.f32 3.0, %v310_v11  ;;  %v313_v21 = vld [vmem:[%s3576_s24 + $0x568] sm:$0xff] }
  0xee   : > { %v2354_v14 = vmul.f32 0.16666667, %v1842_v7  ;;  %v1843_v15 = vmin.f32 %v1331_v8, 6.0  ;;  %v1844_v16 = vmin.f32 %v1332_v9, 6.0  ;;  %2864 = vst [vmem:[%s3598_s17 + $0x520] sm:$0xff] %v2352_v4  ;;  %v823_v19 = vadd.f32 3.0, %v311_v12 }
  0xef   : > { %v1845_v18 = vmin.f32 %v1333_v10, 6.0  ;;  %v824_v20 = vadd.f32 3.0, %v312_v13  ;;  %v314_v22 = vld [vmem:[%s3576_s24 + $0x570] sm:$0xff]  ;;  %2865 = vst [vmem:[%s3598_s17 + $0x528] sm:$0xff] %v2353_v6  ;;  %v1334_v25 = vmax.f32 %v822_v17, 0.0  ;;  %v825_v29 = vadd.f32 3.0, %v313_v21 }
  0xf0   : > { %v2355_v23 = vmul.f32 0.16666667, %v1843_v15  ;;  %v2356_v24 = vmul.f32 0.16666667, %v1844_v16  ;;  %2866 = vst [vmem:[%s3598_s17 + $0x530] sm:$0xff] %v2354_v14  ;;  %v1335_v27 = vmax.f32 %v823_v19, 0.0 }
  0xf1   : > { %v2357_v26 = vmul.f32 0.16666667, %v1845_v18  ;;  %v1336_v28 = vmax.f32 %v824_v20, 0.0  ;;  %v1846_v30 = vmin.f32 %v1334_v25, 6.0  ;;  %v826_v31 = vadd.f32 3.0, %v314_v22  ;;  %v315_v32 = vld [vmem:[%s3576_s24 + $0x578] sm:$0xff] }
  0xf2   : > { %2867 = vst [vmem:[%s3598_s17 + $0x538] sm:$0xff] %v2355_v23  ;;  %v316_v33 = vld [vmem:[%s3576_s24 + $0x580] sm:$0xff]  ;;  %v317_v34 = vld [vmem:[%s3576_s24 + $0x588] sm:$0xff]  ;;  %v1847_v35 = vmin.f32 %v1335_v27, 6.0  ;;  %v1337_v37 = vmax.f32 %v825_v29, 0.0  ;;  %v827_v38 = vadd.f32 3.0, %v315_v32 }
  0xf3   : > { %2868 = vst [vmem:[%s3598_s17 + $0x540] sm:$0xff] %v2356_v24  ;;  %v1848_v36 = vmin.f32 %v1336_v28, 6.0  ;;  %v318_v39 = vld [vmem:[%s3576_s24 + $0x590] sm:$0xff]  ;;  %v2358_v40 = vmul.f32 0.16666667, %v1846_v30  ;;  %v1338_v41 = vmax.f32 %v826_v31, 0.0 }
  0xf4   : > { %2869 = vst [vmem:[%s3598_s17 + $0x548] sm:$0xff] %v2357_v26  ;;  %v828_v42 = vadd.f32 3.0, %v316_v33  ;;  %v829_v43 = vadd.f32 3.0, %v317_v34  ;;  %v2359_v44 = vmul.f32 0.16666667, %v1847_v35  ;;  %v1849_v46 = vmin.f32 %v1337_v37, 6.0 }
  0xf5   : > { %v2360_v45 = vmul.f32 0.16666667, %v1848_v36  ;;  %v1339_v47 = vmax.f32 %v827_v38, 0.0  ;;  %2870 = vst [vmem:[%s3598_s17 + $0x550] sm:$0xff] %v2358_v40  ;;  %v1850_v48 = vmin.f32 %v1338_v41, 6.0  ;;  %v830_v51 = vadd.f32 3.0, %v318_v39 }
  0xf6   : > { %v1340_v49 = vmax.f32 %v828_v42, 0.0  ;;  %v1341_v50 = vmax.f32 %v829_v43, 0.0  ;;  %v319_v52 = vld [vmem:[%s3576_s24 + $0x598] sm:$0xff]  ;;  %2871 = vst [vmem:[%s3598_s17 + $0x558] sm:$0xff] %v2359_v44  ;;  %v2361_v53 = vmul.f32 0.16666667, %v1849_v46 }
  0xf7   : > { %v1851_v54 = vmin.f32 %v1339_v47, 6.0  ;;  %v831_v55 = vadd.f32 3.0, %v319_v52  ;;  %v320_v56 = vld [vmem:[%s3576_s24 + $0x5a0] sm:$0xff]  ;;  %2872 = vst [vmem:[%s3598_s17 + $0x560] sm:$0xff] %v2360_v45  ;;  %v2362_v57 = vmul.f32 0.16666667, %v1850_v48 }
  0xf8   : > { %v1852_v58 = vmin.f32 %v1340_v49, 6.0  ;;  %v1853_v59 = vmin.f32 %v1341_v50, 6.0  ;;  %v1342_v60 = vmax.f32 %v830_v51, 0.0  ;;  %2873 = vst [vmem:[%s3598_s17 + $0x568] sm:$0xff] %v2361_v53  ;;  %v832_v63 = vadd.f32 3.0, %v320_v56  ;;  %v321_v0 = vld [vmem:[%s3576_s24 + $0x5a8] sm:$0xff] }
  0xf9   : > { %v2363_v61 = vmul.f32 0.16666667, %v1851_v54  ;;  %v1343_v62 = vmax.f32 %v831_v55, 0.0  ;;  %2874 = vst [vmem:[%s3598_s17 + $0x570] sm:$0xff] %v2362_v57  ;;  %v833_v6 = vadd.f32 3.0, %v321_v0  ;;  %v322_v7 = vld [vmem:[%s3576_s24 + $0x5b0] sm:$0xff] }
  0xfa   : > { %v2364_v1 = vmul.f32 0.16666667, %v1852_v58  ;;  %v2365_v2 = vmul.f32 0.16666667, %v1853_v59  ;;  %v1854_v3 = vmin.f32 %v1342_v60, 6.0  ;;  %v1344_v5 = vmax.f32 %v832_v63, 0.0 }
  0xfb   : > { %2875 = vst [vmem:[%s3598_s17 + $0x578] sm:$0xff] %v2363_v61  ;;  %v1855_v4 = vmin.f32 %v1343_v62, 6.0  ;;  %v323_v8 = vld [vmem:[%s3576_s24 + $0x5b8] sm:$0xff]  ;;  %v834_v10 = vadd.f32 3.0, %v322_v7  ;;  %v324_v12 = vld [vmem:[%s3576_s24 + $0x5c0] sm:$0xff]  ;;  %v1345_v15 = vmax.f32 %v833_v6, 0.0 }
  0xfc   : > { %2876 = vst [vmem:[%s3598_s17 + $0x580] sm:$0xff] %v2364_v1  ;;  %v2366_v9 = vmul.f32 0.16666667, %v1854_v3  ;;  %v835_v11 = vadd.f32 3.0, %v323_v8  ;;  %v1856_v14 = vmin.f32 %v1344_v5, 6.0  ;;  %v836_v16 = vadd.f32 3.0, %v324_v12 }
  0xfd   : > { %2877 = vst [vmem:[%s3598_s17 + $0x588] sm:$0xff] %v2365_v2  ;;  %v2367_v13 = vmul.f32 0.16666667, %v1855_v4  ;;  %v1346_v17 = vmax.f32 %v834_v10, 0.0  ;;  %v325_v19 = vld [vmem:[%s3576_s24 + $0x5c8] sm:$0xff]  ;;  %v326_v20 = vld [vmem:[%s3576_s24 + $0x5d0] sm:$0xff] }
  0xfe   : > { %2878 = vst [vmem:[%s3598_s17 + $0x590] sm:$0xff] %v2366_v9  ;;  %v1347_v18 = vmax.f32 %v835_v11, 0.0  ;;  %v327_v21 = vld [vmem:[%s3576_s24 + $0x5d8] sm:$0xff]  ;;  %v2368_v22 = vmul.f32 0.16666667, %v1856_v14  ;;  %v1857_v23 = vmin.f32 %v1345_v15, 6.0 }
  0xff   : > { %2879 = vst [vmem:[%s3598_s17 + $0x598] sm:$0xff] %v2367_v13  ;;  %v1348_v24 = vmax.f32 %v836_v16, 0.0  ;;  %v837_v25 = vadd.f32 3.0, %v325_v19  ;;  %v1858_v26 = vmin.f32 %v1346_v17, 6.0  ;;  %v838_v28 = vadd.f32 3.0, %v326_v20  ;;  %v328_v30 = vld [vmem:[%s3576_s24 + $0x5e0] sm:$0xff] }
 0x100   : > { %v1859_v27 = vmin.f32 %v1347_v18, 6.0  ;;  %v839_v29 = vadd.f32 3.0, %v327_v21  ;;  %v329_v31 = vld [vmem:[%s3576_s24 + $0x5e8] sm:$0xff]  ;;  %2880 = vst [vmem:[%s3598_s17 + $0x5a0] sm:$0xff] %v2368_v22  ;;  %v2369_v32 = vmul.f32 0.16666667, %v1857_v23 }
 0x101   : > { %v1860_v33 = vmin.f32 %v1348_v24, 6.0  ;;  %v1349_v34 = vmax.f32 %v837_v25, 0.0  ;;  %v840_v35 = vadd.f32 3.0, %v328_v30  ;;  %v2370_v36 = vmul.f32 0.16666667, %v1858_v26  ;;  %v330_v46 = vld [vmem:[%s3576_s24 + $0x5f0] sm:$0xff] }
 0x102   : > { %v2371_v37 = vmul.f32 0.16666667, %v1859_v27  ;;  %v1350_v38 = vmax.f32 %v838_v28, 0.0  ;;  %v1351_v39 = vmax.f32 %v839_v29, 0.0  ;;  %2881 = vst [vmem:[%s3598_s17 + $0x5a8] sm:$0xff] %v2369_v32  ;;  %v841_v43 = vadd.f32 3.0, %v329_v31 }
 0x103   : > { %v2372_v40 = vmul.f32 0.16666667, %v1860_v33  ;;  %v1861_v41 = vmin.f32 %v1349_v34, 6.0  ;;  %v1352_v42 = vmax.f32 %v840_v35, 0.0  ;;  %2882 = vst [vmem:[%s3598_s17 + $0x5b0] sm:$0xff] %v2370_v36  ;;  %v331_v47 = vld [vmem:[%s3576_s24 + $0x5f8] sm:$0xff] }
 0x104   : > { %v1862_v44 = vmin.f32 %v1350_v38, 6.0  ;;  %v1863_v45 = vmin.f32 %v1351_v39, 6.0  ;;  %v332_v48 = vld [vmem:[%s3576_s24 + $0x600] sm:$0xff]  ;;  %2883 = vst [vmem:[%s3598_s17 + $0x5b8] sm:$0xff] %v2371_v37  ;;  %v1353_v51 = vmax.f32 %v841_v43, 0.0  ;;  %v842_v52 = vadd.f32 3.0, %v330_v46 }
 0x105   : > { %v2373_v49 = vmul.f32 0.16666667, %v1861_v41  ;;  %v1864_v50 = vmin.f32 %v1352_v42, 6.0  ;;  %2884 = vst [vmem:[%s3598_s17 + $0x5c0] sm:$0xff] %v2372_v40  ;;  %v843_v55 = vadd.f32 3.0, %v331_v47  ;;  %v844_v59 = vadd.f32 3.0, %v332_v48 }
 0x106   : > { %v2374_v53 = vmul.f32 0.16666667, %v1862_v44  ;;  %v2375_v54 = vmul.f32 0.16666667, %v1863_v45  ;;  %v1865_v57 = vmin.f32 %v1353_v51, 6.0  ;;  %v1354_v58 = vmax.f32 %v842_v52, 0.0 }
 0x107   : > { %2885 = vst [vmem:[%s3598_s17 + $0x5c8] sm:$0xff] %v2373_v49  ;;  %v2376_v56 = vmul.f32 0.16666667, %v1864_v50  ;;  %v1355_v60 = vmax.f32 %v843_v55, 0.0  ;;  %v333_v61 = vld [vmem:[%s3576_s24 + $0x608] sm:$0xff]  ;;  %v334_v62 = vld [vmem:[%s3576_s24 + $0x610] sm:$0xff] }
 0x108   : > { %2886 = vst [vmem:[%s3598_s17 + $0x5d0] sm:$0xff] %v2374_v53  ;;  %v335_v63 = vld [vmem:[%s3576_s24 + $0x618] sm:$0xff]  ;;  %v2377_v0 = vmul.f32 0.16666667, %v1865_v57  ;;  %v1866_v1 = vmin.f32 %v1354_v58, 6.0  ;;  %v1356_v2 = vmax.f32 %v844_v59, 0.0 }
 0x109   : > { %2887 = vst [vmem:[%s3598_s17 + $0x5d8] sm:$0xff] %v2375_v54  ;;  %v845_v3 = vadd.f32 3.0, %v333_v61  ;;  %v1867_v4 = vmin.f32 %v1355_v60, 6.0  ;;  %v846_v5 = vadd.f32 3.0, %v334_v62  ;;  %v847_v6 = vadd.f32 3.0, %v335_v63  ;;  %v336_v7 = vld [vmem:[%s3576_s24 + $0x620] sm:$0xff] }
 0x10a   : > { %2888 = vst [vmem:[%s3598_s17 + $0x5e0] sm:$0xff] %v2376_v56  ;;  %v337_v8 = vld [vmem:[%s3576_s24 + $0x628] sm:$0xff]  ;;  %v2378_v9 = vmul.f32 0.16666667, %v1866_v1  ;;  %v1868_v10 = vmin.f32 %v1356_v2, 6.0  ;;  %v848_v12 = vadd.f32 3.0, %v336_v7 }
 0x10b   : > { %2889 = vst [vmem:[%s3598_s17 + $0x5e8] sm:$0xff] %v2377_v0  ;;  %v1357_v11 = vmax.f32 %v845_v3, 0.0  ;;  %v2379_v13 = vmul.f32 0.16666667, %v1867_v4  ;;  %v1358_v14 = vmax.f32 %v846_v5, 0.0  ;;  %v1359_v15 = vmax.f32 %v847_v6, 0.0 }
 0x10c   : > { %v849_v16 = vadd.f32 3.0, %v337_v8  ;;  %v338_v17 = vld [vmem:[%s3576_s24 + $0x630] sm:$0xff]  ;;  %2890 = vst [vmem:[%s3598_s17 + $0x5f0] sm:$0xff] %v2378_v9  ;;  %v2380_v18 = vmul.f32 0.16666667, %v1868_v10  ;;  %v1360_v20 = vmax.f32 %v848_v12, 0.0 }
 0x10d   : > { %v1869_v19 = vmin.f32 %v1357_v11, 6.0  ;;  %v850_v21 = vadd.f32 3.0, %v338_v17  ;;  %2891 = vst [vmem:[%s3598_s17 + $0x5f8] sm:$0xff] %v2379_v13  ;;  %v1870_v22 = vmin.f32 %v1358_v14, 6.0  ;;  %v1871_v23 = vmin.f32 %v1359_v15, 6.0  ;;  %v339_v25 = vld [vmem:[%s3576_s24 + $0x638] sm:$0xff] }
 0x10e   : > { %v1361_v24 = vmax.f32 %v849_v16, 0.0  ;;  %v340_v26 = vld [vmem:[%s3576_s24 + $0x640] sm:$0xff]  ;;  %2892 = vst [vmem:[%s3598_s17 + $0x600] sm:$0xff] %v2380_v18  ;;  %v1872_v28 = vmin.f32 %v1360_v20, 6.0  ;;  %v851_v30 = vadd.f32 3.0, %v339_v25  ;;  %v341_v38 = vld [vmem:[%s3576_s24 + $0x648] sm:$0xff] }
 0x10f   : > { %v2381_v27 = vmul.f32 0.16666667, %v1869_v19  ;;  %v1362_v29 = vmax.f32 %v850_v21, 0.0  ;;  %v2382_v31 = vmul.f32 0.16666667, %v1870_v22  ;;  %v852_v34 = vadd.f32 3.0, %v340_v26 }
 0x110   : > { %v2383_v32 = vmul.f32 0.16666667, %v1871_v23  ;;  %v1873_v33 = vmin.f32 %v1361_v24, 6.0  ;;  %v2384_v35 = vmul.f32 0.16666667, %v1872_v28  ;;  %v1363_v37 = vmax.f32 %v851_v30, 0.0 }
 0x111   : > { %2893 = vst [vmem:[%s3598_s17 + $0x608] sm:$0xff] %v2381_v27  ;;  %v1874_v36 = vmin.f32 %v1362_v29, 6.0  ;;  %v1364_v40 = vmax.f32 %v852_v34, 0.0  ;;  %v853_v41 = vadd.f32 3.0, %v341_v38  ;;  %v342_v42 = vld [vmem:[%s3576_s24 + $0x650] sm:$0xff]  ;;  %v343_v46 = vld [vmem:[%s3576_s24 + $0x658] sm:$0xff] }
 0x112   : > { %2894 = vst [vmem:[%s3598_s17 + $0x610] sm:$0xff] %v2382_v31  ;;  %v2385_v39 = vmul.f32 0.16666667, %v1873_v33  ;;  %v1875_v44 = vmin.f32 %v1363_v37, 6.0  ;;  %v854_v45 = vadd.f32 3.0, %v342_v42  ;;  %v855_v49 = vadd.f32 3.0, %v343_v46 }
 0x113   : > { %2895 = vst [vmem:[%s3598_s17 + $0x618] sm:$0xff] %v2383_v32  ;;  %v2386_v43 = vmul.f32 0.16666667, %v1874_v36  ;;  %v1876_v47 = vmin.f32 %v1364_v40, 6.0  ;;  %v1365_v48 = vmax.f32 %v853_v41, 0.0  ;;  %v344_v50 = vld [vmem:[%s3576_s24 + $0x660] sm:$0xff] }
 0x114   : > { %2896 = vst [vmem:[%s3598_s17 + $0x620] sm:$0xff] %v2384_v35  ;;  %v345_v51 = vld [vmem:[%s3576_s24 + $0x668] sm:$0xff]  ;;  %v2387_v52 = vmul.f32 0.16666667, %v1875_v44  ;;  %v1366_v53 = vmax.f32 %v854_v45, 0.0  ;;  %v856_v54 = vadd.f32 3.0, %v344_v50 }
 0x115   : > { %2897 = vst [vmem:[%s3598_s17 + $0x628] sm:$0xff] %v2385_v39  ;;  %v857_v55 = vadd.f32 3.0, %v345_v51  ;;  %v2388_v56 = vmul.f32 0.16666667, %v1876_v47  ;;  %v1877_v57 = vmin.f32 %v1365_v48, 6.0  ;;  %v1367_v58 = vmax.f32 %v855_v49, 0.0 }
 0x116   : > { %2898 = vst [vmem:[%s3598_s17 + $0x630] sm:$0xff] %v2386_v43  ;;  %v346_v59 = vld [vmem:[%s3576_s24 + $0x670] sm:$0xff]  ;;  %v1878_v60 = vmin.f32 %v1366_v53, 6.0  ;;  %v1368_v61 = vmax.f32 %v856_v54, 0.0  ;;  %v347_v0 = vld [vmem:[%s3576_s24 + $0x678] sm:$0xff]  ;;  %v348_v4 = vld [vmem:[%s3576_s24 + $0x680] sm:$0xff] }
 0x117   : > { %2899 = vst [vmem:[%s3598_s17 + $0x638] sm:$0xff] %v2387_v52  ;;  %v1369_v62 = vmax.f32 %v857_v55, 0.0  ;;  %v858_v63 = vadd.f32 3.0, %v346_v59  ;;  %v2389_v1 = vmul.f32 0.16666667, %v1877_v57  ;;  %v1879_v2 = vmin.f32 %v1367_v58, 6.0 }
 0x118   : > { %2900 = vst [vmem:[%s3598_s17 + $0x640] sm:$0xff] %v2388_v56  ;;  %v859_v3 = vadd.f32 3.0, %v347_v0  ;;  %v2390_v5 = vmul.f32 0.16666667, %v1878_v60  ;;  %v1880_v6 = vmin.f32 %v1368_v61, 6.0  ;;  %v349_v9 = vld [vmem:[%s3576_s24 + $0x688] sm:$0xff] }
 0x119   : > { %v1881_v7 = vmin.f32 %v1369_v62, 6.0  ;;  %v1370_v8 = vmax.f32 %v858_v63, 0.0  ;;  %2901 = vst [vmem:[%s3598_s17 + $0x648] sm:$0xff] %v2389_v1  ;;  %v2391_v10 = vmul.f32 0.16666667, %v1879_v2  ;;  %v860_v12 = vadd.f32 3.0, %v348_v4 }
 0x11a   : > { %v1371_v11 = vmax.f32 %v859_v3, 0.0  ;;  %v861_v13 = vadd.f32 3.0, %v349_v9  ;;  %2902 = vst [vmem:[%s3598_s17 + $0x650] sm:$0xff] %v2390_v5  ;;  %v2392_v14 = vmul.f32 0.16666667, %v1880_v6  ;;  %v350_v20 = vld [vmem:[%s3576_s24 + $0x690] sm:$0xff] }
 0x11b   : > { %v2393_v15 = vmul.f32 0.16666667, %v1881_v7  ;;  %v1882_v16 = vmin.f32 %v1370_v8, 6.0  ;;  %2903 = vst [vmem:[%s3598_s17 + $0x658] sm:$0xff] %v2391_v10  ;;  %v1372_v18 = vmax.f32 %v860_v12, 0.0  ;;  %v351_v21 = vld [vmem:[%s3576_s24 + $0x698] sm:$0xff] }
 0x11c   : > { %v1883_v17 = vmin.f32 %v1371_v11, 6.0  ;;  %v1373_v19 = vmax.f32 %v861_v13, 0.0  ;;  %2904 = vst [vmem:[%s3598_s17 + $0x660] sm:$0xff] %v2392_v14  ;;  %v862_v23 = vadd.f32 3.0, %v350_v20  ;;  %v863_v24 = vadd.f32 3.0, %v351_v21  ;;  %v352_v25 = vld [vmem:[%s3576_s24 + $0x6a0] sm:$0xff] }
 0x11d   : > { %v2394_v22 = vmul.f32 0.16666667, %v1882_v16  ;;  %2905 = vst [vmem:[%s3598_s17 + $0x668] sm:$0xff] %v2393_v15  ;;  %v1884_v27 = vmin.f32 %v1372_v18, 6.0  ;;  %v864_v29 = vadd.f32 3.0, %v352_v25  ;;  %v353_v32 = vld [vmem:[%s3576_s24 + $0x6a8] sm:$0xff] }
 0x11e   : > { %v2395_v26 = vmul.f32 0.16666667, %v1883_v17  ;;  %v1885_v28 = vmin.f32 %v1373_v19, 6.0  ;;  %v1374_v30 = vmax.f32 %v862_v23, 0.0  ;;  %v1375_v31 = vmax.f32 %v863_v24, 0.0  ;;  %v354_v33 = vld [vmem:[%s3576_s24 + $0x6b0] sm:$0xff] }
 0x11f   : > { %2906 = vst [vmem:[%s3598_s17 + $0x670] sm:$0xff] %v2394_v22  ;;  %v355_v34 = vld [vmem:[%s3576_s24 + $0x6b8] sm:$0xff]  ;;  %v2396_v35 = vmul.f32 0.16666667, %v1884_v27  ;;  %v1376_v37 = vmax.f32 %v864_v29, 0.0  ;;  %v865_v40 = vadd.f32 3.0, %v353_v32 }
 0x120   : > { %2907 = vst [vmem:[%s3598_s17 + $0x678] sm:$0xff] %v2395_v26  ;;  %v2397_v36 = vmul.f32 0.16666667, %v1885_v28  ;;  %v1886_v38 = vmin.f32 %v1374_v30, 6.0  ;;  %v1887_v39 = vmin.f32 %v1375_v31, 6.0  ;;  %v866_v41 = vadd.f32 3.0, %v354_v33 }
 0x121   : > { %v356_v42 = vld [vmem:[%s3576_s24 + $0x6c0] sm:$0xff]  ;;  %v357_v43 = vld [vmem:[%s3576_s24 + $0x6c8] sm:$0xff]  ;;  %2908 = vst [vmem:[%s3598_s17 + $0x680] sm:$0xff] %v2396_v35  ;;  %v1888_v44 = vmin.f32 %v1376_v37, 6.0  ;;  %v867_v45 = vadd.f32 3.0, %v355_v34  ;;  %v358_v48 = vld [vmem:[%s3576_s24 + $0x6d0] sm:$0xff] }
 0x122   : > { %v868_v46 = vadd.f32 3.0, %v356_v42  ;;  %v869_v47 = vadd.f32 3.0, %v357_v43  ;;  %2909 = vst [vmem:[%s3598_s17 + $0x688] sm:$0xff] %v2397_v36  ;;  %v2398_v49 = vmul.f32 0.16666667, %v1886_v38  ;;  %v1377_v51 = vmax.f32 %v865_v40, 0.0 }
 0x123   : > { %v2399_v50 = vmul.f32 0.16666667, %v1887_v39  ;;  %v2400_v52 = vmul.f32 0.16666667, %v1888_v44  ;;  %v1378_v53 = vmax.f32 %v866_v41, 0.0  ;;  %v1379_v54 = vmax.f32 %v867_v45, 0.0 }
 0x124   : > { %v1380_v55 = vmax.f32 %v868_v46, 0.0  ;;  %v359_v56 = vld [vmem:[%s3576_s24 + $0x6d8] sm:$0xff]  ;;  %2910 = vst [vmem:[%s3598_s17 + $0x690] sm:$0xff] %v2398_v49  ;;  %v1889_v57 = vmin.f32 %v1377_v51, 6.0  ;;  %v1381_v58 = vmax.f32 %v869_v47, 0.0  ;;  %v870_v59 = vadd.f32 3.0, %v358_v48 }
 0x125   : > { %v871_v60 = vadd.f32 3.0, %v359_v56  ;;  %v360_v61 = vld [vmem:[%s3576_s24 + $0x6e0] sm:$0xff]  ;;  %2911 = vst [vmem:[%s3598_s17 + $0x698] sm:$0xff] %v2399_v50  ;;  %v1890_v62 = vmin.f32 %v1378_v53, 6.0  ;;  %v1891_v63 = vmin.f32 %v1379_v54, 6.0  ;;  %v361_v2 = vld [vmem:[%s3576_s24 + $0x6e8] sm:$0xff] }
 0x126   : > { %v1892_v0 = vmin.f32 %v1380_v55, 6.0  ;;  %v872_v1 = vadd.f32 3.0, %v360_v61  ;;  %2912 = vst [vmem:[%s3598_s17 + $0x6a0] sm:$0xff] %v2400_v52  ;;  %v2401_v3 = vmul.f32 0.16666667, %v1889_v57  ;;  %v1893_v4 = vmin.f32 %v1381_v58, 6.0 }
 0x127   : > { %v1382_v5 = vmax.f32 %v870_v59, 0.0  ;;  %v1383_v6 = vmax.f32 %v871_v60, 0.0  ;;  %v2402_v7 = vmul.f32 0.16666667, %v1890_v62  ;;  %v2403_v8 = vmul.f32 0.16666667, %v1891_v63 }
 0x128   : > { %v2404_v9 = vmul.f32 0.16666667, %v1892_v0  ;;  %2913 = vst [vmem:[%s3598_s17 + $0x6a8] sm:$0xff] %v2401_v3  ;;  %v2405_v10 = vmul.f32 0.16666667, %v1893_v4  ;;  %v1384_v13 = vmax.f32 %v872_v1, 0.0 }
 0x129   : > { %v1894_v11 = vmin.f32 %v1382_v5, 6.0  ;;  %v1895_v12 = vmin.f32 %v1383_v6, 6.0  ;;  %2914 = vst [vmem:[%s3598_s17 + $0x6b0] sm:$0xff] %v2402_v7  ;;  %v873_v14 = vadd.f32 3.0, %v361_v2  ;;  %v362_v15 = vld [vmem:[%s3576_s24 + $0x6f0] sm:$0xff]  ;;  %v363_v16 = vld [vmem:[%s3576_s24 + $0x6f8] sm:$0xff] }
 0x12a   : > { %v364_v17 = vld [vmem:[%s3576_s24 + $0x700] sm:$0xff]  ;;  %2915 = vst [vmem:[%s3598_s17 + $0x6b8] sm:$0xff] %v2403_v8  ;;  %v1896_v20 = vmin.f32 %v1384_v13, 6.0  ;;  %v874_v22 = vadd.f32 3.0, %v362_v15  ;;  %v875_v23 = vadd.f32 3.0, %v363_v16  ;;  %v365_v25 = vld [vmem:[%s3576_s24 + $0x708] sm:$0xff] }
 0x12b   : > { %v2406_v18 = vmul.f32 0.16666667, %v1894_v11  ;;  %v2407_v19 = vmul.f32 0.16666667, %v1895_v12  ;;  %2916 = vst [vmem:[%s3598_s17 + $0x6c0] sm:$0xff] %v2404_v9  ;;  %v1385_v21 = vmax.f32 %v873_v14, 0.0 }
 0x12c   : > { %v876_v24 = vadd.f32 3.0, %v364_v17  ;;  %2917 = vst [vmem:[%s3598_s17 + $0x6c8] sm:$0xff] %v2405_v10  ;;  %v2408_v26 = vmul.f32 0.16666667, %v1896_v20  ;;  %v877_v27 = vadd.f32 3.0, %v365_v25  ;;  %v366_v28 = vld [vmem:[%s3576_s24 + $0x710] sm:$0xff] }
 0x12d   : > { %v367_v29 = vld [vmem:[%s3576_s24 + $0x718] sm:$0xff]  ;;  %2918 = vst [vmem:[%s3598_s17 + $0x6d0] sm:$0xff] %v2406_v18  ;;  %v1897_v30 = vmin.f32 %v1385_v21, 6.0  ;;  %v1386_v31 = vmax.f32 %v874_v22, 0.0  ;;  %v1387_v32 = vmax.f32 %v875_v23, 0.0  ;;  %v368_v34 = vld [vmem:[%s3576_s24 + $0x720] sm:$0xff] }
 0x12e   : > { %v1388_v33 = vmax.f32 %v876_v24, 0.0  ;;  %2919 = vst [vmem:[%s3598_s17 + $0x6d8] sm:$0xff] %v2407_v19  ;;  %v1389_v35 = vmax.f32 %v877_v27, 0.0  ;;  %v878_v36 = vadd.f32 3.0, %v366_v28  ;;  %v879_v37 = vadd.f32 3.0, %v367_v29  ;;  %v369_v39 = vld [vmem:[%s3576_s24 + $0x728] sm:$0xff] }
 0x12f   : > { %v880_v38 = vadd.f32 3.0, %v368_v34  ;;  %2920 = vst [vmem:[%s3598_s17 + $0x6e0] sm:$0xff] %v2408_v26  ;;  %v2409_v40 = vmul.f32 0.16666667, %v1897_v30  ;;  %v1898_v41 = vmin.f32 %v1386_v31, 6.0  ;;  %v1899_v42 = vmin.f32 %v1387_v32, 6.0 }
 0x130   : > { %v1900_v43 = vmin.f32 %v1388_v33, 6.0  ;;  %v1901_v44 = vmin.f32 %v1389_v35, 6.0  ;;  %v1390_v45 = vmax.f32 %v878_v36, 0.0  ;;  %v1391_v46 = vmax.f32 %v879_v37, 0.0  ;;  %v370_v48 = vld [vmem:[%s3576_s24 + $0x730] sm:$0xff]  ;;  %v371_v49 = vld [vmem:[%s3576_s24 + $0x738] sm:$0xff] }
 0x131   : > { %v1392_v47 = vmax.f32 %v880_v38, 0.0  ;;  %2921 = vst [vmem:[%s3598_s17 + $0x6e8] sm:$0xff] %v2409_v40  ;;  %v2410_v50 = vmul.f32 0.16666667, %v1898_v41  ;;  %v2411_v51 = vmul.f32 0.16666667, %v1899_v42 }
 0x132   : > { %v881_v52 = vadd.f32 3.0, %v369_v39  ;;  %v2412_v53 = vmul.f32 0.16666667, %v1900_v43  ;;  %v2413_v54 = vmul.f32 0.16666667, %v1901_v44  ;;  %v1902_v55 = vmin.f32 %v1390_v45, 6.0 }
 0x133   : > { %v1903_v56 = vmin.f32 %v1391_v46, 6.0  ;;  %2922 = vst [vmem:[%s3598_s17 + $0x6f0] sm:$0xff] %v2410_v50  ;;  %v1904_v57 = vmin.f32 %v1392_v47, 6.0  ;;  %v882_v59 = vadd.f32 3.0, %v370_v48  ;;  %v883_v60 = vadd.f32 3.0, %v371_v49  ;;  %v372_v61 = vld [vmem:[%s3576_s24 + $0x740] sm:$0xff] }
 0x134   : > { %v1393_v58 = vmax.f32 %v881_v52, 0.0  ;;  %2923 = vst [vmem:[%s3598_s17 + $0x6f8] sm:$0xff] %v2411_v51  ;;  %v2414_v62 = vmul.f32 0.16666667, %v1902_v55  ;;  %v884_v0 = vadd.f32 3.0, %v372_v61  ;;  %v373_v6 = vld [vmem:[%s3576_s24 + $0x748] sm:$0xff] }
 0x135   : > { %v2415_v63 = vmul.f32 0.16666667, %v1903_v56  ;;  %2924 = vst [vmem:[%s3598_s17 + $0x700] sm:$0xff] %v2412_v53  ;;  %v2416_v1 = vmul.f32 0.16666667, %v1904_v57  ;;  %v1394_v3 = vmax.f32 %v882_v59, 0.0 }
 0x136   : > { %v1905_v2 = vmin.f32 %v1393_v58, 6.0  ;;  %v1395_v4 = vmax.f32 %v883_v60, 0.0  ;;  %2925 = vst [vmem:[%s3598_s17 + $0x708] sm:$0xff] %v2413_v54  ;;  %v1396_v5 = vmax.f32 %v884_v0, 0.0  ;;  %v374_v7 = vld [vmem:[%s3576_s24 + $0x750] sm:$0xff]  ;;  %v375_v8 = vld [vmem:[%s3576_s24 + $0x758] sm:$0xff] }
 0x137   : > { %2926 = vst [vmem:[%s3598_s17 + $0x710] sm:$0xff] %v2414_v62  ;;  %v1906_v10 = vmin.f32 %v1394_v3, 6.0  ;;  %v885_v12 = vadd.f32 3.0, %v373_v6  ;;  %v886_v14 = vadd.f32 3.0, %v374_v7  ;;  %v887_v15 = vadd.f32 3.0, %v375_v8  ;;  %v376_v16 = vld [vmem:[%s3576_s24 + $0x760] sm:$0xff] }
 0x138   : > { %v2417_v9 = vmul.f32 0.16666667, %v1905_v2  ;;  %v1907_v11 = vmin.f32 %v1395_v4, 6.0  ;;  %2927 = vst [vmem:[%s3598_s17 + $0x718] sm:$0xff] %v2415_v63  ;;  %v1908_v13 = vmin.f32 %v1396_v5, 6.0  ;;  %v377_v17 = vld [vmem:[%s3576_s24 + $0x768] sm:$0xff] }
 0x139   : > { %2928 = vst [vmem:[%s3598_s17 + $0x720] sm:$0xff] %v2416_v1  ;;  %v2418_v18 = vmul.f32 0.16666667, %v1906_v10  ;;  %v1397_v20 = vmax.f32 %v885_v12, 0.0  ;;  %v1398_v22 = vmax.f32 %v886_v14, 0.0  ;;  %v1399_v23 = vmax.f32 %v887_v15, 0.0 }
 0x13a   : > { %v2419_v19 = vmul.f32 0.16666667, %v1907_v11  ;;  %2929 = vst [vmem:[%s3598_s17 + $0x728] sm:$0xff] %v2417_v9  ;;  %v2420_v21 = vmul.f32 0.16666667, %v1908_v13  ;;  %v888_v24 = vadd.f32 3.0, %v376_v16 }
 0x13b   : > { %2930 = vst [vmem:[%s3598_s17 + $0x730] sm:$0xff] %v2418_v18  ;;  %v1909_v25 = vmin.f32 %v1397_v20, 6.0  ;;  %v889_v26 = vadd.f32 3.0, %v377_v17  ;;  %v378_v27 = vld [vmem:[%s3576_s24 + $0x770] sm:$0xff]  ;;  %v379_v28 = vld [vmem:[%s3576_s24 + $0x778] sm:$0xff]  ;;  %v380_v29 = vld [vmem:[%s3576_s24 + $0x780] sm:$0xff] }
 0x13c   : > { %2931 = vst [vmem:[%s3598_s17 + $0x738] sm:$0xff] %v2419_v19  ;;  %v1910_v30 = vmin.f32 %v1398_v22, 6.0  ;;  %v1911_v31 = vmin.f32 %v1399_v23, 6.0  ;;  %v1400_v32 = vmax.f32 %v888_v24, 0.0  ;;  %v890_v33 = vadd.f32 3.0, %v378_v27  ;;  %v381_v34 = vld [vmem:[%s3576_s24 + $0x788] sm:$0xff] }
 0x13d   : > { %2932 = vst [vmem:[%s3598_s17 + $0x740] sm:$0xff] %v2420_v21  ;;  %v2421_v35 = vmul.f32 0.16666667, %v1909_v25  ;;  %v1401_v36 = vmax.f32 %v889_v26, 0.0  ;;  %v891_v37 = vadd.f32 3.0, %v379_v28  ;;  %v892_v38 = vadd.f32 3.0, %v380_v29 }
 0x13e   : > { %v2422_v39 = vmul.f32 0.16666667, %v1910_v30  ;;  %v2423_v40 = vmul.f32 0.16666667, %v1911_v31  ;;  %v1912_v41 = vmin.f32 %v1400_v32, 6.0  ;;  %v1402_v42 = vmax.f32 %v890_v33, 0.0 }
 0x13f   : > { %2933 = vst [vmem:[%s3598_s17 + $0x748] sm:$0xff] %v2421_v35  ;;  %v1913_v43 = vmin.f32 %v1401_v36, 6.0  ;;  %v1403_v44 = vmax.f32 %v891_v37, 0.0  ;;  %v1404_v45 = vmax.f32 %v892_v38, 0.0  ;;  %v893_v46 = vadd.f32 3.0, %v381_v34  ;;  %v382_v47 = vld [vmem:[%s3576_s24 + $0x790] sm:$0xff] }
 0x140   : > { %2934 = vst [vmem:[%s3598_s17 + $0x750] sm:$0xff] %v2422_v39  ;;  %v2424_v48 = vmul.f32 0.16666667, %v1912_v41  ;;  %v1914_v49 = vmin.f32 %v1402_v42, 6.0  ;;  %v894_v50 = vadd.f32 3.0, %v382_v47  ;;  %v383_v51 = vld [vmem:[%s3576_s24 + $0x798] sm:$0xff] }
 0x141   : > { %2935 = vst [vmem:[%s3598_s17 + $0x758] sm:$0xff] %v2423_v40  ;;  %v2425_v52 = vmul.f32 0.16666667, %v1913_v43  ;;  %v1915_v53 = vmin.f32 %v1403_v44, 6.0  ;;  %v1916_v54 = vmin.f32 %v1404_v45, 6.0  ;;  %v1405_v55 = vmax.f32 %v893_v46, 0.0 }
 0x142   : > { %2936 = vst [vmem:[%s3598_s17 + $0x760] sm:$0xff] %v2424_v48  ;;  %v2426_v56 = vmul.f32 0.16666667, %v1914_v49  ;;  %v1406_v57 = vmax.f32 %v894_v50, 0.0  ;;  %v895_v58 = vadd.f32 3.0, %v383_v51  ;;  %v384_v59 = vld [vmem:[%s3576_s24 + $0x7a0] sm:$0xff] }
 0x143   : > { %2937 = vst [vmem:[%s3598_s17 + $0x768] sm:$0xff] %v2425_v52  ;;  %v2427_v60 = vmul.f32 0.16666667, %v1915_v53  ;;  %v2428_v61 = vmul.f32 0.16666667, %v1916_v54  ;;  %v1917_v62 = vmin.f32 %v1405_v55, 6.0 }
 0x144   : > { %2938 = vst [vmem:[%s3598_s17 + $0x770] sm:$0xff] %v2426_v56  ;;  %v1918_v63 = vmin.f32 %v1406_v57, 6.0  ;;  %v1407_v0 = vmax.f32 %v895_v58, 0.0  ;;  %v896_v1 = vadd.f32 3.0, %v384_v59  ;;  %v385_v2 = vld [vmem:[%s3576_s24 + $0x7a8] sm:$0xff]  ;;  %v386_v3 = vld [vmem:[%s3576_s24 + $0x7b0] sm:$0xff] }
 0x145   : > { %2939 = vst [vmem:[%s3598_s17 + $0x778] sm:$0xff] %v2427_v60  ;;  %v2429_v4 = vmul.f32 0.16666667, %v1917_v62  ;;  %v897_v5 = vadd.f32 3.0, %v385_v2  ;;  %v898_v6 = vadd.f32 3.0, %v386_v3  ;;  %v387_v7 = vld [vmem:[%s3576_s24 + $0x7b8] sm:$0xff] }
 0x146   : > { %2940 = vst [vmem:[%s3598_s17 + $0x780] sm:$0xff] %v2428_v61  ;;  %v2430_v8 = vmul.f32 0.16666667, %v1918_v63  ;;  %v1919_v9 = vmin.f32 %v1407_v0, 6.0  ;;  %v1408_v10 = vmax.f32 %v896_v1, 0.0  ;;  %v899_v11 = vadd.f32 3.0, %v387_v7 }
 0x147   : > { %2941 = vst [vmem:[%s3598_s17 + $0x788] sm:$0xff] %v2429_v4  ;;  %v1409_v12 = vmax.f32 %v897_v5, 0.0  ;;  %v1410_v13 = vmax.f32 %v898_v6, 0.0  ;;  %v388_v14 = vld [vmem:[%s3576_s24 + $0x7c0] sm:$0xff]  ;;  %v389_v15 = vld [vmem:[%s3576_s24 + $0x7c8] sm:$0xff]  ;;  %v390_v16 = vld [vmem:[%s3576_s24 + $0x7d0] sm:$0xff] }
 0x148   : > { %2942 = vst [vmem:[%s3598_s17 + $0x790] sm:$0xff] %v2430_v8  ;;  %v2431_v17 = vmul.f32 0.16666667, %v1919_v9  ;;  %v1920_v18 = vmin.f32 %v1408_v10, 6.0  ;;  %v1411_v19 = vmax.f32 %v899_v11, 0.0  ;;  %v900_v20 = vadd.f32 3.0, %v388_v14 }
 0x149   : > { %v1921_v21 = vmin.f32 %v1409_v12, 6.0  ;;  %v1922_v22 = vmin.f32 %v1410_v13, 6.0  ;;  %v901_v23 = vadd.f32 3.0, %v389_v15  ;;  %v902_v24 = vadd.f32 3.0, %v390_v16  ;;  %v391_v25 = vld [vmem:[%s3576_s24 + $0x7d8] sm:$0xff]  ;;  %v392_v26 = vld [vmem:[%s3576_s24 + $0x7e0] sm:$0xff] }
 0x14a   : > { %2943 = vst [vmem:[%s3598_s17 + $0x798] sm:$0xff] %v2431_v17  ;;  %v2432_v27 = vmul.f32 0.16666667, %v1920_v18  ;;  %v1923_v28 = vmin.f32 %v1411_v19, 6.0  ;;  %v1412_v29 = vmax.f32 %v900_v20, 0.0  ;;  %v903_v30 = vadd.f32 3.0, %v391_v25 }
 0x14b   : > { %v2433_v31 = vmul.f32 0.16666667, %v1921_v21  ;;  %v2434_v32 = vmul.f32 0.16666667, %v1922_v22  ;;  %v1413_v33 = vmax.f32 %v901_v23, 0.0  ;;  %v1414_v34 = vmax.f32 %v902_v24, 0.0 }
 0x14c   : > { %2944 = vst [vmem:[%s3598_s17 + $0x7a0] sm:$0xff] %v2432_v27  ;;  %v2435_v35 = vmul.f32 0.16666667, %v1923_v28  ;;  %v1924_v36 = vmin.f32 %v1412_v29, 6.0  ;;  %v1415_v37 = vmax.f32 %v903_v30, 0.0  ;;  %v904_v38 = vadd.f32 3.0, %v392_v26 }
 0x14d   : > { %2945 = vst [vmem:[%s3598_s17 + $0x7a8] sm:$0xff] %v2433_v31  ;;  %v1925_v39 = vmin.f32 %v1413_v33, 6.0  ;;  %v1926_v40 = vmin.f32 %v1414_v34, 6.0  ;;  %v393_v41 = vld [vmem:[%s3576_s24 + $0x7e8] sm:$0xff]  ;;  %v394_v42 = vld [vmem:[%s3576_s24 + $0x7f0] sm:$0xff]  ;;  %v395_v43 = vld [vmem:[%s3576_s24 + $0x7f8] sm:$0xff] }
 0x14e   : > { %2946 = vst [vmem:[%s3598_s17 + $0x7b0] sm:$0xff] %v2434_v32  ;;  %v2436_v44 = vmul.f32 0.16666667, %v1924_v36  ;;  %v1927_v45 = vmin.f32 %v1415_v37, 6.0  ;;  %v1416_v46 = vmax.f32 %v904_v38, 0.0  ;;  %v905_v47 = vadd.f32 3.0, %v393_v41 }
 0x14f   : > { %2947 = vst [vmem:[%s3598_s17 + $0x7b8] sm:$0xff] %v2435_v35  ;;  %v2437_v48 = vmul.f32 0.16666667, %v1925_v39  ;;  %v2438_v49 = vmul.f32 0.16666667, %v1926_v40  ;;  %v906_v50 = vadd.f32 3.0, %v394_v42 }
 0x150   : > { %2948 = vst [vmem:[%s3598_s17 + $0x7c0] sm:$0xff] %v2436_v44  ;;  %v2439_v51 = vmul.f32 0.16666667, %v1927_v45  ;;  %v1928_v52 = vmin.f32 %v1416_v46, 6.0  ;;  %v1417_v53 = vmax.f32 %v905_v47, 0.0  ;;  %v907_v54 = vadd.f32 3.0, %v395_v43 }
 0x151   : > { %2949 = vst [vmem:[%s3598_s17 + $0x7c8] sm:$0xff] %v2437_v48  ;;  %v1418_v55 = vmax.f32 %v906_v50, 0.0  ;;  %v396_v56 = vld [vmem:[%s3576_s24 + $0x800] sm:$0xff]  ;;  %v397_v57 = vld [vmem:[%s3576_s24 + $0x808] sm:$0xff]  ;;  %v398_v58 = vld [vmem:[%s3576_s24 + $0x810] sm:$0xff]  ;;  %s3228_s29 = sshll.u32 %s3225_s27, 4  ;;  %s3229_s29 = int_to_ptr.hbm [resolvable:$true] %s3228_s29 }
 0x152   : > { %2950 = vst [vmem:[%s3598_s17 + $0x7d0] sm:$0xff] %v2438_v49  ;;  %v2440_v59 = vmul.f32 0.16666667, %v1928_v52  ;;  %v1929_v60 = vmin.f32 %v1417_v53, 6.0  ;;  %v1419_v61 = vmax.f32 %v907_v54, 0.0  ;;  %v908_v62 = vadd.f32 3.0, %v396_v56 }
 0x153   : > { %2951 = vst [vmem:[%s3598_s17 + $0x7d8] sm:$0xff] %v2439_v51  ;;  %v1930_v63 = vmin.f32 %v1418_v55, 6.0  ;;  %v909_v0 = vadd.f32 3.0, %v397_v57  ;;  %v910_v1 = vadd.f32 3.0, %v398_v58  ;;  %v399_v2 = vld [vmem:[%s3576_s24 + $0x818] sm:$0xff]  ;;  %v400_v3 = vld [vmem:[%s3576_s24 + $0x820] sm:$0xff] }
 0x154   : > { %2952 = vst [vmem:[%s3598_s17 + $0x7e0] sm:$0xff] %v2440_v59  ;;  %v2441_v4 = vmul.f32 0.16666667, %v1929_v60  ;;  %v1931_v5 = vmin.f32 %v1419_v61, 6.0  ;;  %v1420_v6 = vmax.f32 %v908_v62, 0.0  ;;  %v911_v7 = vadd.f32 3.0, %v399_v2 }
 0x155   : > { %v2442_v8 = vmul.f32 0.16666667, %v1930_v63  ;;  %v1421_v9 = vmax.f32 %v909_v0, 0.0  ;;  %v1422_v10 = vmax.f32 %v910_v1, 0.0  ;;  %v912_v11 = vadd.f32 3.0, %v400_v3  ;;  %v401_v12 = vld [vmem:[%s3576_s24 + $0x828] sm:$0xff] }
 0x156   : > { %2953 = vst [vmem:[%s3598_s17 + $0x7e8] sm:$0xff] %v2441_v4  ;;  %v2443_v13 = vmul.f32 0.16666667, %v1931_v5  ;;  %v1932_v14 = vmin.f32 %v1420_v6, 6.0  ;;  %v1423_v15 = vmax.f32 %v911_v7, 0.0  ;;  %v913_v16 = vadd.f32 3.0, %v401_v12 }
 0x157   : > { %2954 = vst [vmem:[%s3598_s17 + $0x7f0] sm:$0xff] %v2442_v8  ;;  %v1933_v17 = vmin.f32 %v1421_v9, 6.0  ;;  %v1934_v18 = vmin.f32 %v1422_v10, 6.0  ;;  %v1424_v19 = vmax.f32 %v912_v11, 0.0  ;;  %v402_v20 = vld [vmem:[%s3576_s24 + $0x830] sm:$0xff]  ;;  %v403_v21 = vld [vmem:[%s3576_s24 + $0x838] sm:$0xff] }
 0x158   : > { %2955 = vst [vmem:[%s3598_s17 + $0x7f8] sm:$0xff] %v2443_v13  ;;  %v2444_v22 = vmul.f32 0.16666667, %v1932_v14  ;;  %v1935_v23 = vmin.f32 %v1423_v15, 6.0  ;;  %v1425_v24 = vmax.f32 %v913_v16, 0.0  ;;  %v914_v25 = vadd.f32 3.0, %v402_v20 }
 0x159   : > { %v2445_v26 = vmul.f32 0.16666667, %v1933_v17  ;;  %v2446_v27 = vmul.f32 0.16666667, %v1934_v18  ;;  %v1936_v28 = vmin.f32 %v1424_v19, 6.0  ;;  %v915_v29 = vadd.f32 3.0, %v403_v21 }
 0x15a   : > { %2956 = vst [vmem:[%s3598_s17 + $0x800] sm:$0xff] %v2444_v22  ;;  %v2447_v30 = vmul.f32 0.16666667, %v1935_v23  ;;  %v1937_v31 = vmin.f32 %v1425_v24, 6.0  ;;  %v1426_v32 = vmax.f32 %v914_v25, 0.0  ;;  %v404_v33 = vld [vmem:[%s3576_s24 + $0x840] sm:$0xff] }
 0x15b   : > { %2957 = vst [vmem:[%s3598_s17 + $0x808] sm:$0xff] %v2445_v26  ;;  %v2448_v34 = vmul.f32 0.16666667, %v1936_v28  ;;  %v1427_v35 = vmax.f32 %v915_v29, 0.0  ;;  %v916_v36 = vadd.f32 3.0, %v404_v33  ;;  %v405_v37 = vld [vmem:[%s3576_s24 + $0x848] sm:$0xff] }
 0x15c   : > { %2958 = vst [vmem:[%s3598_s17 + $0x810] sm:$0xff] %v2446_v27  ;;  %v2449_v38 = vmul.f32 0.16666667, %v1937_v31  ;;  %v1938_v39 = vmin.f32 %v1426_v32, 6.0  ;;  %v917_v40 = vadd.f32 3.0, %v405_v37  ;;  %v406_v41 = vld [vmem:[%s3576_s24 + $0x850] sm:$0xff] }
 0x15d   : > { %2959 = vst [vmem:[%s3598_s17 + $0x818] sm:$0xff] %v2447_v30  ;;  %v1939_v42 = vmin.f32 %v1427_v35, 6.0  ;;  %v1428_v43 = vmax.f32 %v916_v36, 0.0  ;;  %v918_v44 = vadd.f32 3.0, %v406_v41  ;;  %v407_v45 = vld [vmem:[%s3576_s24 + $0x858] sm:$0xff]  ;;  %v408_v46 = vld [vmem:[%s3576_s24 + $0x860] sm:$0xff] }
 0x15e   : > { %2960 = vst [vmem:[%s3598_s17 + $0x820] sm:$0xff] %v2448_v34  ;;  %v2450_v47 = vmul.f32 0.16666667, %v1938_v39  ;;  %v1429_v48 = vmax.f32 %v917_v40, 0.0  ;;  %v919_v49 = vadd.f32 3.0, %v407_v45  ;;  %v920_v50 = vadd.f32 3.0, %v408_v46 }
 0x15f   : > { %2961 = vst [vmem:[%s3598_s17 + $0x828] sm:$0xff] %v2449_v38  ;;  %v2451_v51 = vmul.f32 0.16666667, %v1939_v42  ;;  %v1940_v52 = vmin.f32 %v1428_v43, 6.0  ;;  %v1430_v53 = vmax.f32 %v918_v44, 0.0  ;;  %v409_v54 = vld [vmem:[%s3576_s24 + $0x868] sm:$0xff] }
 0x160   : > { %2962 = vst [vmem:[%s3598_s17 + $0x830] sm:$0xff] %v2450_v47  ;;  %v1941_v55 = vmin.f32 %v1429_v48, 6.0  ;;  %v1431_v56 = vmax.f32 %v919_v49, 0.0  ;;  %v1432_v57 = vmax.f32 %v920_v50, 0.0  ;;  %v921_v58 = vadd.f32 3.0, %v409_v54  ;;  %v410_v59 = vld [vmem:[%s3576_s24 + $0x870] sm:$0xff] }
 0x161   : > { %2963 = vst [vmem:[%s3598_s17 + $0x838] sm:$0xff] %v2451_v51  ;;  %v2452_v60 = vmul.f32 0.16666667, %v1940_v52  ;;  %v1942_v61 = vmin.f32 %v1430_v53, 6.0  ;;  %v922_v62 = vadd.f32 3.0, %v410_v59  ;;  %v411_v63 = vld [vmem:[%s3576_s24 + $0x878] sm:$0xff] }
 0x162   : > { %v2453_v0 = vmul.f32 0.16666667, %v1941_v55  ;;  %v1943_v1 = vmin.f32 %v1431_v56, 6.0  ;;  %v1944_v2 = vmin.f32 %v1432_v57, 6.0  ;;  %v1433_v3 = vmax.f32 %v921_v58, 0.0  ;;  %v412_v4 = vld [vmem:[%s3576_s24 + $0x880] sm:$0xff] }
 0x163   : > { %2964 = vst [vmem:[%s3598_s17 + $0x840] sm:$0xff] %v2452_v60  ;;  %v2454_v5 = vmul.f32 0.16666667, %v1942_v61  ;;  %v1434_v6 = vmax.f32 %v922_v62, 0.0  ;;  %v923_v7 = vadd.f32 3.0, %v411_v63  ;;  %v924_v8 = vadd.f32 3.0, %v412_v4 }
 0x164   : > { %2965 = vst [vmem:[%s3598_s17 + $0x848] sm:$0xff] %v2453_v0  ;;  %v2455_v9 = vmul.f32 0.16666667, %v1943_v1  ;;  %v2456_v10 = vmul.f32 0.16666667, %v1944_v2  ;;  %v1945_v11 = vmin.f32 %v1433_v3, 6.0 }
 0x165   : > { %2966 = vst [vmem:[%s3598_s17 + $0x850] sm:$0xff] %v2454_v5  ;;  %v1946_v12 = vmin.f32 %v1434_v6, 6.0  ;;  %v1435_v13 = vmax.f32 %v923_v7, 0.0  ;;  %v1436_v14 = vmax.f32 %v924_v8, 0.0  ;;  %v413_v15 = vld [vmem:[%s3576_s24 + $0x888] sm:$0xff]  ;;  %v414_v16 = vld [vmem:[%s3576_s24 + $0x890] sm:$0xff] }
 0x166   : > { %2967 = vst [vmem:[%s3598_s17 + $0x858] sm:$0xff] %v2455_v9  ;;  %v2457_v17 = vmul.f32 0.16666667, %v1945_v11  ;;  %v925_v18 = vadd.f32 3.0, %v413_v15  ;;  %v926_v19 = vadd.f32 3.0, %v414_v16  ;;  %v415_v20 = vld [vmem:[%s3576_s24 + $0x898] sm:$0xff] }
 0x167   : > { %2968 = vst [vmem:[%s3598_s17 + $0x860] sm:$0xff] %v2456_v10  ;;  %v2458_v21 = vmul.f32 0.16666667, %v1946_v12  ;;  %v1947_v22 = vmin.f32 %v1435_v13, 6.0  ;;  %v1948_v23 = vmin.f32 %v1436_v14, 6.0  ;;  %v927_v24 = vadd.f32 3.0, %v415_v20 }
 0x168   : > { %2969 = vst [vmem:[%s3598_s17 + $0x868] sm:$0xff] %v2457_v17  ;;  %v1437_v25 = vmax.f32 %v925_v18, 0.0  ;;  %v1438_v26 = vmax.f32 %v926_v19, 0.0  ;;  %v416_v27 = vld [vmem:[%s3576_s24 + $0x8a0] sm:$0xff]  ;;  %v417_v28 = vld [vmem:[%s3576_s24 + $0x8a8] sm:$0xff]  ;;  %v418_v29 = vld [vmem:[%s3576_s24 + $0x8b0] sm:$0xff] }
 0x169   : > { %2970 = vst [vmem:[%s3598_s17 + $0x870] sm:$0xff] %v2458_v21  ;;  %v2459_v30 = vmul.f32 0.16666667, %v1947_v22  ;;  %v2460_v31 = vmul.f32 0.16666667, %v1948_v23  ;;  %v1439_v32 = vmax.f32 %v927_v24, 0.0 }
 0x16a   : > { %v1949_v33 = vmin.f32 %v1437_v25, 6.0  ;;  %v1950_v34 = vmin.f32 %v1438_v26, 6.0  ;;  %v928_v35 = vadd.f32 3.0, %v416_v27  ;;  %v929_v36 = vadd.f32 3.0, %v417_v28  ;;  %v419_v37 = vld [vmem:[%s3576_s24 + $0x8b8] sm:$0xff]  ;;  %v420_v38 = vld [vmem:[%s3576_s24 + $0x8c0] sm:$0xff] }
 0x16b   : > { %2971 = vst [vmem:[%s3598_s17 + $0x878] sm:$0xff] %v2459_v30  ;;  %v1951_v39 = vmin.f32 %v1439_v32, 6.0  ;;  %v930_v40 = vadd.f32 3.0, %v418_v29  ;;  %v931_v41 = vadd.f32 3.0, %v419_v37  ;;  %v932_v42 = vadd.f32 3.0, %v420_v38  ;;  %v421_v43 = vld [vmem:[%s3576_s24 + $0x8c8] sm:$0xff] }
 0x16c   : > { %2972 = vst [vmem:[%s3598_s17 + $0x880] sm:$0xff] %v2460_v31  ;;  %v2461_v44 = vmul.f32 0.16666667, %v1949_v33  ;;  %v2462_v45 = vmul.f32 0.16666667, %v1950_v34  ;;  %v1440_v46 = vmax.f32 %v928_v35, 0.0 }
 0x16d   : > { %v2463_v47 = vmul.f32 0.16666667, %v1951_v39  ;;  %v1441_v48 = vmax.f32 %v929_v36, 0.0  ;;  %v1442_v49 = vmax.f32 %v930_v40, 0.0  ;;  %v1443_v50 = vmax.f32 %v931_v41, 0.0  ;;  %v422_v51 = vld [vmem:[%s3576_s24 + $0x8d0] sm:$0xff] }
 0x16e   : > { %2973 = vst [vmem:[%s3598_s17 + $0x888] sm:$0xff] %v2461_v44  ;;  %v1952_v52 = vmin.f32 %v1440_v46, 6.0  ;;  %v1444_v53 = vmax.f32 %v932_v42, 0.0  ;;  %v933_v54 = vadd.f32 3.0, %v421_v43  ;;  %v934_v55 = vadd.f32 3.0, %v422_v51  ;;  %v423_v56 = vld [vmem:[%s3576_s24 + $0x8d8] sm:$0xff] }
 0x16f   : > { %2974 = vst [vmem:[%s3598_s17 + $0x890] sm:$0xff] %v2462_v45  ;;  %v1953_v57 = vmin.f32 %v1441_v48, 6.0  ;;  %v1954_v58 = vmin.f32 %v1442_v49, 6.0  ;;  %v1955_v59 = vmin.f32 %v1443_v50, 6.0  ;;  %v935_v60 = vadd.f32 3.0, %v423_v56  ;;  %v424_v61 = vld [vmem:[%s3576_s24 + $0x8e0] sm:$0xff] }
 0x170   : > { %2975 = vst [vmem:[%s3598_s17 + $0x898] sm:$0xff] %v2463_v47  ;;  %v2464_v62 = vmul.f32 0.16666667, %v1952_v52  ;;  %v1956_v63 = vmin.f32 %v1444_v53, 6.0  ;;  %v1445_v0 = vmax.f32 %v933_v54, 0.0  ;;  %v1446_v1 = vmax.f32 %v934_v55, 0.0 }
 0x171   : > { %v2465_v2 = vmul.f32 0.16666667, %v1953_v57  ;;  %v2466_v3 = vmul.f32 0.16666667, %v1954_v58  ;;  %v2467_v4 = vmul.f32 0.16666667, %v1955_v59 }
 0x172   : > { %2976 = vst [vmem:[%s3598_s17 + $0x8a0] sm:$0xff] %v2464_v62  ;;  %v2468_v5 = vmul.f32 0.16666667, %v1956_v63  ;;  %v1957_v6 = vmin.f32 %v1445_v0, 6.0  ;;  %v1958_v7 = vmin.f32 %v1446_v1, 6.0  ;;  %v1447_v8 = vmax.f32 %v935_v60, 0.0 }
 0x173   : > { %2977 = vst [vmem:[%s3598_s17 + $0x8a8] sm:$0xff] %v2465_v2  ;;  %v936_v9 = vadd.f32 3.0, %v424_v61  ;;  %v425_v10 = vld [vmem:[%s3576_s24 + $0x8e8] sm:$0xff]  ;;  %v426_v11 = vld [vmem:[%s3576_s24 + $0x8f0] sm:$0xff]  ;;  %v427_v12 = vld [vmem:[%s3576_s24 + $0x8f8] sm:$0xff]  ;;  %s3213_s30 = scalar_lea.sflag [#allocation4], %s3570_s21 }
 0x174   : > { %2978 = vst [vmem:[%s3598_s17 + $0x8b0] sm:$0xff] %v2466_v3  ;;  %v2469_v13 = vmul.f32 0.16666667, %v1957_v6  ;;  %v2470_v14 = vmul.f32 0.16666667, %v1958_v7  ;;  %v1959_v15 = vmin.f32 %v1447_v8, 6.0 }
 0x175   : > { %2979 = vst [vmem:[%s3598_s17 + $0x8b8] sm:$0xff] %v2467_v4  ;;  %v1448_v16 = vmax.f32 %v936_v9, 0.0  ;;  %v937_v17 = vadd.f32 3.0, %v425_v10  ;;  %v938_v18 = vadd.f32 3.0, %v426_v11  ;;  %v939_v19 = vadd.f32 3.0, %v427_v12  ;;  %v428_v20 = vld [vmem:[%s3576_s24 + $0x900] sm:$0xff] }
 0x176   : > { %2980 = vst [vmem:[%s3598_s17 + $0x8c0] sm:$0xff] %v2468_v5  ;;  %v2471_v21 = vmul.f32 0.16666667, %v1959_v15  ;;  %v940_v22 = vadd.f32 3.0, %v428_v20  ;;  %v429_v23 = vld [vmem:[%s3576_s24 + $0x908] sm:$0xff]  ;;  %v430_v24 = vld [vmem:[%s3576_s24 + $0x910] sm:$0xff] }
 0x177   : > { %2981 = vst [vmem:[%s3598_s17 + $0x8c8] sm:$0xff] %v2469_v13  ;;  %v1960_v25 = vmin.f32 %v1448_v16, 6.0  ;;  %v1449_v26 = vmax.f32 %v937_v17, 0.0  ;;  %v1450_v27 = vmax.f32 %v938_v18, 0.0  ;;  %v1451_v28 = vmax.f32 %v939_v19, 0.0  ;;  %v431_v29 = vld [vmem:[%s3576_s24 + $0x918] sm:$0xff] }
 0x178   : > { %2982 = vst [vmem:[%s3598_s17 + $0x8d0] sm:$0xff] %v2470_v14  ;;  %v1452_v30 = vmax.f32 %v940_v22, 0.0  ;;  %v941_v31 = vadd.f32 3.0, %v429_v23  ;;  %v942_v32 = vadd.f32 3.0, %v430_v24  ;;  %v943_v33 = vadd.f32 3.0, %v431_v29  ;;  %v432_v34 = vld [vmem:[%s3576_s24 + $0x920] sm:$0xff] }
 0x179   : > { %2983 = vst [vmem:[%s3598_s17 + $0x8d8] sm:$0xff] %v2471_v21  ;;  %v2472_v35 = vmul.f32 0.16666667, %v1960_v25  ;;  %v1961_v36 = vmin.f32 %v1449_v26, 6.0  ;;  %v1962_v37 = vmin.f32 %v1450_v27, 6.0  ;;  %v1963_v38 = vmin.f32 %v1451_v28, 6.0 }
 0x17a   : > { %v1964_v39 = vmin.f32 %v1452_v30, 6.0  ;;  %v1453_v40 = vmax.f32 %v941_v31, 0.0  ;;  %v1454_v41 = vmax.f32 %v942_v32, 0.0  ;;  %v1455_v42 = vmax.f32 %v943_v33, 0.0  ;;  %v433_v43 = vld [vmem:[%s3576_s24 + $0x928] sm:$0xff]  ;;  %v434_v44 = vld [vmem:[%s3576_s24 + $0x930] sm:$0xff] }
 0x17b   : > { %2984 = vst [vmem:[%s3598_s17 + $0x8e0] sm:$0xff] %v2472_v35  ;;  %v2473_v45 = vmul.f32 0.16666667, %v1961_v36  ;;  %v2474_v46 = vmul.f32 0.16666667, %v1962_v37  ;;  %v944_v47 = vadd.f32 3.0, %v432_v34 }
 0x17c   : > { %v2475_v48 = vmul.f32 0.16666667, %v1963_v38  ;;  %v2476_v49 = vmul.f32 0.16666667, %v1964_v39  ;;  %v1965_v50 = vmin.f32 %v1453_v40, 6.0  ;;  %v1966_v51 = vmin.f32 %v1454_v41, 6.0 }
 0x17d   : > { %2985 = vst [vmem:[%s3598_s17 + $0x8e8] sm:$0xff] %v2473_v45  ;;  %v1967_v52 = vmin.f32 %v1455_v42, 6.0  ;;  %v1456_v53 = vmax.f32 %v944_v47, 0.0  ;;  %v945_v54 = vadd.f32 3.0, %v433_v43  ;;  %v946_v55 = vadd.f32 3.0, %v434_v44  ;;  %v435_v56 = vld [vmem:[%s3576_s24 + $0x938] sm:$0xff] }
 0x17e   : > { %2986 = vst [vmem:[%s3598_s17 + $0x8f0] sm:$0xff] %v2474_v46  ;;  %v2477_v57 = vmul.f32 0.16666667, %v1965_v50  ;;  %v2478_v58 = vmul.f32 0.16666667, %v1966_v51  ;;  %v947_v59 = vadd.f32 3.0, %v435_v56 }
 0x17f   : > { %2987 = vst [vmem:[%s3598_s17 + $0x8f8] sm:$0xff] %v2475_v48  ;;  %v2479_v60 = vmul.f32 0.16666667, %v1967_v52  ;;  %v1968_v61 = vmin.f32 %v1456_v53, 6.0  ;;  %v1457_v62 = vmax.f32 %v945_v54, 0.0  ;;  %v1458_v63 = vmax.f32 %v946_v55, 0.0 }
 0x180   : > { %2988 = vst [vmem:[%s3598_s17 + $0x900] sm:$0xff] %v2476_v49  ;;  %v1459_v0 = vmax.f32 %v947_v59, 0.0  ;;  %v436_v1 = vld [vmem:[%s3576_s24 + $0x940] sm:$0xff]  ;;  %v437_v2 = vld [vmem:[%s3576_s24 + $0x948] sm:$0xff]  ;;  %v438_v3 = vld [vmem:[%s3576_s24 + $0x950] sm:$0xff]  ;;  %s3416_s2 = sshra.s32 %s3229_s29, 4  ;;  %s3417_s2 = int_to_ptr.hbm [resolvable:$true] %s3416_s2 }
 0x181   : > { %2989 = vst [vmem:[%s3598_s17 + $0x908] sm:$0xff] %v2477_v57  ;;  %v2480_v4 = vmul.f32 0.16666667, %v1968_v61  ;;  %v1969_v5 = vmin.f32 %v1457_v62, 6.0  ;;  %v1970_v6 = vmin.f32 %v1458_v63, 6.0  ;;  %v948_v7 = vadd.f32 3.0, %v436_v1  ;;  %p3423_p0 = scmp.lt.s32.totalorder %s3417_s2, %s4645_s1 }
 0x182   : > { %2990 = vst [vmem:[%s3598_s17 + $0x910] sm:$0xff] %v2478_v58  ;;  %v1971_v8 = vmin.f32 %v1459_v0, 6.0  ;;  %v949_v9 = vadd.f32 3.0, %v437_v2  ;;  %v950_v10 = vadd.f32 3.0, %v438_v3  ;;  %v439_v11 = vld [vmem:[%s3576_s24 + $0x958] sm:$0xff]  ;;  %v440_v12 = vld [vmem:[%s3576_s24 + $0x960] sm:$0xff] }
 0x183   : > { %2991 = vst [vmem:[%s3598_s17 + $0x918] sm:$0xff] %v2479_v60  ;;  %v2481_v13 = vmul.f32 0.16666667, %v1969_v5  ;;  %v2482_v14 = vmul.f32 0.16666667, %v1970_v6  ;;  %v1460_v15 = vmax.f32 %v948_v7, 0.0 }
 0x184   : > { %2992 = vst [vmem:[%s3598_s17 + $0x920] sm:$0xff] %v2480_v4  ;;  %v2483_v16 = vmul.f32 0.16666667, %v1971_v8  ;;  %v1461_v17 = vmax.f32 %v949_v9, 0.0  ;;  %v1462_v18 = vmax.f32 %v950_v10, 0.0  ;;  %v951_v19 = vadd.f32 3.0, %v439_v11 }
 0x185   : > { %2993 = vst [vmem:[%s3598_s17 + $0x928] sm:$0xff] %v2481_v13  ;;  %v1972_v20 = vmin.f32 %v1460_v15, 6.0  ;;  %v952_v21 = vadd.f32 3.0, %v440_v12  ;;  %v441_v22 = vld [vmem:[%s3576_s24 + $0x968] sm:$0xff]  ;;  %v442_v23 = vld [vmem:[%s3576_s24 + $0x970] sm:$0xff]  ;;  %v443_v24 = vld [vmem:[%s3576_s24 + $0x978] sm:$0xff] }
 0x186   : > { %2994 = vst [vmem:[%s3598_s17 + $0x930] sm:$0xff] %v2482_v14  ;;  %v1973_v25 = vmin.f32 %v1461_v17, 6.0  ;;  %v1974_v26 = vmin.f32 %v1462_v18, 6.0  ;;  %v1463_v27 = vmax.f32 %v951_v19, 0.0  ;;  %v953_v28 = vadd.f32 3.0, %v441_v22  ;;  %v444_v29 = vld [vmem:[%s3576_s24 + $0x980] sm:$0xff] }
 0x187   : > { %2995 = vst [vmem:[%s3598_s17 + $0x938] sm:$0xff] %v2483_v16  ;;  %v2484_v30 = vmul.f32 0.16666667, %v1972_v20  ;;  %v1464_v31 = vmax.f32 %v952_v21, 0.0  ;;  %v954_v32 = vadd.f32 3.0, %v442_v23  ;;  %v955_v33 = vadd.f32 3.0, %v443_v24 }
 0x188   : > { %v2485_v34 = vmul.f32 0.16666667, %v1973_v25  ;;  %v2486_v35 = vmul.f32 0.16666667, %v1974_v26  ;;  %v1975_v36 = vmin.f32 %v1463_v27, 6.0  ;;  %v1465_v37 = vmax.f32 %v953_v28, 0.0 }
 0x189   : > { %2996 = vst [vmem:[%s3598_s17 + $0x940] sm:$0xff] %v2484_v30  ;;  %v1976_v38 = vmin.f32 %v1464_v31, 6.0  ;;  %v1466_v39 = vmax.f32 %v954_v32, 0.0  ;;  %v1467_v40 = vmax.f32 %v955_v33, 0.0  ;;  %v956_v41 = vadd.f32 3.0, %v444_v29  ;;  %v445_v42 = vld [vmem:[%s3576_s24 + $0x988] sm:$0xff] }
 0x18a   : > { %2997 = vst [vmem:[%s3598_s17 + $0x948] sm:$0xff] %v2485_v34  ;;  %v2487_v43 = vmul.f32 0.16666667, %v1975_v36  ;;  %v1977_v44 = vmin.f32 %v1465_v37, 6.0  ;;  %v957_v45 = vadd.f32 3.0, %v445_v42  ;;  %v446_v46 = vld [vmem:[%s3576_s24 + $0x990] sm:$0xff] }
 0x18b   : > { %2998 = vst [vmem:[%s3598_s17 + $0x950] sm:$0xff] %v2486_v35  ;;  %v2488_v47 = vmul.f32 0.16666667, %v1976_v38  ;;  %v1978_v48 = vmin.f32 %v1466_v39, 6.0  ;;  %v1979_v49 = vmin.f32 %v1467_v40, 6.0  ;;  %v1468_v50 = vmax.f32 %v956_v41, 0.0 }
 0x18c   : > { %2999 = vst [vmem:[%s3598_s17 + $0x958] sm:$0xff] %v2487_v43  ;;  %v2489_v51 = vmul.f32 0.16666667, %v1977_v44  ;;  %v1469_v52 = vmax.f32 %v957_v45, 0.0  ;;  %v958_v53 = vadd.f32 3.0, %v446_v46  ;;  %v447_v54 = vld [vmem:[%s3576_s24 + $0x998] sm:$0xff] }
 0x18d   : > { %3000 = vst [vmem:[%s3598_s17 + $0x960] sm:$0xff] %v2488_v47  ;;  %v2490_v55 = vmul.f32 0.16666667, %v1978_v48  ;;  %v2491_v56 = vmul.f32 0.16666667, %v1979_v49  ;;  %v1980_v57 = vmin.f32 %v1468_v50, 6.0 }
 0x18e   : > { %3001 = vst [vmem:[%s3598_s17 + $0x968] sm:$0xff] %v2489_v51  ;;  %v1981_v58 = vmin.f32 %v1469_v52, 6.0  ;;  %v1470_v59 = vmax.f32 %v958_v53, 0.0  ;;  %v959_v60 = vadd.f32 3.0, %v447_v54  ;;  %v448_v61 = vld [vmem:[%s3576_s24 + $0x9a0] sm:$0xff]  ;;  %v449_v62 = vld [vmem:[%s3576_s24 + $0x9a8] sm:$0xff] }
 0x18f   : > { %3002 = vst [vmem:[%s3598_s17 + $0x970] sm:$0xff] %v2490_v55  ;;  %v2492_v63 = vmul.f32 0.16666667, %v1980_v57  ;;  %v960_v0 = vadd.f32 3.0, %v448_v61  ;;  %v961_v1 = vadd.f32 3.0, %v449_v62  ;;  %v450_v2 = vld [vmem:[%s3576_s24 + $0x9b0] sm:$0xff] }
 0x190   : > { %3003 = vst [vmem:[%s3598_s17 + $0x978] sm:$0xff] %v2491_v56  ;;  %v2493_v3 = vmul.f32 0.16666667, %v1981_v58  ;;  %v1982_v4 = vmin.f32 %v1470_v59, 6.0  ;;  %v1471_v5 = vmax.f32 %v959_v60, 0.0  ;;  %v962_v6 = vadd.f32 3.0, %v450_v2 }
 0x191   : > { %3004 = vst [vmem:[%s3598_s17 + $0x980] sm:$0xff] %v2492_v63  ;;  %v1472_v7 = vmax.f32 %v960_v0, 0.0  ;;  %v1473_v8 = vmax.f32 %v961_v1, 0.0  ;;  %v451_v9 = vld [vmem:[%s3576_s24 + $0x9b8] sm:$0xff]  ;;  %v452_v10 = vld [vmem:[%s3576_s24 + $0x9c0] sm:$0xff]  ;;  %v453_v11 = vld [vmem:[%s3576_s24 + $0x9c8] sm:$0xff] }
 0x192   : > { %3005 = vst [vmem:[%s3598_s17 + $0x988] sm:$0xff] %v2493_v3  ;;  %v2494_v12 = vmul.f32 0.16666667, %v1982_v4  ;;  %v1983_v13 = vmin.f32 %v1471_v5, 6.0  ;;  %v1474_v14 = vmax.f32 %v962_v6, 0.0  ;;  %v963_v15 = vadd.f32 3.0, %v451_v9 }
 0x193   : > { %v1984_v16 = vmin.f32 %v1472_v7, 6.0  ;;  %v1985_v17 = vmin.f32 %v1473_v8, 6.0  ;;  %v964_v18 = vadd.f32 3.0, %v452_v10  ;;  %v965_v19 = vadd.f32 3.0, %v453_v11  ;;  %v454_v20 = vld [vmem:[%s3576_s24 + $0x9d0] sm:$0xff]  ;;  %v455_v21 = vld [vmem:[%s3576_s24 + $0x9d8] sm:$0xff] }
 0x194   : > { %3006 = vst [vmem:[%s3598_s17 + $0x990] sm:$0xff] %v2494_v12  ;;  %v2495_v22 = vmul.f32 0.16666667, %v1983_v13  ;;  %v1986_v23 = vmin.f32 %v1474_v14, 6.0  ;;  %v1475_v24 = vmax.f32 %v963_v15, 0.0  ;;  %v966_v25 = vadd.f32 3.0, %v454_v20 }
 0x195   : > { %v2496_v26 = vmul.f32 0.16666667, %v1984_v16  ;;  %v2497_v27 = vmul.f32 0.16666667, %v1985_v17  ;;  %v1476_v28 = vmax.f32 %v964_v18, 0.0  ;;  %v1477_v29 = vmax.f32 %v965_v19, 0.0 }
 0x196   : > { %3007 = vst [vmem:[%s3598_s17 + $0x998] sm:$0xff] %v2495_v22  ;;  %v2498_v30 = vmul.f32 0.16666667, %v1986_v23  ;;  %v1987_v31 = vmin.f32 %v1475_v24, 6.0  ;;  %v1478_v32 = vmax.f32 %v966_v25, 0.0  ;;  %v967_v33 = vadd.f32 3.0, %v455_v21 }
 0x197   : > { %3008 = vst [vmem:[%s3598_s17 + $0x9a0] sm:$0xff] %v2496_v26  ;;  %v1988_v34 = vmin.f32 %v1476_v28, 6.0  ;;  %v1989_v35 = vmin.f32 %v1477_v29, 6.0  ;;  %v456_v36 = vld [vmem:[%s3576_s24 + $0x9e0] sm:$0xff]  ;;  %v457_v37 = vld [vmem:[%s3576_s24 + $0x9e8] sm:$0xff]  ;;  %v458_v38 = vld [vmem:[%s3576_s24 + $0x9f0] sm:$0xff] }
 0x198   : > { %3009 = vst [vmem:[%s3598_s17 + $0x9a8] sm:$0xff] %v2497_v27  ;;  %v2499_v39 = vmul.f32 0.16666667, %v1987_v31  ;;  %v1990_v40 = vmin.f32 %v1478_v32, 6.0  ;;  %v1479_v41 = vmax.f32 %v967_v33, 0.0  ;;  %v968_v42 = vadd.f32 3.0, %v456_v36 }
 0x199   : > { %3010 = vst [vmem:[%s3598_s17 + $0x9b0] sm:$0xff] %v2498_v30  ;;  %v2500_v43 = vmul.f32 0.16666667, %v1988_v34  ;;  %v2501_v44 = vmul.f32 0.16666667, %v1989_v35  ;;  %v969_v45 = vadd.f32 3.0, %v457_v37 }
 0x19a   : > { %3011 = vst [vmem:[%s3598_s17 + $0x9b8] sm:$0xff] %v2499_v39  ;;  %v2502_v46 = vmul.f32 0.16666667, %v1990_v40  ;;  %v1991_v47 = vmin.f32 %v1479_v41, 6.0  ;;  %v1480_v48 = vmax.f32 %v968_v42, 0.0  ;;  %v970_v49 = vadd.f32 3.0, %v458_v38 }
 0x19b   : > { %3012 = vst [vmem:[%s3598_s17 + $0x9c0] sm:$0xff] %v2500_v43  ;;  %v1481_v50 = vmax.f32 %v969_v45, 0.0  ;;  %v459_v51 = vld [vmem:[%s3576_s24 + $0x9f8] sm:$0xff]  ;;  %v460_v52 = vld [vmem:[%s3576_s24 + $0xa00] sm:$0xff]  ;;  %v461_v53 = vld [vmem:[%s3576_s24 + $0xa08] sm:$0xff]  ;;  %s3418_s3 = scalar_lea.hbm %s3417_s2, 4096 }
 0x19c   : > { %3013 = vst [vmem:[%s3598_s17 + $0x9c8] sm:$0xff] %v2501_v44  ;;  %v2503_v54 = vmul.f32 0.16666667, %v1991_v47  ;;  %v1992_v55 = vmin.f32 %v1480_v48, 6.0  ;;  %v1482_v56 = vmax.f32 %v970_v49, 0.0  ;;  %v971_v57 = vadd.f32 3.0, %v459_v51  ;;  %p3419_p6 = scmp.ne.s32.totalorder %s3417_s2, %s3418_s3 }
 0x19d   : > { %3014 = vst [vmem:[%s3598_s17 + $0x9d0] sm:$0xff] %v2502_v46  ;;  %v1993_v58 = vmin.f32 %v1481_v50, 6.0  ;;  %v972_v59 = vadd.f32 3.0, %v460_v52  ;;  %v973_v60 = vadd.f32 3.0, %v461_v53  ;;  %v462_v61 = vld [vmem:[%s3576_s24 + $0xa10] sm:$0xff]  ;;  %v463_v62 = vld [vmem:[%s3576_s24 + $0xa18] sm:$0xff] }
 0x19e   : > { %3015 = vst [vmem:[%s3598_s17 + $0x9d8] sm:$0xff] %v2503_v54  ;;  %v2504_v63 = vmul.f32 0.16666667, %v1992_v55  ;;  %v1994_v0 = vmin.f32 %v1482_v56, 6.0  ;;  %v1483_v1 = vmax.f32 %v971_v57, 0.0  ;;  %v974_v2 = vadd.f32 3.0, %v462_v61  ;;  %p3420_p9 = pnand %p3419_p6, %p3534_p11 }
 0x19f   : > { %v2505_v3 = vmul.f32 0.16666667, %v1993_v58  ;;  %v1484_v4 = vmax.f32 %v972_v59, 0.0  ;;  %v1485_v5 = vmax.f32 %v973_v60, 0.0  ;;  %v975_v6 = vadd.f32 3.0, %v463_v62  ;;  %v464_v7 = vld [vmem:[%s3576_s24 + $0xa20] sm:$0xff] }
 0x1a0   : > { %3016 = vst [vmem:[%s3598_s17 + $0x9e0] sm:$0xff] %v2504_v63  ;;  %v2506_v8 = vmul.f32 0.16666667, %v1994_v0  ;;  %v1995_v9 = vmin.f32 %v1483_v1, 6.0  ;;  %v1486_v10 = vmax.f32 %v974_v2, 0.0  ;;  %v976_v11 = vadd.f32 3.0, %v464_v7  ;;  %p3421_p13 = pneg %p3420_p9 }
 0x1a1   : > { %3017 = vst [vmem:[%s3598_s17 + $0x9e8] sm:$0xff] %v2505_v3  ;;  %v1996_v12 = vmin.f32 %v1484_v4, 6.0  ;;  %v1997_v13 = vmin.f32 %v1485_v5, 6.0  ;;  %v1487_v14 = vmax.f32 %v975_v6, 0.0  ;;  %v465_v15 = vld [vmem:[%s3576_s24 + $0xa28] sm:$0xff]  ;;  %v466_v16 = vld [vmem:[%s3576_s24 + $0xa30] sm:$0xff] }
 0x1a2   : > { %3018 = vst [vmem:[%s3598_s17 + $0x9f0] sm:$0xff] %v2506_v8  ;;  %v2507_v17 = vmul.f32 0.16666667, %v1995_v9  ;;  %v1998_v18 = vmin.f32 %v1486_v10, 6.0  ;;  %v1488_v19 = vmax.f32 %v976_v11, 0.0  ;;  %v977_v20 = vadd.f32 3.0, %v465_v15 }
 0x1a3   : > { %v2508_v21 = vmul.f32 0.16666667, %v1996_v12  ;;  %v2509_v22 = vmul.f32 0.16666667, %v1997_v13  ;;  %v1999_v23 = vmin.f32 %v1487_v14, 6.0  ;;  %v978_v24 = vadd.f32 3.0, %v466_v16 }
 0x1a4   : > { %3019 = vst [vmem:[%s3598_s17 + $0x9f8] sm:$0xff] %v2507_v17  ;;  %v2510_v25 = vmul.f32 0.16666667, %v1998_v18  ;;  %v2000_v26 = vmin.f32 %v1488_v19, 6.0  ;;  %v1489_v27 = vmax.f32 %v977_v20, 0.0  ;;  %v467_v28 = vld [vmem:[%s3576_s24 + $0xa38] sm:$0xff] }
 0x1a5   : > { %3020 = vst [vmem:[%s3598_s17 + $0xa00] sm:$0xff] %v2508_v21  ;;  %v2511_v29 = vmul.f32 0.16666667, %v1999_v23  ;;  %v1490_v30 = vmax.f32 %v978_v24, 0.0  ;;  %v979_v31 = vadd.f32 3.0, %v467_v28  ;;  %v468_v32 = vld [vmem:[%s3576_s24 + $0xa40] sm:$0xff] }
 0x1a6   : > { %3021 = vst [vmem:[%s3598_s17 + $0xa08] sm:$0xff] %v2509_v22  ;;  %v2512_v33 = vmul.f32 0.16666667, %v2000_v26  ;;  %v2001_v34 = vmin.f32 %v1489_v27, 6.0  ;;  %v980_v35 = vadd.f32 3.0, %v468_v32  ;;  %v469_v36 = vld [vmem:[%s3576_s24 + $0xa48] sm:$0xff] }
 0x1a7   : > { %3022 = vst [vmem:[%s3598_s17 + $0xa10] sm:$0xff] %v2510_v25  ;;  %v2002_v37 = vmin.f32 %v1490_v30, 6.0  ;;  %v1491_v38 = vmax.f32 %v979_v31, 0.0  ;;  %v981_v39 = vadd.f32 3.0, %v469_v36  ;;  %v470_v40 = vld [vmem:[%s3576_s24 + $0xa50] sm:$0xff]  ;;  %v471_v41 = vld [vmem:[%s3576_s24 + $0xa58] sm:$0xff] }
 0x1a8   : > { %3023 = vst [vmem:[%s3598_s17 + $0xa18] sm:$0xff] %v2511_v29  ;;  %v2513_v42 = vmul.f32 0.16666667, %v2001_v34  ;;  %v1492_v43 = vmax.f32 %v980_v35, 0.0  ;;  %v982_v44 = vadd.f32 3.0, %v470_v40  ;;  %v983_v45 = vadd.f32 3.0, %v471_v41 }
 0x1a9   : > { %3024 = vst [vmem:[%s3598_s17 + $0xa20] sm:$0xff] %v2512_v33  ;;  %v2514_v46 = vmul.f32 0.16666667, %v2002_v37  ;;  %v2003_v47 = vmin.f32 %v1491_v38, 6.0  ;;  %v1493_v48 = vmax.f32 %v981_v39, 0.0  ;;  %v472_v49 = vld [vmem:[%s3576_s24 + $0xa60] sm:$0xff] }
 0x1aa   : > { %3025 = vst [vmem:[%s3598_s17 + $0xa28] sm:$0xff] %v2513_v42  ;;  %v2004_v50 = vmin.f32 %v1492_v43, 6.0  ;;  %v1494_v51 = vmax.f32 %v982_v44, 0.0  ;;  %v1495_v52 = vmax.f32 %v983_v45, 0.0  ;;  %v984_v53 = vadd.f32 3.0, %v472_v49  ;;  %v473_v54 = vld [vmem:[%s3576_s24 + $0xa68] sm:$0xff] }
 0x1ab   : > { %3026 = vst [vmem:[%s3598_s17 + $0xa30] sm:$0xff] %v2514_v46  ;;  %v2515_v55 = vmul.f32 0.16666667, %v2003_v47  ;;  %v2005_v56 = vmin.f32 %v1493_v48, 6.0  ;;  %v985_v57 = vadd.f32 3.0, %v473_v54  ;;  %v474_v58 = vld [vmem:[%s3576_s24 + $0xa70] sm:$0xff] }
 0x1ac   : > { %v2516_v59 = vmul.f32 0.16666667, %v2004_v50  ;;  %v2006_v60 = vmin.f32 %v1494_v51, 6.0  ;;  %v2007_v61 = vmin.f32 %v1495_v52, 6.0  ;;  %v1496_v62 = vmax.f32 %v984_v53, 0.0  ;;  %v475_v63 = vld [vmem:[%s3576_s24 + $0xa78] sm:$0xff] }
 0x1ad   : > { %3027 = vst [vmem:[%s3598_s17 + $0xa38] sm:$0xff] %v2515_v55  ;;  %v2517_v0 = vmul.f32 0.16666667, %v2005_v56  ;;  %v1497_v1 = vmax.f32 %v985_v57, 0.0  ;;  %v986_v2 = vadd.f32 3.0, %v474_v58  ;;  %v987_v3 = vadd.f32 3.0, %v475_v63 }
 0x1ae   : > { %3028 = vst [vmem:[%s3598_s17 + $0xa40] sm:$0xff] %v2516_v59  ;;  %v2518_v4 = vmul.f32 0.16666667, %v2006_v60  ;;  %v2519_v5 = vmul.f32 0.16666667, %v2007_v61  ;;  %v2008_v6 = vmin.f32 %v1496_v62, 6.0 }
 0x1af   : > { %3029 = vst [vmem:[%s3598_s17 + $0xa48] sm:$0xff] %v2517_v0  ;;  %v2009_v7 = vmin.f32 %v1497_v1, 6.0  ;;  %v1498_v8 = vmax.f32 %v986_v2, 0.0  ;;  %v1499_v9 = vmax.f32 %v987_v3, 0.0  ;;  %v476_v10 = vld [vmem:[%s3576_s24 + $0xa80] sm:$0xff]  ;;  %v477_v11 = vld [vmem:[%s3576_s24 + $0xa88] sm:$0xff] }
 0x1b0   : > { %3030 = vst [vmem:[%s3598_s17 + $0xa50] sm:$0xff] %v2518_v4  ;;  %v2520_v12 = vmul.f32 0.16666667, %v2008_v6  ;;  %v988_v13 = vadd.f32 3.0, %v476_v10  ;;  %v989_v14 = vadd.f32 3.0, %v477_v11  ;;  %v478_v15 = vld [vmem:[%s3576_s24 + $0xa90] sm:$0xff] }
 0x1b1   : > { %3031 = vst [vmem:[%s3598_s17 + $0xa58] sm:$0xff] %v2519_v5  ;;  %v2521_v16 = vmul.f32 0.16666667, %v2009_v7  ;;  %v2010_v17 = vmin.f32 %v1498_v8, 6.0  ;;  %v2011_v18 = vmin.f32 %v1499_v9, 6.0  ;;  %v990_v19 = vadd.f32 3.0, %v478_v15 }
 0x1b2   : > { %3032 = vst [vmem:[%s3598_s17 + $0xa60] sm:$0xff] %v2520_v12  ;;  %v1500_v20 = vmax.f32 %v988_v13, 0.0  ;;  %v1501_v21 = vmax.f32 %v989_v14, 0.0  ;;  %v479_v22 = vld [vmem:[%s3576_s24 + $0xa98] sm:$0xff]  ;;  %v480_v23 = vld [vmem:[%s3576_s24 + $0xaa0] sm:$0xff]  ;;  %v481_v24 = vld [vmem:[%s3576_s24 + $0xaa8] sm:$0xff] }
 0x1b3   : > { %3033 = vst [vmem:[%s3598_s17 + $0xa68] sm:$0xff] %v2521_v16  ;;  %v2522_v25 = vmul.f32 0.16666667, %v2010_v17  ;;  %v2523_v26 = vmul.f32 0.16666667, %v2011_v18  ;;  %v1502_v27 = vmax.f32 %v990_v19, 0.0 }
 0x1b4   : > { %v2012_v28 = vmin.f32 %v1500_v20, 6.0  ;;  %v2013_v29 = vmin.f32 %v1501_v21, 6.0  ;;  %v991_v30 = vadd.f32 3.0, %v479_v22  ;;  %v992_v31 = vadd.f32 3.0, %v480_v23  ;;  %v482_v32 = vld [vmem:[%s3576_s24 + $0xab0] sm:$0xff]  ;;  %v483_v33 = vld [vmem:[%s3576_s24 + $0xab8] sm:$0xff] }
 0x1b5   : > { %3034 = vst [vmem:[%s3598_s17 + $0xa70] sm:$0xff] %v2522_v25  ;;  %v2014_v34 = vmin.f32 %v1502_v27, 6.0  ;;  %v993_v35 = vadd.f32 3.0, %v481_v24  ;;  %v994_v36 = vadd.f32 3.0, %v482_v32  ;;  %v995_v37 = vadd.f32 3.0, %v483_v33  ;;  %v484_v38 = vld [vmem:[%s3576_s24 + $0xac0] sm:$0xff] }
 0x1b6   : > { %3035 = vst [vmem:[%s3598_s17 + $0xa78] sm:$0xff] %v2523_v26  ;;  %v2524_v39 = vmul.f32 0.16666667, %v2012_v28  ;;  %v2525_v40 = vmul.f32 0.16666667, %v2013_v29  ;;  %v1503_v41 = vmax.f32 %v991_v30, 0.0 }
 0x1b7   : > { %v2526_v42 = vmul.f32 0.16666667, %v2014_v34  ;;  %v1504_v43 = vmax.f32 %v992_v31, 0.0  ;;  %v1505_v44 = vmax.f32 %v993_v35, 0.0  ;;  %v1506_v45 = vmax.f32 %v994_v36, 0.0  ;;  %v485_v46 = vld [vmem:[%s3576_s24 + $0xac8] sm:$0xff] }
 0x1b8   : > { %3036 = vst [vmem:[%s3598_s17 + $0xa80] sm:$0xff] %v2524_v39  ;;  %v2015_v47 = vmin.f32 %v1503_v41, 6.0  ;;  %v1507_v48 = vmax.f32 %v995_v37, 0.0  ;;  %v996_v49 = vadd.f32 3.0, %v484_v38  ;;  %v997_v50 = vadd.f32 3.0, %v485_v46  ;;  %v486_v51 = vld [vmem:[%s3576_s24 + $0xad0] sm:$0xff] }
 0x1b9   : > { %3037 = vst [vmem:[%s3598_s17 + $0xa88] sm:$0xff] %v2525_v40  ;;  %v2016_v52 = vmin.f32 %v1504_v43, 6.0  ;;  %v2017_v53 = vmin.f32 %v1505_v44, 6.0  ;;  %v2018_v54 = vmin.f32 %v1506_v45, 6.0  ;;  %v998_v55 = vadd.f32 3.0, %v486_v51  ;;  %v487_v56 = vld [vmem:[%s3576_s24 + $0xad8] sm:$0xff] }
 0x1ba   : > { %3038 = vst [vmem:[%s3598_s17 + $0xa90] sm:$0xff] %v2526_v42  ;;  %v2527_v57 = vmul.f32 0.16666667, %v2015_v47  ;;  %v2019_v58 = vmin.f32 %v1507_v48, 6.0  ;;  %v1508_v59 = vmax.f32 %v996_v49, 0.0  ;;  %v1509_v60 = vmax.f32 %v997_v50, 0.0 }
 0x1bb   : > { %v2528_v61 = vmul.f32 0.16666667, %v2016_v52  ;;  %v2529_v62 = vmul.f32 0.16666667, %v2017_v53  ;;  %v2530_v63 = vmul.f32 0.16666667, %v2018_v54 }
 0x1bc   : > { %3039 = vst [vmem:[%s3598_s17 + $0xa98] sm:$0xff] %v2527_v57  ;;  %v2531_v0 = vmul.f32 0.16666667, %v2019_v58  ;;  %v2020_v1 = vmin.f32 %v1508_v59, 6.0  ;;  %v2021_v2 = vmin.f32 %v1509_v60, 6.0  ;;  %v1510_v3 = vmax.f32 %v998_v55, 0.0 }
 0x1bd   : > { %3040 = vst [vmem:[%s3598_s17 + $0xaa0] sm:$0xff] %v2528_v61  ;;  %v999_v4 = vadd.f32 3.0, %v487_v56  ;;  %v488_v5 = vld [vmem:[%s3576_s24 + $0xae0] sm:$0xff]  ;;  %v489_v6 = vld [vmem:[%s3576_s24 + $0xae8] sm:$0xff]  ;;  %v490_v7 = vld [vmem:[%s3576_s24 + $0xaf0] sm:$0xff]  ;;  %s3422_s11 = scalar_lea.hbm %s4645_s1, 8192 }
 0x1be   : > { %3041 = vst [vmem:[%s3598_s17 + $0xaa8] sm:$0xff] %v2529_v62  ;;  %v2532_v8 = vmul.f32 0.16666667, %v2020_v1  ;;  %v2533_v9 = vmul.f32 0.16666667, %v2021_v2  ;;  %v2022_v10 = vmin.f32 %v1510_v3, 6.0  ;;  %p3424_p1 = scmp.lt.s32.totalorder %s3422_s11, %s3418_s3 }
 0x1bf   : > { %3042 = vst [vmem:[%s3598_s17 + $0xab0] sm:$0xff] %v2530_v63  ;;  %v1511_v11 = vmax.f32 %v999_v4, 0.0  ;;  %v1000_v12 = vadd.f32 3.0, %v488_v5  ;;  %v1001_v13 = vadd.f32 3.0, %v489_v6  ;;  %v1002_v14 = vadd.f32 3.0, %v490_v7  ;;  %v491_v15 = vld [vmem:[%s3576_s24 + $0xaf8] sm:$0xff] }
 0x1c0   : > { %3043 = vst [vmem:[%s3598_s17 + $0xab8] sm:$0xff] %v2531_v0  ;;  %v2534_v16 = vmul.f32 0.16666667, %v2022_v10  ;;  %v1003_v17 = vadd.f32 3.0, %v491_v15  ;;  %v492_v18 = vld [vmem:[%s3576_s24 + $0xb00] sm:$0xff]  ;;  %v493_v19 = vld [vmem:[%s3576_s24 + $0xb08] sm:$0xff]  ;;  %p3425_p3 = por %p3424_p1, %p3423_p0 }
 0x1c1   : > { %3044 = vst [vmem:[%s3598_s17 + $0xac0] sm:$0xff] %v2532_v8  ;;  %v2023_v20 = vmin.f32 %v1511_v11, 6.0  ;;  %v1512_v21 = vmax.f32 %v1000_v12, 0.0  ;;  %v1513_v22 = vmax.f32 %v1001_v13, 0.0  ;;  %v1514_v23 = vmax.f32 %v1002_v14, 0.0  ;;  %v494_v24 = vld [vmem:[%s3576_s24 + $0xb10] sm:$0xff] }
 0x1c2   : > { %3045 = vst [vmem:[%s3598_s17 + $0xac8] sm:$0xff] %v2533_v9  ;;  %v1515_v25 = vmax.f32 %v1003_v17, 0.0  ;;  %v1004_v26 = vadd.f32 3.0, %v492_v18  ;;  %v1005_v27 = vadd.f32 3.0, %v493_v19  ;;  %v1006_v28 = vadd.f32 3.0, %v494_v24  ;;  %v495_v29 = vld [vmem:[%s3576_s24 + $0xb18] sm:$0xff]  ;;  %p3426_p4 = pnand %p3425_p3, %p3421_p13 }
 0x1c3   : > { %3046 = vst [vmem:[%s3598_s17 + $0xad0] sm:$0xff] %v2534_v16  ;;  %v2535_v30 = vmul.f32 0.16666667, %v2023_v20  ;;  %v2024_v31 = vmin.f32 %v1512_v21, 6.0  ;;  %v2025_v32 = vmin.f32 %v1513_v22, 6.0  ;;  %v2026_v33 = vmin.f32 %v1514_v23, 6.0 }
 0x1c4   : > { %v2027_v34 = vmin.f32 %v1515_v25, 6.0  ;;  %v1516_v35 = vmax.f32 %v1004_v26, 0.0  ;;  %v1517_v36 = vmax.f32 %v1005_v27, 0.0  ;;  %v1518_v37 = vmax.f32 %v1006_v28, 0.0  ;;  %v496_v38 = vld [vmem:[%s3576_s24 + $0xb20] sm:$0xff]  ;;  %v497_v39 = vld [vmem:[%s3576_s24 + $0xb28] sm:$0xff] }
 0x1c5   : > { %3047 = vst [vmem:[%s3598_s17 + $0xad8] sm:$0xff] %v2535_v30  ;;  %v2536_v40 = vmul.f32 0.16666667, %v2024_v31  ;;  %v2537_v41 = vmul.f32 0.16666667, %v2025_v32  ;;  %v1007_v42 = vadd.f32 3.0, %v495_v29 }
 0x1c6   : > { %v2538_v43 = vmul.f32 0.16666667, %v2026_v33  ;;  %v2539_v44 = vmul.f32 0.16666667, %v2027_v34  ;;  %v2028_v45 = vmin.f32 %v1516_v35, 6.0  ;;  %v2029_v46 = vmin.f32 %v1517_v36, 6.0 }
 0x1c7   : > { %3048 = vst [vmem:[%s3598_s17 + $0xae0] sm:$0xff] %v2536_v40  ;;  %v2030_v47 = vmin.f32 %v1518_v37, 6.0  ;;  %v1519_v48 = vmax.f32 %v1007_v42, 0.0  ;;  %v1008_v49 = vadd.f32 3.0, %v496_v38  ;;  %v1009_v50 = vadd.f32 3.0, %v497_v39  ;;  %v498_v51 = vld [vmem:[%s3576_s24 + $0xb30] sm:$0xff] }
 0x1c8   : > { %3049 = vst [vmem:[%s3598_s17 + $0xae8] sm:$0xff] %v2537_v41  ;;  %v2540_v52 = vmul.f32 0.16666667, %v2028_v45  ;;  %v2541_v53 = vmul.f32 0.16666667, %v2029_v46  ;;  %v1010_v54 = vadd.f32 3.0, %v498_v51 }
 0x1c9   : > { %3050 = vst [vmem:[%s3598_s17 + $0xaf0] sm:$0xff] %v2538_v43  ;;  %v2542_v55 = vmul.f32 0.16666667, %v2030_v47  ;;  %v2031_v56 = vmin.f32 %v1519_v48, 6.0  ;;  %v1520_v57 = vmax.f32 %v1008_v49, 0.0  ;;  %v1521_v58 = vmax.f32 %v1009_v50, 0.0 }
 0x1ca   : > { %3051 = vst [vmem:[%s3598_s17 + $0xaf8] sm:$0xff] %v2539_v44  ;;  %v1522_v59 = vmax.f32 %v1010_v54, 0.0  ;;  %v499_v60 = vld [vmem:[%s3576_s24 + $0xb38] sm:$0xff]  ;;  %v500_v61 = vld [vmem:[%s3576_s24 + $0xb40] sm:$0xff]  ;;  %v501_v62 = vld [vmem:[%s3576_s24 + $0xb48] sm:$0xff] }
 0x1cb   : > { %3052 = vst [vmem:[%s3598_s17 + $0xb00] sm:$0xff] %v2540_v52  ;;  %v2543_v63 = vmul.f32 0.16666667, %v2031_v56  ;;  %v2032_v0 = vmin.f32 %v1520_v57, 6.0  ;;  %v2033_v1 = vmin.f32 %v1521_v58, 6.0  ;;  %v1011_v2 = vadd.f32 3.0, %v499_v60 }
 0x1cc   : > { %3053 = vst [vmem:[%s3598_s17 + $0xb08] sm:$0xff] %v2541_v53  ;;  %v2034_v3 = vmin.f32 %v1522_v59, 6.0  ;;  %v1012_v4 = vadd.f32 3.0, %v500_v61  ;;  %v1013_v5 = vadd.f32 3.0, %v501_v62  ;;  %v502_v6 = vld [vmem:[%s3576_s24 + $0xb50] sm:$0xff]  ;;  %v503_v7 = vld [vmem:[%s3576_s24 + $0xb58] sm:$0xff] }
 0x1cd   : > { %3054 = vst [vmem:[%s3598_s17 + $0xb10] sm:$0xff] %v2542_v55  ;;  %v2544_v8 = vmul.f32 0.16666667, %v2032_v0  ;;  %v2545_v9 = vmul.f32 0.16666667, %v2033_v1  ;;  %v1523_v10 = vmax.f32 %v1011_v2, 0.0 }
 0x1ce   : > { %3055 = vst [vmem:[%s3598_s17 + $0xb18] sm:$0xff] %v2543_v63  ;;  %v2546_v11 = vmul.f32 0.16666667, %v2034_v3  ;;  %v1524_v12 = vmax.f32 %v1012_v4, 0.0  ;;  %v1525_v13 = vmax.f32 %v1013_v5, 0.0  ;;  %v1014_v14 = vadd.f32 3.0, %v502_v6 }
 0x1cf   : > { %3056 = vst [vmem:[%s3598_s17 + $0xb20] sm:$0xff] %v2544_v8  ;;  %v2035_v15 = vmin.f32 %v1523_v10, 6.0  ;;  %v1015_v16 = vadd.f32 3.0, %v503_v7  ;;  %v504_v17 = vld [vmem:[%s3576_s24 + $0xb60] sm:$0xff]  ;;  %v505_v18 = vld [vmem:[%s3576_s24 + $0xb68] sm:$0xff]  ;;  %v506_v19 = vld [vmem:[%s3576_s24 + $0xb70] sm:$0xff] }
 0x1d0   : > { %3057 = vst [vmem:[%s3598_s17 + $0xb28] sm:$0xff] %v2545_v9  ;;  %v2036_v20 = vmin.f32 %v1524_v12, 6.0  ;;  %v2037_v21 = vmin.f32 %v1525_v13, 6.0  ;;  %v1526_v22 = vmax.f32 %v1014_v14, 0.0  ;;  %v1016_v23 = vadd.f32 3.0, %v504_v17  ;;  %v507_v24 = vld [vmem:[%s3576_s24 + $0xb78] sm:$0xff] }
 0x1d1   : > { %3058 = vst [vmem:[%s3598_s17 + $0xb30] sm:$0xff] %v2546_v11  ;;  %v2547_v25 = vmul.f32 0.16666667, %v2035_v15  ;;  %v1527_v26 = vmax.f32 %v1015_v16, 0.0  ;;  %v1017_v27 = vadd.f32 3.0, %v505_v18  ;;  %v1018_v28 = vadd.f32 3.0, %v506_v19 }
 0x1d2   : > { %v2548_v29 = vmul.f32 0.16666667, %v2036_v20  ;;  %v2549_v30 = vmul.f32 0.16666667, %v2037_v21  ;;  %v2038_v31 = vmin.f32 %v1526_v22, 6.0  ;;  %v1528_v32 = vmax.f32 %v1016_v23, 0.0 }
 0x1d3   : > { %3059 = vst [vmem:[%s3598_s17 + $0xb38] sm:$0xff] %v2547_v25  ;;  %v2039_v33 = vmin.f32 %v1527_v26, 6.0  ;;  %v1529_v34 = vmax.f32 %v1017_v27, 0.0  ;;  %v1530_v35 = vmax.f32 %v1018_v28, 0.0  ;;  %v1019_v36 = vadd.f32 3.0, %v507_v24  ;;  %v508_v37 = vld [vmem:[%s3576_s24 + $0xb80] sm:$0xff] }
 0x1d4   : > { %3060 = vst [vmem:[%s3598_s17 + $0xb40] sm:$0xff] %v2548_v29  ;;  %v2550_v38 = vmul.f32 0.16666667, %v2038_v31  ;;  %v2040_v39 = vmin.f32 %v1528_v32, 6.0  ;;  %v1020_v40 = vadd.f32 3.0, %v508_v37  ;;  %v509_v41 = vld [vmem:[%s3576_s24 + $0xb88] sm:$0xff] }
 0x1d5   : > { %3061 = vst [vmem:[%s3598_s17 + $0xb48] sm:$0xff] %v2549_v30  ;;  %v2551_v42 = vmul.f32 0.16666667, %v2039_v33  ;;  %v2041_v43 = vmin.f32 %v1529_v34, 6.0  ;;  %v2042_v44 = vmin.f32 %v1530_v35, 6.0  ;;  %v1531_v45 = vmax.f32 %v1019_v36, 0.0 }
 0x1d6   : > { %3062 = vst [vmem:[%s3598_s17 + $0xb50] sm:$0xff] %v2550_v38  ;;  %v2552_v46 = vmul.f32 0.16666667, %v2040_v39  ;;  %v1532_v47 = vmax.f32 %v1020_v40, 0.0  ;;  %v1021_v48 = vadd.f32 3.0, %v509_v41  ;;  %v510_v49 = vld [vmem:[%s3576_s24 + $0xb90] sm:$0xff] }
 0x1d7   : > { %3063 = vst [vmem:[%s3598_s17 + $0xb58] sm:$0xff] %v2551_v42  ;;  %v2553_v50 = vmul.f32 0.16666667, %v2041_v43  ;;  %v2554_v51 = vmul.f32 0.16666667, %v2042_v44  ;;  %v2043_v52 = vmin.f32 %v1531_v45, 6.0 }
 0x1d8   : > { %3064 = vst [vmem:[%s3598_s17 + $0xb60] sm:$0xff] %v2552_v46  ;;  %v2044_v53 = vmin.f32 %v1532_v47, 6.0  ;;  %v1533_v54 = vmax.f32 %v1021_v48, 0.0  ;;  %v1022_v55 = vadd.f32 3.0, %v510_v49  ;;  %v511_v56 = vld [vmem:[%s3576_s24 + $0xb98] sm:$0xff]  ;;  %v512_v57 = vld [vmem:[%s3576_s24 + $0xba0] sm:$0xff] }
 0x1d9   : > { %3065 = vst [vmem:[%s3598_s17 + $0xb68] sm:$0xff] %v2553_v50  ;;  %v2555_v58 = vmul.f32 0.16666667, %v2043_v52  ;;  %v1023_v59 = vadd.f32 3.0, %v511_v56  ;;  %v1024_v60 = vadd.f32 3.0, %v512_v57  ;;  %v513_v61 = vld [vmem:[%s3576_s24 + $0xba8] sm:$0xff] }
 0x1da   : > { %3066 = vst [vmem:[%s3598_s17 + $0xb70] sm:$0xff] %v2554_v51  ;;  %v2556_v62 = vmul.f32 0.16666667, %v2044_v53  ;;  %v2045_v63 = vmin.f32 %v1533_v54, 6.0  ;;  %v1534_v0 = vmax.f32 %v1022_v55, 0.0  ;;  %v1025_v1 = vadd.f32 3.0, %v513_v61 }
 0x1db   : > { %3067 = vst [vmem:[%s3598_s17 + $0xb78] sm:$0xff] %v2555_v58  ;;  %v1535_v2 = vmax.f32 %v1023_v59, 0.0  ;;  %v1536_v3 = vmax.f32 %v1024_v60, 0.0  ;;  %v514_v4 = vld [vmem:[%s3576_s24 + $0xbb0] sm:$0xff]  ;;  %v515_v5 = vld [vmem:[%s3576_s24 + $0xbb8] sm:$0xff]  ;;  %v516_v6 = vld [vmem:[%s3576_s24 + $0xbc0] sm:$0xff] }
 0x1dc   : > { %3068 = vst [vmem:[%s3598_s17 + $0xb80] sm:$0xff] %v2556_v62  ;;  %v2557_v7 = vmul.f32 0.16666667, %v2045_v63  ;;  %v2046_v8 = vmin.f32 %v1534_v0, 6.0  ;;  %v1537_v9 = vmax.f32 %v1025_v1, 0.0  ;;  %v1026_v10 = vadd.f32 3.0, %v514_v4 }
 0x1dd   : > { %v2047_v11 = vmin.f32 %v1535_v2, 6.0  ;;  %v2048_v12 = vmin.f32 %v1536_v3, 6.0  ;;  %v1027_v13 = vadd.f32 3.0, %v515_v5  ;;  %v1028_v14 = vadd.f32 3.0, %v516_v6  ;;  %v517_v15 = vld [vmem:[%s3576_s24 + $0xbc8] sm:$0xff]  ;;  %v518_v16 = vld [vmem:[%s3576_s24 + $0xbd0] sm:$0xff] }
 0x1de   : > { %3069 = vst [vmem:[%s3598_s17 + $0xb88] sm:$0xff] %v2557_v7  ;;  %v2558_v17 = vmul.f32 0.16666667, %v2046_v8  ;;  %v2049_v18 = vmin.f32 %v1537_v9, 6.0  ;;  %v1538_v19 = vmax.f32 %v1026_v10, 0.0  ;;  %v1029_v20 = vadd.f32 3.0, %v517_v15 }
 0x1df   : > { %v2559_v21 = vmul.f32 0.16666667, %v2047_v11  ;;  %v2560_v22 = vmul.f32 0.16666667, %v2048_v12  ;;  %v1539_v23 = vmax.f32 %v1027_v13, 0.0  ;;  %v1540_v24 = vmax.f32 %v1028_v14, 0.0 }
 0x1e0   : > { %3070 = vst [vmem:[%s3598_s17 + $0xb90] sm:$0xff] %v2558_v17  ;;  %v2561_v25 = vmul.f32 0.16666667, %v2049_v18  ;;  %v2050_v26 = vmin.f32 %v1538_v19, 6.0  ;;  %v1541_v27 = vmax.f32 %v1029_v20, 0.0  ;;  %v1030_v28 = vadd.f32 3.0, %v518_v16 }
 0x1e1   : > { %3071 = vst [vmem:[%s3598_s17 + $0xb98] sm:$0xff] %v2559_v21  ;;  %v2051_v29 = vmin.f32 %v1539_v23, 6.0  ;;  %v2052_v30 = vmin.f32 %v1540_v24, 6.0  ;;  %v519_v31 = vld [vmem:[%s3576_s24 + $0xbd8] sm:$0xff]  ;;  %v520_v32 = vld [vmem:[%s3576_s24 + $0xbe0] sm:$0xff]  ;;  %v521_v33 = vld [vmem:[%s3576_s24 + $0xbe8] sm:$0xff] }
 0x1e2   : > { %3072 = vst [vmem:[%s3598_s17 + $0xba0] sm:$0xff] %v2560_v22  ;;  %v2562_v34 = vmul.f32 0.16666667, %v2050_v26  ;;  %v2053_v35 = vmin.f32 %v1541_v27, 6.0  ;;  %v1542_v36 = vmax.f32 %v1030_v28, 0.0  ;;  %v1031_v37 = vadd.f32 3.0, %v519_v31 }
 0x1e3   : > { %3073 = vst [vmem:[%s3598_s17 + $0xba8] sm:$0xff] %v2561_v25  ;;  %v2563_v38 = vmul.f32 0.16666667, %v2051_v29  ;;  %v2564_v39 = vmul.f32 0.16666667, %v2052_v30  ;;  %v1032_v40 = vadd.f32 3.0, %v520_v32 }
 0x1e4   : > { %3074 = vst [vmem:[%s3598_s17 + $0xbb0] sm:$0xff] %v2562_v34  ;;  %v2565_v41 = vmul.f32 0.16666667, %v2053_v35  ;;  %v2054_v42 = vmin.f32 %v1542_v36, 6.0  ;;  %v1543_v43 = vmax.f32 %v1031_v37, 0.0  ;;  %v1033_v44 = vadd.f32 3.0, %v521_v33 }
 0x1e5   : > { %3075 = vst [vmem:[%s3598_s17 + $0xbb8] sm:$0xff] %v2563_v38  ;;  %v1544_v45 = vmax.f32 %v1032_v40, 0.0  ;;  %v522_v46 = vld [vmem:[%s3576_s24 + $0xbf0] sm:$0xff]  ;;  %v523_v47 = vld [vmem:[%s3576_s24 + $0xbf8] sm:$0xff]  ;;  %v524_v48 = vld [vmem:[%s3576_s24 + $0xc00] sm:$0xff] }
 0x1e6   : > { %3076 = vst [vmem:[%s3598_s17 + $0xbc0] sm:$0xff] %v2564_v39  ;;  %v2566_v49 = vmul.f32 0.16666667, %v2054_v42  ;;  %v2055_v50 = vmin.f32 %v1543_v43, 6.0  ;;  %v1545_v51 = vmax.f32 %v1033_v44, 0.0  ;;  %v1034_v52 = vadd.f32 3.0, %v522_v46 }
 0x1e7   : > { %3077 = vst [vmem:[%s3598_s17 + $0xbc8] sm:$0xff] %v2565_v41  ;;  %v2056_v53 = vmin.f32 %v1544_v45, 6.0  ;;  %v1035_v54 = vadd.f32 3.0, %v523_v47  ;;  %v1036_v55 = vadd.f32 3.0, %v524_v48  ;;  %v525_v56 = vld [vmem:[%s3576_s24 + $0xc08] sm:$0xff]  ;;  %v526_v57 = vld [vmem:[%s3576_s24 + $0xc10] sm:$0xff] }
 0x1e8   : > { %3078 = vst [vmem:[%s3598_s17 + $0xbd0] sm:$0xff] %v2566_v49  ;;  %v2567_v58 = vmul.f32 0.16666667, %v2055_v50  ;;  %v2057_v59 = vmin.f32 %v1545_v51, 6.0  ;;  %v1546_v60 = vmax.f32 %v1034_v52, 0.0  ;;  %v1037_v61 = vadd.f32 3.0, %v525_v56 }
 0x1e9   : > { %v2568_v62 = vmul.f32 0.16666667, %v2056_v53  ;;  %v1547_v63 = vmax.f32 %v1035_v54, 0.0  ;;  %v1548_v0 = vmax.f32 %v1036_v55, 0.0  ;;  %v1038_v1 = vadd.f32 3.0, %v526_v57  ;;  %v527_v2 = vld [vmem:[%s3576_s24 + $0xc18] sm:$0xff] }
 0x1ea   : > { %3079 = vst [vmem:[%s3598_s17 + $0xbd8] sm:$0xff] %v2567_v58  ;;  %v2569_v3 = vmul.f32 0.16666667, %v2057_v59  ;;  %v2058_v4 = vmin.f32 %v1546_v60, 6.0  ;;  %v1549_v5 = vmax.f32 %v1037_v61, 0.0  ;;  %v1039_v6 = vadd.f32 3.0, %v527_v2 }
 0x1eb   : > { %3080 = vst [vmem:[%s3598_s17 + $0xbe0] sm:$0xff] %v2568_v62  ;;  %v2059_v7 = vmin.f32 %v1547_v63, 6.0  ;;  %v2060_v8 = vmin.f32 %v1548_v0, 6.0  ;;  %v1550_v9 = vmax.f32 %v1038_v1, 0.0  ;;  %v528_v10 = vld [vmem:[%s3576_s24 + $0xc20] sm:$0xff]  ;;  %v529_v11 = vld [vmem:[%s3576_s24 + $0xc28] sm:$0xff] }
 0x1ec   : > { %3081 = vst [vmem:[%s3598_s17 + $0xbe8] sm:$0xff] %v2569_v3  ;;  %v2570_v12 = vmul.f32 0.16666667, %v2058_v4  ;;  %v2061_v13 = vmin.f32 %v1549_v5, 6.0  ;;  %v1551_v14 = vmax.f32 %v1039_v6, 0.0  ;;  %v1040_v15 = vadd.f32 3.0, %v528_v10 }
 0x1ed   : > { %v2571_v16 = vmul.f32 0.16666667, %v2059_v7  ;;  %v2572_v17 = vmul.f32 0.16666667, %v2060_v8  ;;  %v2062_v18 = vmin.f32 %v1550_v9, 6.0  ;;  %v1041_v19 = vadd.f32 3.0, %v529_v11 }
 0x1ee   : > { %3082 = vst [vmem:[%s3598_s17 + $0xbf0] sm:$0xff] %v2570_v12  ;;  %v2573_v20 = vmul.f32 0.16666667, %v2061_v13  ;;  %v2063_v21 = vmin.f32 %v1551_v14, 6.0  ;;  %v1552_v22 = vmax.f32 %v1040_v15, 0.0  ;;  %v530_v23 = vld [vmem:[%s3576_s24 + $0xc30] sm:$0xff] }
 0x1ef   : > { %3083 = vst [vmem:[%s3598_s17 + $0xbf8] sm:$0xff] %v2571_v16  ;;  %v2574_v24 = vmul.f32 0.16666667, %v2062_v18  ;;  %v1553_v25 = vmax.f32 %v1041_v19, 0.0  ;;  %v1042_v26 = vadd.f32 3.0, %v530_v23  ;;  %v531_v27 = vld [vmem:[%s3576_s24 + $0xc38] sm:$0xff] }
 0x1f0   : > { %3084 = vst [vmem:[%s3598_s17 + $0xc00] sm:$0xff] %v2572_v17  ;;  %v2575_v28 = vmul.f32 0.16666667, %v2063_v21  ;;  %v2064_v29 = vmin.f32 %v1552_v22, 6.0  ;;  %v1043_v30 = vadd.f32 3.0, %v531_v27  ;;  %v532_v31 = vld [vmem:[%s3576_s24 + $0xc40] sm:$0xff] }
 0x1f1   : > { %3085 = vst [vmem:[%s3598_s17 + $0xc08] sm:$0xff] %v2573_v20  ;;  %v2065_v32 = vmin.f32 %v1553_v25, 6.0  ;;  %v1554_v33 = vmax.f32 %v1042_v26, 0.0  ;;  %v1044_v34 = vadd.f32 3.0, %v532_v31  ;;  %v533_v35 = vld [vmem:[%s3576_s24 + $0xc48] sm:$0xff]  ;;  %v534_v36 = vld [vmem:[%s3576_s24 + $0xc50] sm:$0xff] }
 0x1f2   : > { %3086 = vst [vmem:[%s3598_s17 + $0xc10] sm:$0xff] %v2574_v24  ;;  %v2576_v37 = vmul.f32 0.16666667, %v2064_v29  ;;  %v1555_v38 = vmax.f32 %v1043_v30, 0.0  ;;  %v1045_v39 = vadd.f32 3.0, %v533_v35  ;;  %v1046_v40 = vadd.f32 3.0, %v534_v36 }
 0x1f3   : > { %3087 = vst [vmem:[%s3598_s17 + $0xc18] sm:$0xff] %v2575_v28  ;;  %v2577_v41 = vmul.f32 0.16666667, %v2065_v32  ;;  %v2066_v42 = vmin.f32 %v1554_v33, 6.0  ;;  %v1556_v43 = vmax.f32 %v1044_v34, 0.0  ;;  %v535_v44 = vld [vmem:[%s3576_s24 + $0xc58] sm:$0xff] }
 0x1f4   : > { %3088 = vst [vmem:[%s3598_s17 + $0xc20] sm:$0xff] %v2576_v37  ;;  %v2067_v45 = vmin.f32 %v1555_v38, 6.0  ;;  %v1557_v46 = vmax.f32 %v1045_v39, 0.0  ;;  %v1558_v47 = vmax.f32 %v1046_v40, 0.0  ;;  %v1047_v48 = vadd.f32 3.0, %v535_v44  ;;  %v536_v49 = vld [vmem:[%s3576_s24 + $0xc60] sm:$0xff] }
 0x1f5   : > { %3089 = vst [vmem:[%s3598_s17 + $0xc28] sm:$0xff] %v2577_v41  ;;  %v2578_v50 = vmul.f32 0.16666667, %v2066_v42  ;;  %v2068_v51 = vmin.f32 %v1556_v43, 6.0  ;;  %v1048_v52 = vadd.f32 3.0, %v536_v49  ;;  %v537_v53 = vld [vmem:[%s3576_s24 + $0xc68] sm:$0xff] }
 0x1f6   : > { %v2579_v54 = vmul.f32 0.16666667, %v2067_v45  ;;  %v2069_v55 = vmin.f32 %v1557_v46, 6.0  ;;  %v2070_v56 = vmin.f32 %v1558_v47, 6.0  ;;  %v1559_v57 = vmax.f32 %v1047_v48, 0.0  ;;  %v538_v58 = vld [vmem:[%s3576_s24 + $0xc70] sm:$0xff] }
 0x1f7   : > { %3090 = vst [vmem:[%s3598_s17 + $0xc30] sm:$0xff] %v2578_v50  ;;  %v2580_v59 = vmul.f32 0.16666667, %v2068_v51  ;;  %v1560_v60 = vmax.f32 %v1048_v52, 0.0  ;;  %v1049_v61 = vadd.f32 3.0, %v537_v53  ;;  %v1050_v62 = vadd.f32 3.0, %v538_v58 }
 0x1f8   : > { %3091 = vst [vmem:[%s3598_s17 + $0xc38] sm:$0xff] %v2579_v54  ;;  %v2581_v63 = vmul.f32 0.16666667, %v2069_v55  ;;  %v2582_v0 = vmul.f32 0.16666667, %v2070_v56  ;;  %v2071_v1 = vmin.f32 %v1559_v57, 6.0 }
 0x1f9   : > { %3092 = vst [vmem:[%s3598_s17 + $0xc40] sm:$0xff] %v2580_v59  ;;  %v2072_v2 = vmin.f32 %v1560_v60, 6.0  ;;  %v1561_v3 = vmax.f32 %v1049_v61, 0.0  ;;  %v1562_v4 = vmax.f32 %v1050_v62, 0.0  ;;  %v539_v5 = vld [vmem:[%s3576_s24 + $0xc78] sm:$0xff]  ;;  %v540_v6 = vld [vmem:[%s3576_s24 + $0xc80] sm:$0xff] }
 0x1fa   : > { %3093 = vst [vmem:[%s3598_s17 + $0xc48] sm:$0xff] %v2581_v63  ;;  %v2583_v7 = vmul.f32 0.16666667, %v2071_v1  ;;  %v1051_v8 = vadd.f32 3.0, %v539_v5  ;;  %v1052_v9 = vadd.f32 3.0, %v540_v6  ;;  %v541_v10 = vld [vmem:[%s3576_s24 + $0xc88] sm:$0xff] }
 0x1fb   : > { %3094 = vst [vmem:[%s3598_s17 + $0xc50] sm:$0xff] %v2582_v0  ;;  %v2584_v11 = vmul.f32 0.16666667, %v2072_v2  ;;  %v2073_v12 = vmin.f32 %v1561_v3, 6.0  ;;  %v2074_v13 = vmin.f32 %v1562_v4, 6.0  ;;  %v1053_v14 = vadd.f32 3.0, %v541_v10 }
 0x1fc   : > { %3095 = vst [vmem:[%s3598_s17 + $0xc58] sm:$0xff] %v2583_v7  ;;  %v1563_v15 = vmax.f32 %v1051_v8, 0.0  ;;  %v1564_v16 = vmax.f32 %v1052_v9, 0.0  ;;  %v542_v17 = vld [vmem:[%s3576_s24 + $0xc90] sm:$0xff]  ;;  %v543_v18 = vld [vmem:[%s3576_s24 + $0xc98] sm:$0xff]  ;;  %v544_v19 = vld [vmem:[%s3576_s24 + $0xca0] sm:$0xff] }
 0x1fd   : > { %3096 = vst [vmem:[%s3598_s17 + $0xc60] sm:$0xff] %v2584_v11  ;;  %v2585_v20 = vmul.f32 0.16666667, %v2073_v12  ;;  %v2586_v21 = vmul.f32 0.16666667, %v2074_v13  ;;  %v1565_v22 = vmax.f32 %v1053_v14, 0.0 }
 0x1fe   : > { %v2075_v23 = vmin.f32 %v1563_v15, 6.0  ;;  %v2076_v24 = vmin.f32 %v1564_v16, 6.0  ;;  %v1054_v25 = vadd.f32 3.0, %v542_v17  ;;  %v1055_v26 = vadd.f32 3.0, %v543_v18  ;;  %v545_v27 = vld [vmem:[%s3576_s24 + $0xca8] sm:$0xff]  ;;  %v546_v28 = vld [vmem:[%s3576_s24 + $0xcb0] sm:$0xff] }
 0x1ff   : > { %3097 = vst [vmem:[%s3598_s17 + $0xc68] sm:$0xff] %v2585_v20  ;;  %v2077_v29 = vmin.f32 %v1565_v22, 6.0  ;;  %v1056_v30 = vadd.f32 3.0, %v544_v19  ;;  %v1057_v31 = vadd.f32 3.0, %v545_v27  ;;  %v1058_v32 = vadd.f32 3.0, %v546_v28  ;;  %v547_v33 = vld [vmem:[%s3576_s24 + $0xcb8] sm:$0xff] }
 0x200   : > { %3098 = vst [vmem:[%s3598_s17 + $0xc70] sm:$0xff] %v2586_v21  ;;  %v2587_v34 = vmul.f32 0.16666667, %v2075_v23  ;;  %v2588_v35 = vmul.f32 0.16666667, %v2076_v24  ;;  %v1566_v36 = vmax.f32 %v1054_v25, 0.0 }
 0x201   : > { %v2589_v37 = vmul.f32 0.16666667, %v2077_v29  ;;  %v1567_v38 = vmax.f32 %v1055_v26, 0.0  ;;  %v1568_v39 = vmax.f32 %v1056_v30, 0.0  ;;  %v1569_v40 = vmax.f32 %v1057_v31, 0.0  ;;  %v548_v41 = vld [vmem:[%s3576_s24 + $0xcc0] sm:$0xff] }
 0x202   : > { %3099 = vst [vmem:[%s3598_s17 + $0xc78] sm:$0xff] %v2587_v34  ;;  %v2078_v42 = vmin.f32 %v1566_v36, 6.0  ;;  %v1570_v43 = vmax.f32 %v1058_v32, 0.0  ;;  %v1059_v44 = vadd.f32 3.0, %v547_v33  ;;  %v1060_v45 = vadd.f32 3.0, %v548_v41  ;;  %v549_v46 = vld [vmem:[%s3576_s24 + $0xcc8] sm:$0xff] }
 0x203   : > { %3100 = vst [vmem:[%s3598_s17 + $0xc80] sm:$0xff] %v2588_v35  ;;  %v2079_v47 = vmin.f32 %v1567_v38, 6.0  ;;  %v2080_v48 = vmin.f32 %v1568_v39, 6.0  ;;  %v2081_v49 = vmin.f32 %v1569_v40, 6.0  ;;  %v1061_v50 = vadd.f32 3.0, %v549_v46  ;;  %v550_v51 = vld [vmem:[%s3576_s24 + $0xcd0] sm:$0xff] }
 0x204   : > { %3101 = vst [vmem:[%s3598_s17 + $0xc88] sm:$0xff] %v2589_v37  ;;  %v2590_v52 = vmul.f32 0.16666667, %v2078_v42  ;;  %v2082_v53 = vmin.f32 %v1570_v43, 6.0  ;;  %v1571_v54 = vmax.f32 %v1059_v44, 0.0  ;;  %v1572_v55 = vmax.f32 %v1060_v45, 0.0 }
 0x205   : > { %v2591_v56 = vmul.f32 0.16666667, %v2079_v47  ;;  %v2592_v57 = vmul.f32 0.16666667, %v2080_v48  ;;  %v2593_v58 = vmul.f32 0.16666667, %v2081_v49 }
 0x206   : > { %3102 = vst [vmem:[%s3598_s17 + $0xc90] sm:$0xff] %v2590_v52  ;;  %v2594_v59 = vmul.f32 0.16666667, %v2082_v53  ;;  %v2083_v60 = vmin.f32 %v1571_v54, 6.0  ;;  %v2084_v61 = vmin.f32 %v1572_v55, 6.0  ;;  %v1573_v62 = vmax.f32 %v1061_v50, 0.0 }
 0x207   : > { %3103 = vst [vmem:[%s3598_s17 + $0xc98] sm:$0xff] %v2591_v56  ;;  %v1062_v63 = vadd.f32 3.0, %v550_v51  ;;  %v551_v0 = vld [vmem:[%s3576_s24 + $0xcd8] sm:$0xff]  ;;  %v552_v1 = vld [vmem:[%s3576_s24 + $0xce0] sm:$0xff]  ;;  %v553_v2 = vld [vmem:[%s3576_s24 + $0xce8] sm:$0xff] }
 0x208   : > { %3104 = vst [vmem:[%s3598_s17 + $0xca0] sm:$0xff] %v2592_v57  ;;  %v2595_v3 = vmul.f32 0.16666667, %v2083_v60  ;;  %v2596_v4 = vmul.f32 0.16666667, %v2084_v61  ;;  %v2085_v5 = vmin.f32 %v1573_v62, 6.0 }
 0x209   : > { %3105 = vst [vmem:[%s3598_s17 + $0xca8] sm:$0xff] %v2593_v58  ;;  %v1574_v6 = vmax.f32 %v1062_v63, 0.0  ;;  %v1063_v7 = vadd.f32 3.0, %v551_v0  ;;  %v1064_v8 = vadd.f32 3.0, %v552_v1  ;;  %v1065_v9 = vadd.f32 3.0, %v553_v2  ;;  %v554_v10 = vld [vmem:[%s3576_s24 + $0xcf0] sm:$0xff] }
 0x20a   : > { %3106 = vst [vmem:[%s3598_s17 + $0xcb0] sm:$0xff] %v2594_v59  ;;  %v2597_v11 = vmul.f32 0.16666667, %v2085_v5  ;;  %v1066_v12 = vadd.f32 3.0, %v554_v10  ;;  %v555_v13 = vld [vmem:[%s3576_s24 + $0xcf8] sm:$0xff]  ;;  %v556_v14 = vld [vmem:[%s3576_s24 + $0xd00] sm:$0xff] }
 0x20b   : > { %3107 = vst [vmem:[%s3598_s17 + $0xcb8] sm:$0xff] %v2595_v3  ;;  %v2086_v15 = vmin.f32 %v1574_v6, 6.0  ;;  %v1575_v16 = vmax.f32 %v1063_v7, 0.0  ;;  %v1576_v17 = vmax.f32 %v1064_v8, 0.0  ;;  %v1577_v18 = vmax.f32 %v1065_v9, 0.0  ;;  %v557_v19 = vld [vmem:[%s3576_s24 + $0xd08] sm:$0xff] }
 0x20c   : > { %3108 = vst [vmem:[%s3598_s17 + $0xcc0] sm:$0xff] %v2596_v4  ;;  %v1578_v20 = vmax.f32 %v1066_v12, 0.0  ;;  %v1067_v21 = vadd.f32 3.0, %v555_v13  ;;  %v1068_v22 = vadd.f32 3.0, %v556_v14  ;;  %v1069_v23 = vadd.f32 3.0, %v557_v19  ;;  %v558_v24 = vld [vmem:[%s3576_s24 + $0xd10] sm:$0xff] }
 0x20d   : > { %3109 = vst [vmem:[%s3598_s17 + $0xcc8] sm:$0xff] %v2597_v11  ;;  %v2598_v25 = vmul.f32 0.16666667, %v2086_v15  ;;  %v2087_v26 = vmin.f32 %v1575_v16, 6.0  ;;  %v2088_v27 = vmin.f32 %v1576_v17, 6.0  ;;  %v2089_v28 = vmin.f32 %v1577_v18, 6.0 }
 0x20e   : > { %v2090_v29 = vmin.f32 %v1578_v20, 6.0  ;;  %v1579_v30 = vmax.f32 %v1067_v21, 0.0  ;;  %v1580_v31 = vmax.f32 %v1068_v22, 0.0  ;;  %v1581_v32 = vmax.f32 %v1069_v23, 0.0  ;;  %v559_v33 = vld [vmem:[%s3576_s24 + $0xd18] sm:$0xff]  ;;  %v560_v34 = vld [vmem:[%s3576_s24 + $0xd20] sm:$0xff] }
 0x20f   : > { %3110 = vst [vmem:[%s3598_s17 + $0xcd0] sm:$0xff] %v2598_v25  ;;  %v2599_v35 = vmul.f32 0.16666667, %v2087_v26  ;;  %v2600_v36 = vmul.f32 0.16666667, %v2088_v27  ;;  %v1070_v37 = vadd.f32 3.0, %v558_v24 }
 0x210   : > { %v2601_v38 = vmul.f32 0.16666667, %v2089_v28  ;;  %v2602_v39 = vmul.f32 0.16666667, %v2090_v29  ;;  %v2091_v40 = vmin.f32 %v1579_v30, 6.0  ;;  %v2092_v41 = vmin.f32 %v1580_v31, 6.0 }
 0x211   : > { %3111 = vst [vmem:[%s3598_s17 + $0xcd8] sm:$0xff] %v2599_v35  ;;  %v2093_v42 = vmin.f32 %v1581_v32, 6.0  ;;  %v1582_v43 = vmax.f32 %v1070_v37, 0.0  ;;  %v1071_v44 = vadd.f32 3.0, %v559_v33  ;;  %v1072_v45 = vadd.f32 3.0, %v560_v34  ;;  %v561_v46 = vld [vmem:[%s3576_s24 + $0xd28] sm:$0xff] }
 0x212   : > { %3112 = vst [vmem:[%s3598_s17 + $0xce0] sm:$0xff] %v2600_v36  ;;  %v2603_v47 = vmul.f32 0.16666667, %v2091_v40  ;;  %v2604_v48 = vmul.f32 0.16666667, %v2092_v41  ;;  %v1073_v49 = vadd.f32 3.0, %v561_v46 }
 0x213   : > { %3113 = vst [vmem:[%s3598_s17 + $0xce8] sm:$0xff] %v2601_v38  ;;  %v2605_v50 = vmul.f32 0.16666667, %v2093_v42  ;;  %v2094_v51 = vmin.f32 %v1582_v43, 6.0  ;;  %v1583_v52 = vmax.f32 %v1071_v44, 0.0  ;;  %v1584_v53 = vmax.f32 %v1072_v45, 0.0 }
 0x214   : > { %3114 = vst [vmem:[%s3598_s17 + $0xcf0] sm:$0xff] %v2602_v39  ;;  %v1585_v54 = vmax.f32 %v1073_v49, 0.0  ;;  %v562_v55 = vld [vmem:[%s3576_s24 + $0xd30] sm:$0xff]  ;;  %v563_v56 = vld [vmem:[%s3576_s24 + $0xd38] sm:$0xff]  ;;  %v564_v57 = vld [vmem:[%s3576_s24 + $0xd40] sm:$0xff] }
 0x215   : > { %3115 = vst [vmem:[%s3598_s17 + $0xcf8] sm:$0xff] %v2603_v47  ;;  %v2606_v58 = vmul.f32 0.16666667, %v2094_v51  ;;  %v2095_v59 = vmin.f32 %v1583_v52, 6.0  ;;  %v2096_v60 = vmin.f32 %v1584_v53, 6.0  ;;  %v1074_v61 = vadd.f32 3.0, %v562_v55 }
 0x216   : > { %3116 = vst [vmem:[%s3598_s17 + $0xd00] sm:$0xff] %v2604_v48  ;;  %v2097_v62 = vmin.f32 %v1585_v54, 6.0  ;;  %v1075_v63 = vadd.f32 3.0, %v563_v56  ;;  %v1076_v0 = vadd.f32 3.0, %v564_v57  ;;  %v565_v1 = vld [vmem:[%s3576_s24 + $0xd48] sm:$0xff]  ;;  %v566_v2 = vld [vmem:[%s3576_s24 + $0xd50] sm:$0xff] }
 0x217   : > { %3117 = vst [vmem:[%s3598_s17 + $0xd08] sm:$0xff] %v2605_v50  ;;  %v2607_v3 = vmul.f32 0.16666667, %v2095_v59  ;;  %v2608_v4 = vmul.f32 0.16666667, %v2096_v60  ;;  %v1586_v5 = vmax.f32 %v1074_v61, 0.0 }
 0x218   : > { %3118 = vst [vmem:[%s3598_s17 + $0xd10] sm:$0xff] %v2606_v58  ;;  %v2609_v6 = vmul.f32 0.16666667, %v2097_v62  ;;  %v1587_v7 = vmax.f32 %v1075_v63, 0.0  ;;  %v1588_v8 = vmax.f32 %v1076_v0, 0.0  ;;  %v1077_v9 = vadd.f32 3.0, %v565_v1 }
 0x219   : > { %3119 = vst [vmem:[%s3598_s17 + $0xd18] sm:$0xff] %v2607_v3  ;;  %v2098_v10 = vmin.f32 %v1586_v5, 6.0  ;;  %v1078_v11 = vadd.f32 3.0, %v566_v2  ;;  %v567_v12 = vld [vmem:[%s3576_s24 + $0xd58] sm:$0xff]  ;;  %v568_v13 = vld [vmem:[%s3576_s24 + $0xd60] sm:$0xff]  ;;  %v569_v14 = vld [vmem:[%s3576_s24 + $0xd68] sm:$0xff] }
 0x21a   : > { %3120 = vst [vmem:[%s3598_s17 + $0xd20] sm:$0xff] %v2608_v4  ;;  %v2099_v15 = vmin.f32 %v1587_v7, 6.0  ;;  %v2100_v16 = vmin.f32 %v1588_v8, 6.0  ;;  %v1589_v17 = vmax.f32 %v1077_v9, 0.0  ;;  %v1079_v18 = vadd.f32 3.0, %v567_v12  ;;  %v570_v19 = vld [vmem:[%s3576_s24 + $0xd70] sm:$0xff] }
 0x21b   : > { %3121 = vst [vmem:[%s3598_s17 + $0xd28] sm:$0xff] %v2609_v6  ;;  %v2610_v20 = vmul.f32 0.16666667, %v2098_v10  ;;  %v1590_v21 = vmax.f32 %v1078_v11, 0.0  ;;  %v1080_v22 = vadd.f32 3.0, %v568_v13  ;;  %v1081_v23 = vadd.f32 3.0, %v569_v14 }
 0x21c   : > { %v2611_v24 = vmul.f32 0.16666667, %v2099_v15  ;;  %v2612_v25 = vmul.f32 0.16666667, %v2100_v16  ;;  %v2101_v26 = vmin.f32 %v1589_v17, 6.0  ;;  %v1591_v27 = vmax.f32 %v1079_v18, 0.0 }
 0x21d   : > { %3122 = vst [vmem:[%s3598_s17 + $0xd30] sm:$0xff] %v2610_v20  ;;  %v2102_v28 = vmin.f32 %v1590_v21, 6.0  ;;  %v1592_v29 = vmax.f32 %v1080_v22, 0.0  ;;  %v1593_v30 = vmax.f32 %v1081_v23, 0.0  ;;  %v1082_v31 = vadd.f32 3.0, %v570_v19  ;;  %v571_v32 = vld [vmem:[%s3576_s24 + $0xd78] sm:$0xff] }
 0x21e   : > { %3123 = vst [vmem:[%s3598_s17 + $0xd38] sm:$0xff] %v2611_v24  ;;  %v2613_v33 = vmul.f32 0.16666667, %v2101_v26  ;;  %v2103_v34 = vmin.f32 %v1591_v27, 6.0  ;;  %v1083_v35 = vadd.f32 3.0, %v571_v32  ;;  %v572_v36 = vld [vmem:[%s3576_s24 + $0xd80] sm:$0xff] }
 0x21f   : > { %3124 = vst [vmem:[%s3598_s17 + $0xd40] sm:$0xff] %v2612_v25  ;;  %v2614_v37 = vmul.f32 0.16666667, %v2102_v28  ;;  %v2104_v38 = vmin.f32 %v1592_v29, 6.0  ;;  %v2105_v39 = vmin.f32 %v1593_v30, 6.0  ;;  %v1594_v40 = vmax.f32 %v1082_v31, 0.0 }
 0x220   : > { %3125 = vst [vmem:[%s3598_s17 + $0xd48] sm:$0xff] %v2613_v33  ;;  %v2615_v41 = vmul.f32 0.16666667, %v2103_v34  ;;  %v1595_v42 = vmax.f32 %v1083_v35, 0.0  ;;  %v1084_v43 = vadd.f32 3.0, %v572_v36  ;;  %v573_v44 = vld [vmem:[%s3576_s24 + $0xd88] sm:$0xff] }
 0x221   : > { %3126 = vst [vmem:[%s3598_s17 + $0xd50] sm:$0xff] %v2614_v37  ;;  %v2616_v45 = vmul.f32 0.16666667, %v2104_v38  ;;  %v2617_v46 = vmul.f32 0.16666667, %v2105_v39  ;;  %v2106_v47 = vmin.f32 %v1594_v40, 6.0 }
 0x222   : > { %3127 = vst [vmem:[%s3598_s17 + $0xd58] sm:$0xff] %v2615_v41  ;;  %v2107_v48 = vmin.f32 %v1595_v42, 6.0  ;;  %v1596_v49 = vmax.f32 %v1084_v43, 0.0  ;;  %v1085_v50 = vadd.f32 3.0, %v573_v44  ;;  %v574_v51 = vld [vmem:[%s3576_s24 + $0xd90] sm:$0xff]  ;;  %v575_v52 = vld [vmem:[%s3576_s24 + $0xd98] sm:$0xff] }
 0x223   : > { %3128 = vst [vmem:[%s3598_s17 + $0xd60] sm:$0xff] %v2616_v45  ;;  %v2618_v53 = vmul.f32 0.16666667, %v2106_v47  ;;  %v1086_v54 = vadd.f32 3.0, %v574_v51  ;;  %v1087_v55 = vadd.f32 3.0, %v575_v52  ;;  %v576_v56 = vld [vmem:[%s3576_s24 + $0xda0] sm:$0xff] }
 0x224   : > { %3129 = vst [vmem:[%s3598_s17 + $0xd68] sm:$0xff] %v2617_v46  ;;  %v2619_v57 = vmul.f32 0.16666667, %v2107_v48  ;;  %v2108_v58 = vmin.f32 %v1596_v49, 6.0  ;;  %v1597_v59 = vmax.f32 %v1085_v50, 0.0  ;;  %v1088_v60 = vadd.f32 3.0, %v576_v56 }
 0x225   : > { %3130 = vst [vmem:[%s3598_s17 + $0xd70] sm:$0xff] %v2618_v53  ;;  %v1598_v61 = vmax.f32 %v1086_v54, 0.0  ;;  %v1599_v62 = vmax.f32 %v1087_v55, 0.0  ;;  %v577_v63 = vld [vmem:[%s3576_s24 + $0xda8] sm:$0xff]  ;;  %v578_v0 = vld [vmem:[%s3576_s24 + $0xdb0] sm:$0xff]  ;;  %v579_v1 = vld [vmem:[%s3576_s24 + $0xdb8] sm:$0xff] }
 0x226   : > { %3131 = vst [vmem:[%s3598_s17 + $0xd78] sm:$0xff] %v2619_v57  ;;  %v2620_v2 = vmul.f32 0.16666667, %v2108_v58  ;;  %v2109_v3 = vmin.f32 %v1597_v59, 6.0  ;;  %v1600_v4 = vmax.f32 %v1088_v60, 0.0  ;;  %v1089_v5 = vadd.f32 3.0, %v577_v63 }
 0x227   : > { %v2110_v6 = vmin.f32 %v1598_v61, 6.0  ;;  %v2111_v7 = vmin.f32 %v1599_v62, 6.0  ;;  %v1090_v8 = vadd.f32 3.0, %v578_v0  ;;  %v1091_v9 = vadd.f32 3.0, %v579_v1  ;;  %v580_v10 = vld [vmem:[%s3576_s24 + $0xdc0] sm:$0xff]  ;;  %v581_v11 = vld [vmem:[%s3576_s24 + $0xdc8] sm:$0xff] }
 0x228   : > { %3132 = vst [vmem:[%s3598_s17 + $0xd80] sm:$0xff] %v2620_v2  ;;  %v2621_v12 = vmul.f32 0.16666667, %v2109_v3  ;;  %v2112_v13 = vmin.f32 %v1600_v4, 6.0  ;;  %v1601_v14 = vmax.f32 %v1089_v5, 0.0  ;;  %v1092_v15 = vadd.f32 3.0, %v580_v10 }
 0x229   : > { %v2622_v16 = vmul.f32 0.16666667, %v2110_v6  ;;  %v2623_v17 = vmul.f32 0.16666667, %v2111_v7  ;;  %v1602_v18 = vmax.f32 %v1090_v8, 0.0  ;;  %v1603_v19 = vmax.f32 %v1091_v9, 0.0 }
 0x22a   : > { %3133 = vst [vmem:[%s3598_s17 + $0xd88] sm:$0xff] %v2621_v12  ;;  %v2624_v20 = vmul.f32 0.16666667, %v2112_v13  ;;  %v2113_v21 = vmin.f32 %v1601_v14, 6.0  ;;  %v1604_v22 = vmax.f32 %v1092_v15, 0.0  ;;  %v1093_v23 = vadd.f32 3.0, %v581_v11 }
 0x22b   : > { %3134 = vst [vmem:[%s3598_s17 + $0xd90] sm:$0xff] %v2622_v16  ;;  %v2114_v24 = vmin.f32 %v1602_v18, 6.0  ;;  %v2115_v25 = vmin.f32 %v1603_v19, 6.0  ;;  %v582_v26 = vld [vmem:[%s3576_s24 + $0xdd0] sm:$0xff]  ;;  %v583_v27 = vld [vmem:[%s3576_s24 + $0xdd8] sm:$0xff]  ;;  %v584_v28 = vld [vmem:[%s3576_s24 + $0xde0] sm:$0xff] }
 0x22c   : > { %3135 = vst [vmem:[%s3598_s17 + $0xd98] sm:$0xff] %v2623_v17  ;;  %v2625_v29 = vmul.f32 0.16666667, %v2113_v21  ;;  %v2116_v30 = vmin.f32 %v1604_v22, 6.0  ;;  %v1605_v31 = vmax.f32 %v1093_v23, 0.0  ;;  %v1094_v32 = vadd.f32 3.0, %v582_v26 }
 0x22d   : > { %3136 = vst [vmem:[%s3598_s17 + $0xda0] sm:$0xff] %v2624_v20  ;;  %v2626_v33 = vmul.f32 0.16666667, %v2114_v24  ;;  %v2627_v34 = vmul.f32 0.16666667, %v2115_v25  ;;  %v1095_v35 = vadd.f32 3.0, %v583_v27 }
 0x22e   : > { %3137 = vst [vmem:[%s3598_s17 + $0xda8] sm:$0xff] %v2625_v29  ;;  %v2628_v36 = vmul.f32 0.16666667, %v2116_v30  ;;  %v2117_v37 = vmin.f32 %v1605_v31, 6.0  ;;  %v1606_v38 = vmax.f32 %v1094_v32, 0.0  ;;  %v1096_v39 = vadd.f32 3.0, %v584_v28 }
 0x22f   : > { %3138 = vst [vmem:[%s3598_s17 + $0xdb0] sm:$0xff] %v2626_v33  ;;  %v1607_v40 = vmax.f32 %v1095_v35, 0.0  ;;  %v585_v41 = vld [vmem:[%s3576_s24 + $0xde8] sm:$0xff]  ;;  %v586_v42 = vld [vmem:[%s3576_s24 + $0xdf0] sm:$0xff]  ;;  %v587_v43 = vld [vmem:[%s3576_s24 + $0xdf8] sm:$0xff] }
 0x230   : > { %3139 = vst [vmem:[%s3598_s17 + $0xdb8] sm:$0xff] %v2627_v34  ;;  %v2629_v44 = vmul.f32 0.16666667, %v2117_v37  ;;  %v2118_v45 = vmin.f32 %v1606_v38, 6.0  ;;  %v1608_v46 = vmax.f32 %v1096_v39, 0.0  ;;  %v1097_v47 = vadd.f32 3.0, %v585_v41 }
 0x231   : > { %3140 = vst [vmem:[%s3598_s17 + $0xdc0] sm:$0xff] %v2628_v36  ;;  %v2119_v48 = vmin.f32 %v1607_v40, 6.0  ;;  %v1098_v49 = vadd.f32 3.0, %v586_v42  ;;  %v1099_v50 = vadd.f32 3.0, %v587_v43  ;;  %v588_v51 = vld [vmem:[%s3576_s24 + $0xe00] sm:$0xff]  ;;  %v589_v52 = vld [vmem:[%s3576_s24 + $0xe08] sm:$0xff] }
 0x232   : > { %3141 = vst [vmem:[%s3598_s17 + $0xdc8] sm:$0xff] %v2629_v44  ;;  %v2630_v53 = vmul.f32 0.16666667, %v2118_v45  ;;  %v2120_v54 = vmin.f32 %v1608_v46, 6.0  ;;  %v1609_v55 = vmax.f32 %v1097_v47, 0.0  ;;  %v1100_v56 = vadd.f32 3.0, %v588_v51 }
 0x233   : > { %v2631_v57 = vmul.f32 0.16666667, %v2119_v48  ;;  %v1610_v58 = vmax.f32 %v1098_v49, 0.0  ;;  %v1611_v59 = vmax.f32 %v1099_v50, 0.0  ;;  %v1101_v60 = vadd.f32 3.0, %v589_v52  ;;  %v590_v61 = vld [vmem:[%s3576_s24 + $0xe10] sm:$0xff] }
 0x234   : > { %3142 = vst [vmem:[%s3598_s17 + $0xdd0] sm:$0xff] %v2630_v53  ;;  %v2632_v62 = vmul.f32 0.16666667, %v2120_v54  ;;  %v2121_v63 = vmin.f32 %v1609_v55, 6.0  ;;  %v1612_v0 = vmax.f32 %v1100_v56, 0.0  ;;  %v1102_v1 = vadd.f32 3.0, %v590_v61 }
 0x235   : > { %3143 = vst [vmem:[%s3598_s17 + $0xdd8] sm:$0xff] %v2631_v57  ;;  %v2122_v2 = vmin.f32 %v1610_v58, 6.0  ;;  %v2123_v3 = vmin.f32 %v1611_v59, 6.0  ;;  %v1613_v4 = vmax.f32 %v1101_v60, 0.0  ;;  %v591_v5 = vld [vmem:[%s3576_s24 + $0xe18] sm:$0xff]  ;;  %v592_v6 = vld [vmem:[%s3576_s24 + $0xe20] sm:$0xff] }
 0x236   : > { %3144 = vst [vmem:[%s3598_s17 + $0xde0] sm:$0xff] %v2632_v62  ;;  %v2633_v7 = vmul.f32 0.16666667, %v2121_v63  ;;  %v2124_v8 = vmin.f32 %v1612_v0, 6.0  ;;  %v1614_v9 = vmax.f32 %v1102_v1, 0.0  ;;  %v1103_v10 = vadd.f32 3.0, %v591_v5 }
 0x237   : > { %v2634_v11 = vmul.f32 0.16666667, %v2122_v2  ;;  %v2635_v12 = vmul.f32 0.16666667, %v2123_v3  ;;  %v2125_v13 = vmin.f32 %v1613_v4, 6.0  ;;  %v1104_v14 = vadd.f32 3.0, %v592_v6 }
 0x238   : > { %3145 = vst [vmem:[%s3598_s17 + $0xde8] sm:$0xff] %v2633_v7  ;;  %v2636_v15 = vmul.f32 0.16666667, %v2124_v8  ;;  %v2126_v16 = vmin.f32 %v1614_v9, 6.0  ;;  %v1615_v17 = vmax.f32 %v1103_v10, 0.0  ;;  %v593_v18 = vld [vmem:[%s3576_s24 + $0xe28] sm:$0xff] }
 0x239   : > { %3146 = vst [vmem:[%s3598_s17 + $0xdf0] sm:$0xff] %v2634_v11  ;;  %v2637_v19 = vmul.f32 0.16666667, %v2125_v13  ;;  %v1616_v20 = vmax.f32 %v1104_v14, 0.0  ;;  %v1105_v21 = vadd.f32 3.0, %v593_v18  ;;  %v594_v22 = vld [vmem:[%s3576_s24 + $0xe30] sm:$0xff] }
 0x23a   : > { %3147 = vst [vmem:[%s3598_s17 + $0xdf8] sm:$0xff] %v2635_v12  ;;  %v2638_v23 = vmul.f32 0.16666667, %v2126_v16  ;;  %v2127_v24 = vmin.f32 %v1615_v17, 6.0  ;;  %v1106_v25 = vadd.f32 3.0, %v594_v22  ;;  %v595_v26 = vld [vmem:[%s3576_s24 + $0xe38] sm:$0xff] }
 0x23b   : > { %3148 = vst [vmem:[%s3598_s17 + $0xe00] sm:$0xff] %v2636_v15  ;;  %v2128_v27 = vmin.f32 %v1616_v20, 6.0  ;;  %v1617_v28 = vmax.f32 %v1105_v21, 0.0  ;;  %v1107_v29 = vadd.f32 3.0, %v595_v26  ;;  %v596_v30 = vld [vmem:[%s3576_s24 + $0xe40] sm:$0xff]  ;;  %v597_v31 = vld [vmem:[%s3576_s24 + $0xe48] sm:$0xff] }
 0x23c   : > { %3149 = vst [vmem:[%s3598_s17 + $0xe08] sm:$0xff] %v2637_v19  ;;  %v2639_v32 = vmul.f32 0.16666667, %v2127_v24  ;;  %v1618_v33 = vmax.f32 %v1106_v25, 0.0  ;;  %v1108_v34 = vadd.f32 3.0, %v596_v30  ;;  %v1109_v35 = vadd.f32 3.0, %v597_v31 }
 0x23d   : > { %3150 = vst [vmem:[%s3598_s17 + $0xe10] sm:$0xff] %v2638_v23  ;;  %v2640_v36 = vmul.f32 0.16666667, %v2128_v27  ;;  %v2129_v37 = vmin.f32 %v1617_v28, 6.0  ;;  %v1619_v38 = vmax.f32 %v1107_v29, 0.0  ;;  %v598_v39 = vld [vmem:[%s3576_s24 + $0xe50] sm:$0xff] }
 0x23e   : > { %3151 = vst [vmem:[%s3598_s17 + $0xe18] sm:$0xff] %v2639_v32  ;;  %v2130_v40 = vmin.f32 %v1618_v33, 6.0  ;;  %v1620_v41 = vmax.f32 %v1108_v34, 0.0  ;;  %v1621_v42 = vmax.f32 %v1109_v35, 0.0  ;;  %v1110_v43 = vadd.f32 3.0, %v598_v39  ;;  %v599_v44 = vld [vmem:[%s3576_s24 + $0xe58] sm:$0xff] }
 0x23f   : > { %3152 = vst [vmem:[%s3598_s17 + $0xe20] sm:$0xff] %v2640_v36  ;;  %v2641_v45 = vmul.f32 0.16666667, %v2129_v37  ;;  %v2131_v46 = vmin.f32 %v1619_v38, 6.0  ;;  %v1111_v47 = vadd.f32 3.0, %v599_v44  ;;  %v600_v48 = vld [vmem:[%s3576_s24 + $0xe60] sm:$0xff] }
 0x240   : > { %v2642_v49 = vmul.f32 0.16666667, %v2130_v40  ;;  %v2132_v50 = vmin.f32 %v1620_v41, 6.0  ;;  %v2133_v51 = vmin.f32 %v1621_v42, 6.0  ;;  %v1622_v52 = vmax.f32 %v1110_v43, 0.0  ;;  %v601_v53 = vld [vmem:[%s3576_s24 + $0xe68] sm:$0xff] }
 0x241   : > { %3153 = vst [vmem:[%s3598_s17 + $0xe28] sm:$0xff] %v2641_v45  ;;  %v2643_v54 = vmul.f32 0.16666667, %v2131_v46  ;;  %v1623_v55 = vmax.f32 %v1111_v47, 0.0  ;;  %v1112_v56 = vadd.f32 3.0, %v600_v48  ;;  %v1113_v57 = vadd.f32 3.0, %v601_v53 }
 0x242   : > { %3154 = vst [vmem:[%s3598_s17 + $0xe30] sm:$0xff] %v2642_v49  ;;  %v2644_v58 = vmul.f32 0.16666667, %v2132_v50  ;;  %v2645_v59 = vmul.f32 0.16666667, %v2133_v51  ;;  %v2134_v60 = vmin.f32 %v1622_v52, 6.0 }
 0x243   : > { %3155 = vst [vmem:[%s3598_s17 + $0xe38] sm:$0xff] %v2643_v54  ;;  %v2135_v61 = vmin.f32 %v1623_v55, 6.0  ;;  %v1624_v62 = vmax.f32 %v1112_v56, 0.0  ;;  %v1625_v63 = vmax.f32 %v1113_v57, 0.0  ;;  %v602_v0 = vld [vmem:[%s3576_s24 + $0xe70] sm:$0xff]  ;;  %v603_v1 = vld [vmem:[%s3576_s24 + $0xe78] sm:$0xff] }
 0x244   : > { %3156 = vst [vmem:[%s3598_s17 + $0xe40] sm:$0xff] %v2644_v58  ;;  %v2646_v2 = vmul.f32 0.16666667, %v2134_v60  ;;  %v1114_v3 = vadd.f32 3.0, %v602_v0  ;;  %v1115_v4 = vadd.f32 3.0, %v603_v1  ;;  %v604_v5 = vld [vmem:[%s3576_s24 + $0xe80] sm:$0xff] }
 0x245   : > { %3157 = vst [vmem:[%s3598_s17 + $0xe48] sm:$0xff] %v2645_v59  ;;  %v2647_v6 = vmul.f32 0.16666667, %v2135_v61  ;;  %v2136_v7 = vmin.f32 %v1624_v62, 6.0  ;;  %v2137_v8 = vmin.f32 %v1625_v63, 6.0  ;;  %v1116_v9 = vadd.f32 3.0, %v604_v5 }
 0x246   : > { %3158 = vst [vmem:[%s3598_s17 + $0xe50] sm:$0xff] %v2646_v2  ;;  %v1626_v10 = vmax.f32 %v1114_v3, 0.0  ;;  %v1627_v11 = vmax.f32 %v1115_v4, 0.0  ;;  %v605_v12 = vld [vmem:[%s3576_s24 + $0xe88] sm:$0xff]  ;;  %v606_v13 = vld [vmem:[%s3576_s24 + $0xe90] sm:$0xff]  ;;  %v607_v14 = vld [vmem:[%s3576_s24 + $0xe98] sm:$0xff] }
 0x247   : > { %3159 = vst [vmem:[%s3598_s17 + $0xe58] sm:$0xff] %v2647_v6  ;;  %v2648_v15 = vmul.f32 0.16666667, %v2136_v7  ;;  %v2649_v16 = vmul.f32 0.16666667, %v2137_v8  ;;  %v1628_v17 = vmax.f32 %v1116_v9, 0.0 }
 0x248   : > { %v2138_v18 = vmin.f32 %v1626_v10, 6.0  ;;  %v2139_v19 = vmin.f32 %v1627_v11, 6.0  ;;  %v1117_v20 = vadd.f32 3.0, %v605_v12  ;;  %v1118_v21 = vadd.f32 3.0, %v606_v13  ;;  %v608_v22 = vld [vmem:[%s3576_s24 + $0xea0] sm:$0xff]  ;;  %v609_v23 = vld [vmem:[%s3576_s24 + $0xea8] sm:$0xff] }
 0x249   : > { %3160 = vst [vmem:[%s3598_s17 + $0xe60] sm:$0xff] %v2648_v15  ;;  %v2140_v24 = vmin.f32 %v1628_v17, 6.0  ;;  %v1119_v25 = vadd.f32 3.0, %v607_v14  ;;  %v1120_v26 = vadd.f32 3.0, %v608_v22  ;;  %v1121_v27 = vadd.f32 3.0, %v609_v23  ;;  %v610_v28 = vld [vmem:[%s3576_s24 + $0xeb0] sm:$0xff] }
 0x24a   : > { %3161 = vst [vmem:[%s3598_s17 + $0xe68] sm:$0xff] %v2649_v16  ;;  %v2650_v29 = vmul.f32 0.16666667, %v2138_v18  ;;  %v2651_v30 = vmul.f32 0.16666667, %v2139_v19  ;;  %v1629_v31 = vmax.f32 %v1117_v20, 0.0 }
 0x24b   : > { %v2652_v32 = vmul.f32 0.16666667, %v2140_v24  ;;  %v1630_v33 = vmax.f32 %v1118_v21, 0.0  ;;  %v1631_v34 = vmax.f32 %v1119_v25, 0.0  ;;  %v1632_v35 = vmax.f32 %v1120_v26, 0.0  ;;  %v611_v36 = vld [vmem:[%s3576_s24 + $0xeb8] sm:$0xff] }
 0x24c   : > { %3162 = vst [vmem:[%s3598_s17 + $0xe70] sm:$0xff] %v2650_v29  ;;  %v2141_v37 = vmin.f32 %v1629_v31, 6.0  ;;  %v1633_v38 = vmax.f32 %v1121_v27, 0.0  ;;  %v1122_v39 = vadd.f32 3.0, %v610_v28  ;;  %v1123_v40 = vadd.f32 3.0, %v611_v36  ;;  %v612_v41 = vld [vmem:[%s3576_s24 + $0xec0] sm:$0xff] }
 0x24d   : > { %3163 = vst [vmem:[%s3598_s17 + $0xe78] sm:$0xff] %v2651_v30  ;;  %v2142_v42 = vmin.f32 %v1630_v33, 6.0  ;;  %v2143_v43 = vmin.f32 %v1631_v34, 6.0  ;;  %v2144_v44 = vmin.f32 %v1632_v35, 6.0  ;;  %v1124_v45 = vadd.f32 3.0, %v612_v41  ;;  %v613_v46 = vld [vmem:[%s3576_s24 + $0xec8] sm:$0xff] }
 0x24e   : > { %3164 = vst [vmem:[%s3598_s17 + $0xe80] sm:$0xff] %v2652_v32  ;;  %v2653_v47 = vmul.f32 0.16666667, %v2141_v37  ;;  %v2145_v48 = vmin.f32 %v1633_v38, 6.0  ;;  %v1634_v49 = vmax.f32 %v1122_v39, 0.0  ;;  %v1635_v50 = vmax.f32 %v1123_v40, 0.0 }
 0x24f   : > { %v2654_v51 = vmul.f32 0.16666667, %v2142_v42  ;;  %v2655_v52 = vmul.f32 0.16666667, %v2143_v43  ;;  %v2656_v53 = vmul.f32 0.16666667, %v2144_v44 }
 0x250   : > { %3165 = vst [vmem:[%s3598_s17 + $0xe88] sm:$0xff] %v2653_v47  ;;  %v2657_v54 = vmul.f32 0.16666667, %v2145_v48  ;;  %v2146_v55 = vmin.f32 %v1634_v49, 6.0  ;;  %v2147_v56 = vmin.f32 %v1635_v50, 6.0  ;;  %v1636_v57 = vmax.f32 %v1124_v45, 0.0 }
 0x251   : > { %3166 = vst [vmem:[%s3598_s17 + $0xe90] sm:$0xff] %v2654_v51  ;;  %v1125_v58 = vadd.f32 3.0, %v613_v46  ;;  %v614_v59 = vld [vmem:[%s3576_s24 + $0xed0] sm:$0xff]  ;;  %v615_v60 = vld [vmem:[%s3576_s24 + $0xed8] sm:$0xff]  ;;  %v616_v61 = vld [vmem:[%s3576_s24 + $0xee0] sm:$0xff] }
 0x252   : > { %3167 = vst [vmem:[%s3598_s17 + $0xe98] sm:$0xff] %v2655_v52  ;;  %v2658_v62 = vmul.f32 0.16666667, %v2146_v55  ;;  %v2659_v63 = vmul.f32 0.16666667, %v2147_v56  ;;  %v2148_v0 = vmin.f32 %v1636_v57, 6.0 }
 0x253   : > { %3168 = vst [vmem:[%s3598_s17 + $0xea0] sm:$0xff] %v2656_v53  ;;  %v1637_v1 = vmax.f32 %v1125_v58, 0.0  ;;  %v1126_v2 = vadd.f32 3.0, %v614_v59  ;;  %v1127_v3 = vadd.f32 3.0, %v615_v60  ;;  %v1128_v4 = vadd.f32 3.0, %v616_v61  ;;  %v617_v5 = vld [vmem:[%s3576_s24 + $0xee8] sm:$0xff] }
 0x254   : > { %3169 = vst [vmem:[%s3598_s17 + $0xea8] sm:$0xff] %v2657_v54  ;;  %v2660_v6 = vmul.f32 0.16666667, %v2148_v0  ;;  %v1129_v7 = vadd.f32 3.0, %v617_v5  ;;  %v618_v8 = vld [vmem:[%s3576_s24 + $0xef0] sm:$0xff]  ;;  %v619_v9 = vld [vmem:[%s3576_s24 + $0xef8] sm:$0xff] }
 0x255   : > { %3170 = vst [vmem:[%s3598_s17 + $0xeb0] sm:$0xff] %v2658_v62  ;;  %v2149_v10 = vmin.f32 %v1637_v1, 6.0  ;;  %v1638_v11 = vmax.f32 %v1126_v2, 0.0  ;;  %v1639_v12 = vmax.f32 %v1127_v3, 0.0  ;;  %v1640_v13 = vmax.f32 %v1128_v4, 0.0  ;;  %v620_v14 = vld [vmem:[%s3576_s24 + $0xf00] sm:$0xff] }
 0x256   : > { %3171 = vst [vmem:[%s3598_s17 + $0xeb8] sm:$0xff] %v2659_v63  ;;  %v1641_v15 = vmax.f32 %v1129_v7, 0.0  ;;  %v1130_v16 = vadd.f32 3.0, %v618_v8  ;;  %v1131_v17 = vadd.f32 3.0, %v619_v9  ;;  %v1132_v18 = vadd.f32 3.0, %v620_v14  ;;  %v621_v19 = vld [vmem:[%s3576_s24 + $0xf08] sm:$0xff] }
 0x257   : > { %3172 = vst [vmem:[%s3598_s17 + $0xec0] sm:$0xff] %v2660_v6  ;;  %v2661_v20 = vmul.f32 0.16666667, %v2149_v10  ;;  %v2150_v21 = vmin.f32 %v1638_v11, 6.0  ;;  %v2151_v22 = vmin.f32 %v1639_v12, 6.0  ;;  %v2152_v23 = vmin.f32 %v1640_v13, 6.0 }
 0x258   : > { %v2153_v24 = vmin.f32 %v1641_v15, 6.0  ;;  %v1642_v25 = vmax.f32 %v1130_v16, 0.0  ;;  %v1643_v26 = vmax.f32 %v1131_v17, 0.0  ;;  %v1644_v27 = vmax.f32 %v1132_v18, 0.0  ;;  %v622_v28 = vld [vmem:[%s3576_s24 + $0xf10] sm:$0xff]  ;;  %v623_v29 = vld [vmem:[%s3576_s24 + $0xf18] sm:$0xff] }
 0x259   : > { %3173 = vst [vmem:[%s3598_s17 + $0xec8] sm:$0xff] %v2661_v20  ;;  %v2662_v30 = vmul.f32 0.16666667, %v2150_v21  ;;  %v2663_v31 = vmul.f32 0.16666667, %v2151_v22  ;;  %v1133_v32 = vadd.f32 3.0, %v621_v19 }
 0x25a   : > { %v2664_v33 = vmul.f32 0.16666667, %v2152_v23  ;;  %v2665_v34 = vmul.f32 0.16666667, %v2153_v24  ;;  %v2154_v35 = vmin.f32 %v1642_v25, 6.0  ;;  %v2155_v36 = vmin.f32 %v1643_v26, 6.0 }
 0x25b   : > { %3174 = vst [vmem:[%s3598_s17 + $0xed0] sm:$0xff] %v2662_v30  ;;  %v2156_v37 = vmin.f32 %v1644_v27, 6.0  ;;  %v1645_v38 = vmax.f32 %v1133_v32, 0.0  ;;  %v1134_v39 = vadd.f32 3.0, %v622_v28  ;;  %v1135_v40 = vadd.f32 3.0, %v623_v29  ;;  %v624_v41 = vld [vmem:[%s3576_s24 + $0xf20] sm:$0xff] }
 0x25c   : > { %3175 = vst [vmem:[%s3598_s17 + $0xed8] sm:$0xff] %v2663_v31  ;;  %v2666_v42 = vmul.f32 0.16666667, %v2154_v35  ;;  %v2667_v43 = vmul.f32 0.16666667, %v2155_v36  ;;  %v1136_v44 = vadd.f32 3.0, %v624_v41 }
 0x25d   : > { %3176 = vst [vmem:[%s3598_s17 + $0xee0] sm:$0xff] %v2664_v33  ;;  %v2668_v45 = vmul.f32 0.16666667, %v2156_v37  ;;  %v2157_v46 = vmin.f32 %v1645_v38, 6.0  ;;  %v1646_v47 = vmax.f32 %v1134_v39, 0.0  ;;  %v1647_v48 = vmax.f32 %v1135_v40, 0.0 }
 0x25e   : > { %3177 = vst [vmem:[%s3598_s17 + $0xee8] sm:$0xff] %v2665_v34  ;;  %v1648_v49 = vmax.f32 %v1136_v44, 0.0  ;;  %v625_v50 = vld [vmem:[%s3576_s24 + $0xf28] sm:$0xff]  ;;  %v626_v51 = vld [vmem:[%s3576_s24 + $0xf30] sm:$0xff]  ;;  %v627_v52 = vld [vmem:[%s3576_s24 + $0xf38] sm:$0xff] }
 0x25f   : > { %3178 = vst [vmem:[%s3598_s17 + $0xef0] sm:$0xff] %v2666_v42  ;;  %v2669_v53 = vmul.f32 0.16666667, %v2157_v46  ;;  %v2158_v54 = vmin.f32 %v1646_v47, 6.0  ;;  %v2159_v55 = vmin.f32 %v1647_v48, 6.0  ;;  %v1137_v56 = vadd.f32 3.0, %v625_v50 }
 0x260   : > { %3179 = vst [vmem:[%s3598_s17 + $0xef8] sm:$0xff] %v2667_v43  ;;  %v2160_v57 = vmin.f32 %v1648_v49, 6.0  ;;  %v1138_v58 = vadd.f32 3.0, %v626_v51  ;;  %v1139_v59 = vadd.f32 3.0, %v627_v52  ;;  %v628_v60 = vld [vmem:[%s3576_s24 + $0xf40] sm:$0xff]  ;;  %v629_v61 = vld [vmem:[%s3576_s24 + $0xf48] sm:$0xff] }
 0x261   : > { %3180 = vst [vmem:[%s3598_s17 + $0xf00] sm:$0xff] %v2668_v45  ;;  %v2670_v62 = vmul.f32 0.16666667, %v2158_v54  ;;  %v2671_v63 = vmul.f32 0.16666667, %v2159_v55  ;;  %v1649_v0 = vmax.f32 %v1137_v56, 0.0 }
 0x262   : > { %3181 = vst [vmem:[%s3598_s17 + $0xf08] sm:$0xff] %v2669_v53  ;;  %v2672_v1 = vmul.f32 0.16666667, %v2160_v57  ;;  %v1650_v2 = vmax.f32 %v1138_v58, 0.0  ;;  %v1651_v3 = vmax.f32 %v1139_v59, 0.0  ;;  %v1140_v4 = vadd.f32 3.0, %v628_v60 }
 0x263   : > { %3182 = vst [vmem:[%s3598_s17 + $0xf10] sm:$0xff] %v2670_v62  ;;  %v2161_v5 = vmin.f32 %v1649_v0, 6.0  ;;  %v1141_v6 = vadd.f32 3.0, %v629_v61  ;;  %v630_v7 = vld [vmem:[%s3576_s24 + $0xf50] sm:$0xff]  ;;  %v631_v8 = vld [vmem:[%s3576_s24 + $0xf58] sm:$0xff]  ;;  %v632_v9 = vld [vmem:[%s3576_s24 + $0xf60] sm:$0xff] }
 0x264   : > { %3183 = vst [vmem:[%s3598_s17 + $0xf18] sm:$0xff] %v2671_v63  ;;  %v2162_v10 = vmin.f32 %v1650_v2, 6.0  ;;  %v2163_v11 = vmin.f32 %v1651_v3, 6.0  ;;  %v1652_v12 = vmax.f32 %v1140_v4, 0.0  ;;  %v1142_v13 = vadd.f32 3.0, %v630_v7  ;;  %v633_v14 = vld [vmem:[%s3576_s24 + $0xf68] sm:$0xff] }
 0x265   : > { %3184 = vst [vmem:[%s3598_s17 + $0xf20] sm:$0xff] %v2672_v1  ;;  %v2673_v15 = vmul.f32 0.16666667, %v2161_v5  ;;  %v1653_v16 = vmax.f32 %v1141_v6, 0.0  ;;  %v1143_v17 = vadd.f32 3.0, %v631_v8  ;;  %v1144_v18 = vadd.f32 3.0, %v632_v9 }
 0x266   : > { %v2674_v19 = vmul.f32 0.16666667, %v2162_v10  ;;  %v2675_v20 = vmul.f32 0.16666667, %v2163_v11  ;;  %v2164_v21 = vmin.f32 %v1652_v12, 6.0  ;;  %v1654_v22 = vmax.f32 %v1142_v13, 0.0 }
 0x267   : > { %3185 = vst [vmem:[%s3598_s17 + $0xf28] sm:$0xff] %v2673_v15  ;;  %v2165_v23 = vmin.f32 %v1653_v16, 6.0  ;;  %v1655_v24 = vmax.f32 %v1143_v17, 0.0  ;;  %v1656_v25 = vmax.f32 %v1144_v18, 0.0  ;;  %v1145_v26 = vadd.f32 3.0, %v633_v14  ;;  %v634_v27 = vld [vmem:[%s3576_s24 + $0xf70] sm:$0xff] }
 0x268   : > { %3186 = vst [vmem:[%s3598_s17 + $0xf30] sm:$0xff] %v2674_v19  ;;  %v2676_v28 = vmul.f32 0.16666667, %v2164_v21  ;;  %v2166_v29 = vmin.f32 %v1654_v22, 6.0  ;;  %v1146_v30 = vadd.f32 3.0, %v634_v27  ;;  %v635_v31 = vld [vmem:[%s3576_s24 + $0xf78] sm:$0xff] }
 0x269   : > { %3187 = vst [vmem:[%s3598_s17 + $0xf38] sm:$0xff] %v2675_v20  ;;  %v2677_v32 = vmul.f32 0.16666667, %v2165_v23  ;;  %v2167_v33 = vmin.f32 %v1655_v24, 6.0  ;;  %v2168_v34 = vmin.f32 %v1656_v25, 6.0  ;;  %v1657_v35 = vmax.f32 %v1145_v26, 0.0 }
 0x26a   : > { %3188 = vst [vmem:[%s3598_s17 + $0xf40] sm:$0xff] %v2676_v28  ;;  %v2678_v36 = vmul.f32 0.16666667, %v2166_v29  ;;  %v1658_v37 = vmax.f32 %v1146_v30, 0.0  ;;  %v1147_v38 = vadd.f32 3.0, %v635_v31  ;;  %v636_v39 = vld [vmem:[%s3576_s24 + $0xf80] sm:$0xff] }
 0x26b   : > { %3189 = vst [vmem:[%s3598_s17 + $0xf48] sm:$0xff] %v2677_v32  ;;  %v2679_v40 = vmul.f32 0.16666667, %v2167_v33  ;;  %v2680_v41 = vmul.f32 0.16666667, %v2168_v34  ;;  %v2169_v42 = vmin.f32 %v1657_v35, 6.0 }
 0x26c   : > { %3190 = vst [vmem:[%s3598_s17 + $0xf50] sm:$0xff] %v2678_v36  ;;  %v2170_v43 = vmin.f32 %v1658_v37, 6.0  ;;  %v1659_v44 = vmax.f32 %v1147_v38, 0.0  ;;  %v1148_v45 = vadd.f32 3.0, %v636_v39  ;;  %v637_v46 = vld [vmem:[%s3576_s24 + $0xf88] sm:$0xff]  ;;  %v638_v47 = vld [vmem:[%s3576_s24 + $0xf90] sm:$0xff] }
 0x26d   : > { %3191 = vst [vmem:[%s3598_s17 + $0xf58] sm:$0xff] %v2679_v40  ;;  %v2681_v48 = vmul.f32 0.16666667, %v2169_v42  ;;  %v1149_v49 = vadd.f32 3.0, %v637_v46  ;;  %v1150_v50 = vadd.f32 3.0, %v638_v47  ;;  %v639_v51 = vld [vmem:[%s3576_s24 + $0xf98] sm:$0xff] }
 0x26e   : > { %3192 = vst [vmem:[%s3598_s17 + $0xf60] sm:$0xff] %v2680_v41  ;;  %v2682_v52 = vmul.f32 0.16666667, %v2170_v43  ;;  %v2171_v53 = vmin.f32 %v1659_v44, 6.0  ;;  %v1660_v54 = vmax.f32 %v1148_v45, 0.0  ;;  %v1151_v55 = vadd.f32 3.0, %v639_v51 }
 0x26f   : > { %3193 = vst [vmem:[%s3598_s17 + $0xf68] sm:$0xff] %v2681_v48  ;;  %v1661_v56 = vmax.f32 %v1149_v49, 0.0  ;;  %v1662_v57 = vmax.f32 %v1150_v50, 0.0  ;;  %v640_v58 = vld [vmem:[%s3576_s24 + $0xfa0] sm:$0xff]  ;;  %v641_v59 = vld [vmem:[%s3576_s24 + $0xfa8] sm:$0xff]  ;;  %v642_v60 = vld [vmem:[%s3576_s24 + $0xfb0] sm:$0xff] }
 0x270   : > { %3194 = vst [vmem:[%s3598_s17 + $0xf70] sm:$0xff] %v2682_v52  ;;  %v2683_v61 = vmul.f32 0.16666667, %v2171_v53  ;;  %v2172_v62 = vmin.f32 %v1660_v54, 6.0  ;;  %v1663_v63 = vmax.f32 %v1151_v55, 0.0  ;;  %v1152_v0 = vadd.f32 3.0, %v640_v58 }
 0x271   : > { %v2173_v1 = vmin.f32 %v1661_v56, 6.0  ;;  %v2174_v2 = vmin.f32 %v1662_v57, 6.0  ;;  %v1153_v3 = vadd.f32 3.0, %v641_v59  ;;  %v1154_v4 = vadd.f32 3.0, %v642_v60  ;;  %v643_v5 = vld [vmem:[%s3576_s24 + $0xfb8] sm:$0xff]  ;;  %v644_v6 = vld [vmem:[%s3576_s24 + $0xfc0] sm:$0xff] }
 0x272   : > { %3195 = vst [vmem:[%s3598_s17 + $0xf78] sm:$0xff] %v2683_v61  ;;  %v2684_v7 = vmul.f32 0.16666667, %v2172_v62  ;;  %v2175_v8 = vmin.f32 %v1663_v63, 6.0  ;;  %v1664_v9 = vmax.f32 %v1152_v0, 0.0  ;;  %v1155_v10 = vadd.f32 3.0, %v643_v5 }
 0x273   : > { %v2685_v11 = vmul.f32 0.16666667, %v2173_v1  ;;  %v2686_v12 = vmul.f32 0.16666667, %v2174_v2  ;;  %v1665_v13 = vmax.f32 %v1153_v3, 0.0  ;;  %v1666_v14 = vmax.f32 %v1154_v4, 0.0 }
 0x274   : > { %3196 = vst [vmem:[%s3598_s17 + $0xf80] sm:$0xff] %v2684_v7  ;;  %v2687_v15 = vmul.f32 0.16666667, %v2175_v8  ;;  %v2176_v16 = vmin.f32 %v1664_v9, 6.0  ;;  %v1667_v17 = vmax.f32 %v1155_v10, 0.0  ;;  %v1156_v18 = vadd.f32 3.0, %v644_v6 }
 0x275   : > { %3197 = vst [vmem:[%s3598_s17 + $0xf88] sm:$0xff] %v2685_v11  ;;  %v2177_v19 = vmin.f32 %v1665_v13, 6.0  ;;  %v2178_v20 = vmin.f32 %v1666_v14, 6.0  ;;  %v645_v21 = vld [vmem:[%s3576_s24 + $0xfc8] sm:$0xff]  ;;  %v646_v22 = vld [vmem:[%s3576_s24 + $0xfd0] sm:$0xff]  ;;  %v647_v23 = vld [vmem:[%s3576_s24 + $0xfd8] sm:$0xff] }
 0x276   : > { %3198 = vst [vmem:[%s3598_s17 + $0xf90] sm:$0xff] %v2686_v12  ;;  %v2688_v24 = vmul.f32 0.16666667, %v2176_v16  ;;  %v2179_v25 = vmin.f32 %v1667_v17, 6.0  ;;  %v1668_v26 = vmax.f32 %v1156_v18, 0.0  ;;  %v1157_v27 = vadd.f32 3.0, %v645_v21 }
 0x277   : > { %3199 = vst [vmem:[%s3598_s17 + $0xf98] sm:$0xff] %v2687_v15  ;;  %v2689_v28 = vmul.f32 0.16666667, %v2177_v19  ;;  %v2690_v29 = vmul.f32 0.16666667, %v2178_v20  ;;  %v1158_v30 = vadd.f32 3.0, %v646_v22 }
 0x278   : > { %3200 = vst [vmem:[%s3598_s17 + $0xfa0] sm:$0xff] %v2688_v24  ;;  %v2691_v31 = vmul.f32 0.16666667, %v2179_v25  ;;  %v2180_v32 = vmin.f32 %v1668_v26, 6.0  ;;  %v1669_v33 = vmax.f32 %v1157_v27, 0.0  ;;  %v1159_v34 = vadd.f32 3.0, %v647_v23 }
 0x279   : > { %3201 = vst [vmem:[%s3598_s17 + $0xfa8] sm:$0xff] %v2689_v28  ;;  %v1670_v35 = vmax.f32 %v1158_v30, 0.0  ;;  %v648_v36 = vld [vmem:[%s3576_s24 + $0xfe0] sm:$0xff]  ;;  %v649_v37 = vld [vmem:[%s3576_s24 + $0xfe8] sm:$0xff]  ;;  %v650_v38 = vld [vmem:[%s3576_s24 + $0xff0] sm:$0xff] }
 0x27a   : > { %3202 = vst [vmem:[%s3598_s17 + $0xfb0] sm:$0xff] %v2690_v29  ;;  %v2692_v39 = vmul.f32 0.16666667, %v2180_v32  ;;  %v2181_v40 = vmin.f32 %v1669_v33, 6.0  ;;  %v1671_v41 = vmax.f32 %v1159_v34, 0.0  ;;  %v1160_v42 = vadd.f32 3.0, %v648_v36 }
 0x27b   : > { %3203 = vst [vmem:[%s3598_s17 + $0xfb8] sm:$0xff] %v2691_v31  ;;  %v2182_v43 = vmin.f32 %v1670_v35, 6.0  ;;  %v1161_v44 = vadd.f32 3.0, %v649_v37  ;;  %v1162_v45 = vadd.f32 3.0, %v650_v38  ;;  %v651_v46 = vld [vmem:[%s3576_s24 + $0xff8] sm:$0xff] }
 0x27c   : > { %3204 = vst [vmem:[%s3598_s17 + $0xfc0] sm:$0xff] %v2692_v39  ;;  %v2693_v47 = vmul.f32 0.16666667, %v2181_v40  ;;  %v2183_v48 = vmin.f32 %v1671_v41, 6.0  ;;  %v1672_v49 = vmax.f32 %v1160_v42, 0.0  ;;  %v1163_v50 = vadd.f32 3.0, %v651_v46 }
 0x27d   : > { %v2694_v51 = vmul.f32 0.16666667, %v2182_v43  ;;  %v1673_v52 = vmax.f32 %v1161_v44, 0.0  ;;  %v1674_v53 = vmax.f32 %v1162_v45, 0.0 }
 0x27e   : > { %3205 = vst [vmem:[%s3598_s17 + $0xfc8] sm:$0xff] %v2693_v47  ;;  %v2695_v54 = vmul.f32 0.16666667, %v2183_v48  ;;  %v2184_v55 = vmin.f32 %v1672_v49, 6.0  ;;  %v1675_v56 = vmax.f32 %v1163_v50, 0.0 }
 0x27f   : > { %3206 = vst [vmem:[%s3598_s17 + $0xfd0] sm:$0xff] %v2694_v51  ;;  %v2185_v57 = vmin.f32 %v1673_v52, 6.0  ;;  %v2186_v58 = vmin.f32 %v1674_v53, 6.0 }
 0x280   : > { %3207 = vst [vmem:[%s3598_s17 + $0xfd8] sm:$0xff] %v2695_v54  ;;  %v2696_v59 = vmul.f32 0.16666667, %v2184_v55  ;;  %v2187_v60 = vmin.f32 %v1675_v56, 6.0 }
 0x281   : > { %v2697_v61 = vmul.f32 0.16666667, %v2185_v57  ;;  %v2698_v62 = vmul.f32 0.16666667, %v2186_v58 }
 0x282   : > { %3208 = vst [vmem:[%s3598_s17 + $0xfe0] sm:$0xff] %v2696_v59  ;;  %v2699_v63 = vmul.f32 0.16666667, %v2187_v60 }
 0x283   : > { %3209 = vst [vmem:[%s3598_s17 + $0xfe8] sm:$0xff] %v2697_v61 }
 0x284   : > { %3210 = vst [vmem:[%s3598_s17 + $0xff0] sm:$0xff] %v2698_v62 }
 0x285   : > { %3211 = vst [vmem:[%s3598_s17 + $0xff8] sm:$0xff] %v2699_v63 }
 0x286   : > { %3429 = shalt.err (!%p3426_p4)
}
 0x287   : > { %s3472_s16 = smov 4096   ;;  %s3473_s20 = smov 256  }
 0x288   : > { %3324 = dma.vmem_to_hbm [thread:$0]  (%p3534_p11), %s3227_s28, 65536, %s3229_s29, %s3213_s30, %s3472_s16, %s3472_s16, %s3473_s20  }
 0x289 PF: > { %s3243_s21 = sand.u32 1, %s3456_s6   ;;  %p4651_p7 = scmp.ge.s32.totalorder %s3468_s9, 2 }
 0x28a   : > { %s3244_s22 = scalar_lea.sflag [#allocation4], %s3243_s21 }
 0x28b   : > { %p3331_p5 = pnand %p4651_p7, %p3538_p12 }
 0x28d   : > { %p3332_p8 = pneg %p3331_p5 }
 0x28f   : > { %3451 = dma.done.wait (%p3332_p8), %s3244_s22, 65536  }
 0x290   : > { %3453 = vsyncadd (%p3332_p8), %s3244_s22, 4294901760  ;;  %p14_p10 = scmp.ge.s32.totalorder %s3509_s12, 4   ;;  %s4652_s6 = smov %s3460_s7 }
 0x291   : > { %s4653_s7 = smov %s3464_s8  ;;  %s4654_s8 = smov %s3521_s15 }
 0x292   : > { %s4655_s9 = smov %s3509_s12  ;;  %16 = sbr.rel (!%p14_p10) target bundleno = 5 (0x5), region = 69 }
 0x297   :  { %3250 = vsyncpa [#allocation3], 1 }
 0x298   :  { %3252 = vsyncpa [#allocation3 + $0x1], 1 }
 0x299   :  { %3253 = vsyncpa [#allocation4], 1 }
 0x29a   :  { %3255 = vsyncpa [#allocation4 + $0x1], 1 }

</bundles_post_ra>
